<compile_context>
chip_gen: v6e
topology: v6e:2x2x1
jax: 0.10.0
libtpu: 0.0.40
codegen_flags: <defaults>
</compile_context>

<pallas_src>
import jax
import jax.numpy as jnp
from jax import lax
from jax.experimental import pallas as pl
from jax.experimental.pallas import tpu as pltpu

# Small shapes consistent with the module (char_emb_dim=E, hidden_dim=H).
T, N, E, H, V = 8, 8, 32, 32, 64   # seq len, batch (num actions), emb, hidden, vocab
G = 4 * H                          # gate width per direction


def _lstm_step(xc, h, c, whh_t):
    """LSTM cell update; input contribution + biases already folded into xc.

    Gate column order is (i, f, o, g) so one sigmoid covers lanes [:3H] and
    one tanh covers lanes [3H:]."""
    gates = xc + jnp.dot(h, whh_t, preferred_element_type=jnp.float32)
    ifo = jax.nn.sigmoid(gates[:, :3 * H])
    g = jnp.tanh(gates[:, 3 * H:])
    i = ifo[:, 0 * H:1 * H]
    f = ifo[:, 1 * H:2 * H]
    o = ifo[:, 2 * H:3 * H]
    c_new = f * c + i * g
    h_new = o * jnp.tanh(c_new)
    return h_new, c_new


def state_rnn_value_kernel(
        x_ref,                       # (T*N, E)  seq-major embedded input, flattened
        wih0_ref, b0_ref,            # (E, 8H), (1, 8H)   layer 0 [fwd | bwd]
        whh0f_ref, whh0b_ref,        # (H, 4H) each
        wih1_ref, b1_ref,            # (2H, 8H), (1, 8H)  layer 1 [fwd | bwd]
        whh1f_ref, whh1b_ref,        # (H, 4H) each
        wout_ref,                    # (1, 2H)  output head: fwd lanes | bwd lanes
        bout_ref,                    # (1, 1)   output bias (SMEM scalar)
        q_ref,                       # (N, 1)   output
        xc0_ref, seq0_ref, xc1_ref): # scratch: (T*N,8H), (T*N,2H), (T*N,8H)
    zeros = jnp.zeros((N, H), jnp.float32)

    # ---- hoisted layer-0 input projection (both directions) + biases ----
    xc0_ref[...] = (jnp.dot(x_ref[...], wih0_ref[...],
                            preferred_element_type=jnp.float32) + b0_ref[...])

    whh0f = whh0f_ref[...]
    whh0b = whh0b_ref[...]

    # ---- layer 0: fwd and bwd recurrences interleaved, fully unrolled ----
    def body0(t, carry):
        hf, cf, hb, cb = carry
        tf = pl.multiple_of(t * N, N)
        tb = pl.multiple_of((T - 1 - t) * N, N)
        blk_f = xc0_ref[pl.ds(tf, N), :]          # (N, 8H)
        blk_b = xc0_ref[pl.ds(tb, N), :]
        hf, cf = _lstm_step(blk_f[:, :G], hf, cf, whh0f)
        hb, cb = _lstm_step(blk_b[:, G:], hb, cb, whh0b)
        seq0_ref[pl.ds(tf, N), pl.ds(0, H)] = hf
        seq0_ref[pl.ds(tb, N), pl.ds(H, H)] = hb
        return hf, cf, hb, cb

    lax.fori_loop(0, T, body0, (zeros, zeros, zeros, zeros), unroll=True)

    # ---- hoisted layer-1 input projection (both directions) + biases ----
    xc1_ref[...] = (jnp.dot(seq0_ref[...], wih1_ref[...],
                            preferred_element_type=jnp.float32) + b1_ref[...])

    whh1f = whh1f_ref[...]
    whh1b = whh1b_ref[...]

    # ---- layer 1: interleaved fwd/bwd recurrences, fully unrolled ----
    def body1(t, carry):
        hf, cf, hb, cb = carry
        tf = pl.multiple_of(t * N, N)
        tb = pl.multiple_of((T - 1 - t) * N, N)
        blk_f = xc1_ref[pl.ds(tf, N), :]
        blk_b = xc1_ref[pl.ds(tb, N), :]
        hf, cf = _lstm_step(blk_f[:, :G], hf, cf, whh1f)
        hb, cb = _lstm_step(blk_b[:, G:], hb, cb, whh1b)
        return hf, cf, hb, cb

    h1f, _, h1b, _ = lax.fori_loop(0, T, body1, (zeros, zeros, zeros, zeros),
                                   unroll=True)

    # ---- output head ----
    # state_hn[-1].permute(1,2,0).reshape(N, 2H) interleaves fwd/bwd per hidden
    # unit; the Linear(2H,1) weight was de-interleaved in the wrapper into
    # [fwd-lane | bwd-lane] halves matching concat([h1f, h1b], -1).
    h_cat = jnp.concatenate([h1f, h1b], axis=-1)          # (N, 2H)
    pre = (jnp.sum(h_cat * wout_ref[...], axis=-1, keepdims=True)
           + bout_ref[0, 0])
    q_ref[...] = jax.nn.sigmoid(pre)


def init_params(key):
    """Deterministic parameter init matching the PyTorch module's shapes."""
    ks = jax.random.split(key, 20)
    scale = 1.0 / (H ** 0.5)

    def u(k, shape, s=scale):
        return jax.random.uniform(k, shape, jnp.float32, -s, s)

    p = {}
    p['emb'] = jax.random.normal(ks[0], (V, E), jnp.float32)          # CharEncoding
    # nn.LSTM(E, H, 2, bidirectional=True) parameters (PyTorch gate order i,f,g,o)
    p['wih_l0'] = u(ks[1], (4 * H, E));   p['whh_l0'] = u(ks[2], (4 * H, H))
    p['bih_l0'] = u(ks[3], (4 * H,));     p['bhh_l0'] = u(ks[4], (4 * H,))
    p['wih_l0r'] = u(ks[5], (4 * H, E));  p['whh_l0r'] = u(ks[6], (4 * H, H))
    p['bih_l0r'] = u(ks[7], (4 * H,));    p['bhh_l0r'] = u(ks[8], (4 * H,))
    p['wih_l1'] = u(ks[9], (4 * H, 2 * H));  p['whh_l1'] = u(ks[10], (4 * H, H))
    p['bih_l1'] = u(ks[11], (4 * H,));       p['bhh_l1'] = u(ks[12], (4 * H,))
    p['wih_l1r'] = u(ks[13], (4 * H, 2 * H)); p['whh_l1r'] = u(ks[14], (4 * H, H))
    p['bih_l1r'] = u(ks[15], (4 * H,));       p['bhh_l1r'] = u(ks[16], (4 * H,))
    # nn.Linear(2H, 1)
    s_out = 1.0 / ((2 * H) ** 0.5)
    p['w_out'] = u(ks[17], (2 * H,), s_out)
    p['b_out'] = u(ks[18], (1,), s_out)
    return p


def state_rnn_value_fn(tokens, p):
    """tokens: (N, T) int32 token ids of the last fact of each next_state."""
    x = p['emb'][tokens]                           # (N, T, E)  embedding lookup (glue)
    x = jnp.transpose(x, (1, 0, 2)).reshape(T * N, E)   # seq-major rows, flattened

    # Gate-column permutation: PyTorch (i, f, g, o) -> kernel (i, f, o, g).
    perm = jnp.concatenate([jnp.arange(0, H), jnp.arange(H, 2 * H),
                            jnp.arange(3 * H, 4 * H), jnp.arange(2 * H, 3 * H)])

    def w_t(w):   # (4H, in) -> (in, 4H) with (i, f, o, g) column order
        return jnp.transpose(w[perm])

    def bias(bih, bhh):
        return (bih + bhh)[perm].reshape(1, 4 * H)

    wih0 = jnp.concatenate([w_t(p['wih_l0']), w_t(p['wih_l0r'])], axis=1)   # (E, 8H)
    b0 = jnp.concatenate([bias(p['bih_l0'], p['bhh_l0']),
                          bias(p['bih_l0r'], p['bhh_l0r'])], axis=1)        # (1, 8H)
    wih1 = jnp.concatenate([w_t(p['wih_l1']), w_t(p['wih_l1r'])], axis=1)   # (2H, 8H)
    b1 = jnp.concatenate([bias(p['bih_l1'], p['bhh_l1']),
                          bias(p['bih_l1r'], p['bhh_l1r'])], axis=1)        # (1, 8H)
    # Even lanes of w_out multiply the fwd hidden state, odd lanes the bwd one.
    wout = jnp.concatenate([p['w_out'][0::2], p['w_out'][1::2]]).reshape(1, 2 * H)
    bout = p['b_out'].reshape(1, 1)

    args = (x,
            wih0, b0, w_t(p['whh_l0']), w_t(p['whh_l0r']),
            wih1, b1, w_t(p['whh_l1']), w_t(p['whh_l1r']),
            wout, bout)

    vmem = pl.BlockSpec(memory_space=pltpu.MemorySpace.VMEM)
    smem = pl.BlockSpec(memory_space=pltpu.MemorySpace.SMEM)
    in_specs = [vmem] * (len(args) - 1) + [smem]     # scalar output bias -> SMEM

    # TODO(synk): for production throughput, batch many candidate states per
    # call and add a parallel grid axis over batch blocks (multiples of 8).
    q = pl.pallas_call(
        state_rnn_value_kernel,
        out_shape=jax.ShapeDtypeStruct((N, 1), jnp.float32),
        in_specs=in_specs,
        out_specs=vmem,
        scratch_shapes=[pltpu.VMEM((T * N, 8 * H), jnp.float32),   # xc0
                        pltpu.VMEM((T * N, 2 * H), jnp.float32),   # seq0 [fwd|bwd]
                        pltpu.VMEM((T * N, 8 * H), jnp.float32)],  # xc1
    )(*args)
    return q[:, 0]                                   # matches .squeeze(1); sigmoid in kernel


def reference(tokens, p):
    """Pure-JAX reference with exact PyTorch nn.LSTM semantics (gate order i,f,g,o)."""
    x = jnp.transpose(p['emb'][tokens], (1, 0, 2))   # (T, N, E)

    def run_dir(inp, wih, whh, b, reverse):
        n = inp.shape[1]
        h = jnp.zeros((n, H), jnp.float32)
        c = jnp.zeros((n, H), jnp.float32)
        outs = [None] * inp.shape[0]
        order = range(inp.shape[0] - 1, -1, -1) if reverse else range(inp.shape[0])
        for t in order:
            gates = inp[t] @ wih.T + h @ whh.T + b
            i = jax.nn.sigmoid(gates[:, :H])
            f = jax.nn.sigmoid(gates[:, H:2 * H])
            g = jnp.tanh(gates[:, 2 * H:3 * H])
            o = jax.nn.sigmoid(gates[:, 3 * H:])
            c = f * c + i * g
            h = o * jnp.tanh(c)
            outs[t] = h
        return jnp.stack(outs), h

    b_l0 = p['bih_l0'] + p['bhh_l0']
    b_l0r = p['bih_l0r'] + p['bhh_l0r']
    b_l1 = p['bih_l1'] + p['bhh_l1']
    b_l1r = p['bih_l1r'] + p['bhh_l1r']

    out0f, _ = run_dir(x, p['wih_l0'], p['whh_l0'], b_l0, False)
    out0b, _ = run_dir(x, p['wih_l0r'], p['whh_l0r'], b_l0r, True)
    x1 = jnp.concatenate([out0f, out0b], axis=-1)
    _, h1f = run_dir(x1, p['wih_l1'], p['whh_l1'], b_l1, False)
    _, h1b = run_dir(x1, p['wih_l1r'], p['whh_l1r'], b_l1r, True)

    emb = jnp.stack([h1f, h1b], axis=-1).reshape(tokens.shape[0], 2 * H)
    return jax.nn.sigmoid(emb @ p['w_out'] + p['b_out'][0])


if __name__ == "__main__":
    key = jax.random.PRNGKey(0)
    k_params, k_tok = jax.random.split(key)
    params = init_params(k_params)
    tokens = jax.random.randint(k_tok, (N, T), 0, V, dtype=jnp.int32)

    q = state_rnn_value_fn(tokens, params)
    q = jax.block_until_ready(q)

    q_ref = reference(tokens, params)
    assert q.shape == (N,)
    assert bool(jnp.allclose(q, q_ref, atol=1e-5, rtol=1e-5)), (q, q_ref)

    print("KERNEL_OK")
</pallas_src>

<mosaic_0001>
module attributes {stable_mosaic.version = 11 : i64} {
  func.func @state_rnn_value_kernel(%arg0: memref<64x32xf32, #tpu.memory_space<vmem>>, %arg1: memref<32x256xf32, #tpu.memory_space<vmem>>, %arg2: memref<1x256xf32, #tpu.memory_space<vmem>>, %arg3: memref<32x128xf32, #tpu.memory_space<vmem>>, %arg4: memref<32x128xf32, #tpu.memory_space<vmem>>, %arg5: memref<64x256xf32, #tpu.memory_space<vmem>>, %arg6: memref<1x256xf32, #tpu.memory_space<vmem>>, %arg7: memref<32x128xf32, #tpu.memory_space<vmem>>, %arg8: memref<32x128xf32, #tpu.memory_space<vmem>>, %arg9: memref<1x64xf32, #tpu.memory_space<vmem>>, %arg10: memref<1x1xf32, #tpu.memory_space<smem>>, %arg11: memref<8x1xf32, #tpu.memory_space<vmem>>, %arg12: memref<64x256xf32, #tpu.memory_space<vmem>>, %arg13: memref<64x64xf32, #tpu.memory_space<vmem>>, %arg14: memref<64x256xf32, #tpu.memory_space<vmem>>) attributes {dimension_semantics = [], scalar_prefetch = 0 : i64, scratch_operands = 3 : i64, tpu.core_type = #tpu.core_type<tc>} {
    %cst = arith.constant 0.000000e+00 : f32
    %0 = vector.broadcast %cst : f32 to vector<8x32xf32>
    %c0 = arith.constant 0 : index
    %c0_0 = arith.constant 0 : index
    %1 = vector.load %arg0[%c0, %c0_0] : memref<64x32xf32, #tpu.memory_space<vmem>>, vector<64x32xf32>
    %c0_1 = arith.constant 0 : index
    %c0_2 = arith.constant 0 : index
    %2 = vector.load %arg1[%c0_1, %c0_2] : memref<32x256xf32, #tpu.memory_space<vmem>>, vector<32x256xf32>
    %cst_3 = arith.constant dense<0.000000e+00> : vector<64x256xf32>
    %3 = tpu.matmul %1, %2, %cst_3 {dimension_numbers = #tpu.dot_dimension_numbers<[1], [0], [0], [1], [0, 0, 1, 1], [], []>} : vector<64x32xf32>, vector<32x256xf32>, vector<64x256xf32> -> vector<64x256xf32>
    %c0_4 = arith.constant 0 : index
    %c0_5 = arith.constant 0 : index
    %4 = vector.load %arg2[%c0_4, %c0_5] : memref<1x256xf32, #tpu.memory_space<vmem>>, vector<1x256xf32>
    %5 = vector.broadcast %4 : vector<1x256xf32> to vector<64x256xf32>
    %6 = arith.addf %3, %5 : vector<64x256xf32>
    %c0_6 = arith.constant 0 : index
    %c0_7 = arith.constant 0 : index
    %7 = vector.load %arg12[%c0_6, %c0_7] : memref<64x256xf32, #tpu.memory_space<vmem>>, vector<64x256xf32>
    tpu.vector_store %arg12[%c0_6, %c0_7], %6 {strides = array<i32>} : memref<64x256xf32, #tpu.memory_space<vmem>>, vector<64x256xf32>,
    %c0_8 = arith.constant 0 : index
    %c0_9 = arith.constant 0 : index
    %8 = vector.load %arg3[%c0_8, %c0_9] : memref<32x128xf32, #tpu.memory_space<vmem>>, vector<32x128xf32>
    %c0_10 = arith.constant 0 : index
    %c0_11 = arith.constant 0 : index
    %9 = vector.load %arg4[%c0_10, %c0_11] : memref<32x128xf32, #tpu.memory_space<vmem>>, vector<32x128xf32>
    %c0_i32 = arith.constant 0 : i32
    %c8_i32 = arith.constant 8 : i32
    %10 = arith.muli %c0_i32, %c8_i32 : i32
    %11 = tpu.assume_multiple %10, 8 : i32
    %c7_i32 = arith.constant 7 : i32
    %12 = arith.subi %c7_i32, %c0_i32 : i32
    %c8_i32_12 = arith.constant 8 : i32
    %13 = arith.muli %12, %c8_i32_12 : i32
    %14 = tpu.assume_multiple %13, 8 : i32
    %15 = arith.index_cast %11 : i32 to index
    %c0_13 = arith.constant 0 : index
    %16 = vector.load %arg12[%15, %c0_13] : memref<64x256xf32, #tpu.memory_space<vmem>>, vector<8x256xf32>
    %17 = arith.index_cast %14 : i32 to index
    %c0_14 = arith.constant 0 : index
    %18 = vector.load %arg12[%17, %c0_14] : memref<64x256xf32, #tpu.memory_space<vmem>>, vector<8x256xf32>
    %19 = vector.extract_strided_slice %16 {offsets = [0, 0], sizes = [8, 128], strides = [1, 1]} : vector<8x256xf32> to vector<8x128xf32>
    %cst_15 = arith.constant dense<0.000000e+00> : vector<8x128xf32>
    %20 = tpu.matmul %0, %8, %cst_15 {dimension_numbers = #tpu.dot_dimension_numbers<[1], [0], [0], [1], [0, 0, 1, 1], [], []>} : vector<8x32xf32>, vector<32x128xf32>, vector<8x128xf32> -> vector<8x128xf32>
    %21 = arith.addf %19, %20 : vector<8x128xf32>
    %22 = vector.extract_strided_slice %21 {offsets = [0, 0], sizes = [8, 96], strides = [1, 1]} : vector<8x128xf32> to vector<8x96xf32>
    %23 = arith.negf %22 : vector<8x96xf32>
    %24 = math.exp %23 : vector<8x96xf32>
    %cst_16 = arith.constant 1.000000e+00 : f32
    %25 = vector.broadcast %cst_16 : f32 to vector<8x96xf32>
    %26 = arith.addf %25, %24 : vector<8x96xf32>
    %27 = arith.divf %25, %26 : vector<8x96xf32>
    %28 = vector.extract_strided_slice %21 {offsets = [0, 96], sizes = [8, 32], strides = [1, 1]} : vector<8x128xf32> to vector<8x32xf32>
    %29 = math.tanh %28 : vector<8x32xf32>
    %30 = vector.extract_strided_slice %27 {offsets = [0, 0], sizes = [8, 32], strides = [1, 1]} : vector<8x96xf32> to vector<8x32xf32>
    %31 = vector.extract_strided_slice %27 {offsets = [0, 32], sizes = [8, 32], strides = [1, 1]} : vector<8x96xf32> to vector<8x32xf32>
    %32 = vector.extract_strided_slice %27 {offsets = [0, 64], sizes = [8, 32], strides = [1, 1]} : vector<8x96xf32> to vector<8x32xf32>
    %33 = arith.mulf %31, %0 : vector<8x32xf32>
    %34 = arith.mulf %30, %29 : vector<8x32xf32>
    %35 = arith.addf %33, %34 : vector<8x32xf32>
    %36 = math.tanh %35 : vector<8x32xf32>
    %37 = arith.mulf %32, %36 : vector<8x32xf32>
    %38 = vector.extract_strided_slice %18 {offsets = [0, 128], sizes = [8, 128], strides = [1, 1]} : vector<8x256xf32> to vector<8x128xf32>
    %cst_17 = arith.constant dense<0.000000e+00> : vector<8x128xf32>
    %39 = tpu.matmul %0, %9, %cst_17 {dimension_numbers = #tpu.dot_dimension_numbers<[1], [0], [0], [1], [0, 0, 1, 1], [], []>} : vector<8x32xf32>, vector<32x128xf32>, vector<8x128xf32> -> vector<8x128xf32>
    %40 = arith.addf %38, %39 : vector<8x128xf32>
    %41 = vector.extract_strided_slice %40 {offsets = [0, 0], sizes = [8, 96], strides = [1, 1]} : vector<8x128xf32> to vector<8x96xf32>
    %42 = arith.negf %41 : vector<8x96xf32>
    %43 = math.exp %42 : vector<8x96xf32>
    %cst_18 = arith.constant 1.000000e+00 : f32
    %44 = vector.broadcast %cst_18 : f32 to vector<8x96xf32>
    %45 = arith.addf %44, %43 : vector<8x96xf32>
    %46 = arith.divf %44, %45 : vector<8x96xf32>
    %47 = vector.extract_strided_slice %40 {offsets = [0, 96], sizes = [8, 32], strides = [1, 1]} : vector<8x128xf32> to vector<8x32xf32>
    %48 = math.tanh %47 : vector<8x32xf32>
    %49 = vector.extract_strided_slice %46 {offsets = [0, 0], sizes = [8, 32], strides = [1, 1]} : vector<8x96xf32> to vector<8x32xf32>
    %50 = vector.extract_strided_slice %46 {offsets = [0, 32], sizes = [8, 32], strides = [1, 1]} : vector<8x96xf32> to vector<8x32xf32>
    %51 = vector.extract_strided_slice %46 {offsets = [0, 64], sizes = [8, 32], strides = [1, 1]} : vector<8x96xf32> to vector<8x32xf32>
    %52 = arith.mulf %50, %0 : vector<8x32xf32>
    %53 = arith.mulf %49, %48 : vector<8x32xf32>
    %54 = arith.addf %52, %53 : vector<8x32xf32>
    %55 = math.tanh %54 : vector<8x32xf32>
    %56 = arith.mulf %51, %55 : vector<8x32xf32>
    %57 = arith.index_cast %11 : i32 to index
    %c0_19 = arith.constant 0 : index
    %58 = vector.load %arg13[%57, %c0_19] : memref<64x64xf32, #tpu.memory_space<vmem>>, vector<8x32xf32>
    tpu.vector_store %arg13[%57, %c0_19], %37 {strides = array<i32>} : memref<64x64xf32, #tpu.memory_space<vmem>>, vector<8x32xf32>,
    %59 = arith.index_cast %14 : i32 to index
    %c32 = arith.constant 32 : index
    %60 = vector.load %arg13[%59, %c32] : memref<64x64xf32, #tpu.memory_space<vmem>>, vector<8x32xf32>
    tpu.vector_store %arg13[%59, %c32], %56 {strides = array<i32>} : memref<64x64xf32, #tpu.memory_space<vmem>>, vector<8x32xf32>,
    %c1_i32 = arith.constant 1 : i32
    %c8_i32_20 = arith.constant 8 : i32
    %61 = arith.muli %c1_i32, %c8_i32_20 : i32
    %62 = tpu.assume_multiple %61, 8 : i32
    %c7_i32_21 = arith.constant 7 : i32
    %63 = arith.subi %c7_i32_21, %c1_i32 : i32
    %c8_i32_22 = arith.constant 8 : i32
    %64 = arith.muli %63, %c8_i32_22 : i32
    %65 = tpu.assume_multiple %64, 8 : i32
    %66 = arith.index_cast %62 : i32 to index
    %c0_23 = arith.constant 0 : index
    %67 = vector.load %arg12[%66, %c0_23] : memref<64x256xf32, #tpu.memory_space<vmem>>, vector<8x256xf32>
    %68 = arith.index_cast %65 : i32 to index
    %c0_24 = arith.constant 0 : index
    %69 = vector.load %arg12[%68, %c0_24] : memref<64x256xf32, #tpu.memory_space<vmem>>, vector<8x256xf32>
    %70 = vector.extract_strided_slice %67 {offsets = [0, 0], sizes = [8, 128], strides = [1, 1]} : vector<8x256xf32> to vector<8x128xf32>
    %cst_25 = arith.constant dense<0.000000e+00> : vector<8x128xf32>
    %71 = tpu.matmul %37, %8, %cst_25 {dimension_numbers = #tpu.dot_dimension_numbers<[1], [0], [0], [1], [0, 0, 1, 1], [], []>} : vector<8x32xf32>, vector<32x128xf32>, vector<8x128xf32> -> vector<8x128xf32>
    %72 = arith.addf %70, %71 : vector<8x128xf32>
    %73 = vector.extract_strided_slice %72 {offsets = [0, 0], sizes = [8, 96], strides = [1, 1]} : vector<8x128xf32> to vector<8x96xf32>
    %74 = arith.negf %73 : vector<8x96xf32>
    %75 = math.exp %74 : vector<8x96xf32>
    %cst_26 = arith.constant 1.000000e+00 : f32
    %76 = vector.broadcast %cst_26 : f32 to vector<8x96xf32>
    %77 = arith.addf %76, %75 : vector<8x96xf32>
    %78 = arith.divf %76, %77 : vector<8x96xf32>
    %79 = vector.extract_strided_slice %72 {offsets = [0, 96], sizes = [8, 32], strides = [1, 1]} : vector<8x128xf32> to vector<8x32xf32>
    %80 = math.tanh %79 : vector<8x32xf32>
    %81 = vector.extract_strided_slice %78 {offsets = [0, 0], sizes = [8, 32], strides = [1, 1]} : vector<8x96xf32> to vector<8x32xf32>
    %82 = vector.extract_strided_slice %78 {offsets = [0, 32], sizes = [8, 32], strides = [1, 1]} : vector<8x96xf32> to vector<8x32xf32>
    %83 = vector.extract_strided_slice %78 {offsets = [0, 64], sizes = [8, 32], strides = [1, 1]} : vector<8x96xf32> to vector<8x32xf32>
    %84 = arith.mulf %82, %35 : vector<8x32xf32>
    %85 = arith.mulf %81, %80 : vector<8x32xf32>
    %86 = arith.addf %84, %85 : vector<8x32xf32>
    %87 = math.tanh %86 : vector<8x32xf32>
    %88 = arith.mulf %83, %87 : vector<8x32xf32>
    %89 = vector.extract_strided_slice %69 {offsets = [0, 128], sizes = [8, 128], strides = [1, 1]} : vector<8x256xf32> to vector<8x128xf32>
    %cst_27 = arith.constant dense<0.000000e+00> : vector<8x128xf32>
    %90 = tpu.matmul %56, %9, %cst_27 {dimension_numbers = #tpu.dot_dimension_numbers<[1], [0], [0], [1], [0, 0, 1, 1], [], []>} : vector<8x32xf32>, vector<32x128xf32>, vector<8x128xf32> -> vector<8x128xf32>
    %91 = arith.addf %89, %90 : vector<8x128xf32>
    %92 = vector.extract_strided_slice %91 {offsets = [0, 0], sizes = [8, 96], strides = [1, 1]} : vector<8x128xf32> to vector<8x96xf32>
    %93 = arith.negf %92 : vector<8x96xf32>
    %94 = math.exp %93 : vector<8x96xf32>
    %cst_28 = arith.constant 1.000000e+00 : f32
    %95 = vector.broadcast %cst_28 : f32 to vector<8x96xf32>
    %96 = arith.addf %95, %94 : vector<8x96xf32>
    %97 = arith.divf %95, %96 : vector<8x96xf32>
    %98 = vector.extract_strided_slice %91 {offsets = [0, 96], sizes = [8, 32], strides = [1, 1]} : vector<8x128xf32> to vector<8x32xf32>
    %99 = math.tanh %98 : vector<8x32xf32>
    %100 = vector.extract_strided_slice %97 {offsets = [0, 0], sizes = [8, 32], strides = [1, 1]} : vector<8x96xf32> to vector<8x32xf32>
    %101 = vector.extract_strided_slice %97 {offsets = [0, 32], sizes = [8, 32], strides = [1, 1]} : vector<8x96xf32> to vector<8x32xf32>
    %102 = vector.extract_strided_slice %97 {offsets = [0, 64], sizes = [8, 32], strides = [1, 1]} : vector<8x96xf32> to vector<8x32xf32>
    %103 = arith.mulf %101, %54 : vector<8x32xf32>
    %104 = arith.mulf %100, %99 : vector<8x32xf32>
    %105 = arith.addf %103, %104 : vector<8x32xf32>
    %106 = math.tanh %105 : vector<8x32xf32>
    %107 = arith.mulf %102, %106 : vector<8x32xf32>
    %108 = arith.index_cast %62 : i32 to index
    %c0_29 = arith.constant 0 : index
    %109 = vector.load %arg13[%108, %c0_29] : memref<64x64xf32, #tpu.memory_space<vmem>>, vector<8x32xf32>
    tpu.vector_store %arg13[%108, %c0_29], %88 {strides = array<i32>} : memref<64x64xf32, #tpu.memory_space<vmem>>, vector<8x32xf32>,
    %110 = arith.index_cast %65 : i32 to index
    %c32_30 = arith.constant 32 : index
    %111 = vector.load %arg13[%110, %c32_30] : memref<64x64xf32, #tpu.memory_space<vmem>>, vector<8x32xf32>
    tpu.vector_store %arg13[%110, %c32_30], %107 {strides = array<i32>} : memref<64x64xf32, #tpu.memory_space<vmem>>, vector<8x32xf32>,
    %c2_i32 = arith.constant 2 : i32
    %c8_i32_31 = arith.constant 8 : i32
    %112 = arith.muli %c2_i32, %c8_i32_31 : i32
    %113 = tpu.assume_multiple %112, 8 : i32
    %c7_i32_32 = arith.constant 7 : i32
    %114 = arith.subi %c7_i32_32, %c2_i32 : i32
    %c8_i32_33 = arith.constant 8 : i32
    %115 = arith.muli %114, %c8_i32_33 : i32
    %116 = tpu.assume_multiple %115, 8 : i32
    %117 = arith.index_cast %113 : i32 to index
    %c0_34 = arith.constant 0 : index
    %118 = vector.load %arg12[%117, %c0_34] : memref<64x256xf32, #tpu.memory_space<vmem>>, vector<8x256xf32>
    %119 = arith.index_cast %116 : i32 to index
    %c0_35 = arith.constant 0 : index
    %120 = vector.load %arg12[%119, %c0_35] : memref<64x256xf32, #tpu.memory_space<vmem>>, vector<8x256xf32>
    %121 = vector.extract_strided_slice %118 {offsets = [0, 0], sizes = [8, 128], strides = [1, 1]} : vector<8x256xf32> to vector<8x128xf32>
    %cst_36 = arith.constant dense<0.000000e+00> : vector<8x128xf32>
    %122 = tpu.matmul %88, %8, %cst_36 {dimension_numbers = #tpu.dot_dimension_numbers<[1], [0], [0], [1], [0, 0, 1, 1], [], []>} : vector<8x32xf32>, vector<32x128xf32>, vector<8x128xf32> -> vector<8x128xf32>
    %123 = arith.addf %121, %122 : vector<8x128xf32>
    %124 = vector.extract_strided_slice %123 {offsets = [0, 0], sizes = [8, 96], strides = [1, 1]} : vector<8x128xf32> to vector<8x96xf32>
    %125 = arith.negf %124 : vector<8x96xf32>
    %126 = math.exp %125 : vector<8x96xf32>
    %cst_37 = arith.constant 1.000000e+00 : f32
    %127 = vector.broadcast %cst_37 : f32 to vector<8x96xf32>
    %128 = arith.addf %127, %126 : vector<8x96xf32>
    %129 = arith.divf %127, %128 : vector<8x96xf32>
    %130 = vector.extract_strided_slice %123 {offsets = [0, 96], sizes = [8, 32], strides = [1, 1]} : vector<8x128xf32> to vector<8x32xf32>
    %131 = math.tanh %130 : vector<8x32xf32>
    %132 = vector.extract_strided_slice %129 {offsets = [0, 0], sizes = [8, 32], strides = [1, 1]} : vector<8x96xf32> to vector<8x32xf32>
    %133 = vector.extract_strided_slice %129 {offsets = [0, 32], sizes = [8, 32], strides = [1, 1]} : vector<8x96xf32> to vector<8x32xf32>
    %134 = vector.extract_strided_slice %129 {offsets = [0, 64], sizes = [8, 32], strides = [1, 1]} : vector<8x96xf32> to vector<8x32xf32>
    %135 = arith.mulf %133, %86 : vector<8x32xf32>
    %136 = arith.mulf %132, %131 : vector<8x32xf32>
    %137 = arith.addf %135, %136 : vector<8x32xf32>
    %138 = math.tanh %137 : vector<8x32xf32>
    %139 = arith.mulf %134, %138 : vector<8x32xf32>
    %140 = vector.extract_strided_slice %120 {offsets = [0, 128], sizes = [8, 128], strides = [1, 1]} : vector<8x256xf32> to vector<8x128xf32>
    %cst_38 = arith.constant dense<0.000000e+00> : vector<8x128xf32>
    %141 = tpu.matmul %107, %9, %cst_38 {dimension_numbers = #tpu.dot_dimension_numbers<[1], [0], [0], [1], [0, 0, 1, 1], [], []>} : vector<8x32xf32>, vector<32x128xf32>, vector<8x128xf32> -> vector<8x128xf32>
    %142 = arith.addf %140, %141 : vector<8x128xf32>
    %143 = vector.extract_strided_slice %142 {offsets = [0, 0], sizes = [8, 96], strides = [1, 1]} : vector<8x128xf32> to vector<8x96xf32>
    %144 = arith.negf %143 : vector<8x96xf32>
    %145 = math.exp %144 : vector<8x96xf32>
    %cst_39 = arith.constant 1.000000e+00 : f32
    %146 = vector.broadcast %cst_39 : f32 to vector<8x96xf32>
    %147 = arith.addf %146, %145 : vector<8x96xf32>
    %148 = arith.divf %146, %147 : vector<8x96xf32>
    %149 = vector.extract_strided_slice %142 {offsets = [0, 96], sizes = [8, 32], strides = [1, 1]} : vector<8x128xf32> to vector<8x32xf32>
    %150 = math.tanh %149 : vector<8x32xf32>
    %151 = vector.extract_strided_slice %148 {offsets = [0, 0], sizes = [8, 32], strides = [1, 1]} : vector<8x96xf32> to vector<8x32xf32>
    %152 = vector.extract_strided_slice %148 {offsets = [0, 32], sizes = [8, 32], strides = [1, 1]} : vector<8x96xf32> to vector<8x32xf32>
    %153 = vector.extract_strided_slice %148 {offsets = [0, 64], sizes = [8, 32], strides = [1, 1]} : vector<8x96xf32> to vector<8x32xf32>
    %154 = arith.mulf %152, %105 : vector<8x32xf32>
    %155 = arith.mulf %151, %150 : vector<8x32xf32>
    %156 = arith.addf %154, %155 : vector<8x32xf32>
    %157 = math.tanh %156 : vector<8x32xf32>
    %158 = arith.mulf %153, %157 : vector<8x32xf32>
    %159 = arith.index_cast %113 : i32 to index
    %c0_40 = arith.constant 0 : index
    %160 = vector.load %arg13[%159, %c0_40] : memref<64x64xf32, #tpu.memory_space<vmem>>, vector<8x32xf32>
    tpu.vector_store %arg13[%159, %c0_40], %139 {strides = array<i32>} : memref<64x64xf32, #tpu.memory_space<vmem>>, vector<8x32xf32>,
    %161 = arith.index_cast %116 : i32 to index
    %c32_41 = arith.constant 32 : index
    %162 = vector.load %arg13[%161, %c32_41] : memref<64x64xf32, #tpu.memory_space<vmem>>, vector<8x32xf32>
    tpu.vector_store %arg13[%161, %c32_41], %158 {strides = array<i32>} : memref<64x64xf32, #tpu.memory_space<vmem>>, vector<8x32xf32>,
    %c3_i32 = arith.constant 3 : i32
    %c8_i32_42 = arith.constant 8 : i32
    %163 = arith.muli %c3_i32, %c8_i32_42 : i32
    %164 = tpu.assume_multiple %163, 8 : i32
    %c7_i32_43 = arith.constant 7 : i32
    %165 = arith.subi %c7_i32_43, %c3_i32 : i32
    %c8_i32_44 = arith.constant 8 : i32
    %166 = arith.muli %165, %c8_i32_44 : i32
    %167 = tpu.assume_multiple %166, 8 : i32
    %168 = arith.index_cast %164 : i32 to index
    %c0_45 = arith.constant 0 : index
    %169 = vector.load %arg12[%168, %c0_45] : memref<64x256xf32, #tpu.memory_space<vmem>>, vector<8x256xf32>
    %170 = arith.index_cast %167 : i32 to index
    %c0_46 = arith.constant 0 : index
    %171 = vector.load %arg12[%170, %c0_46] : memref<64x256xf32, #tpu.memory_space<vmem>>, vector<8x256xf32>
    %172 = vector.extract_strided_slice %169 {offsets = [0, 0], sizes = [8, 128], strides = [1, 1]} : vector<8x256xf32> to vector<8x128xf32>
    %cst_47 = arith.constant dense<0.000000e+00> : vector<8x128xf32>
    %173 = tpu.matmul %139, %8, %cst_47 {dimension_numbers = #tpu.dot_dimension_numbers<[1], [0], [0], [1], [0, 0, 1, 1], [], []>} : vector<8x32xf32>, vector<32x128xf32>, vector<8x128xf32> -> vector<8x128xf32>
    %174 = arith.addf %172, %173 : vector<8x128xf32>
    %175 = vector.extract_strided_slice %174 {offsets = [0, 0], sizes = [8, 96], strides = [1, 1]} : vector<8x128xf32> to vector<8x96xf32>
    %176 = arith.negf %175 : vector<8x96xf32>
    %177 = math.exp %176 : vector<8x96xf32>
    %cst_48 = arith.constant 1.000000e+00 : f32
    %178 = vector.broadcast %cst_48 : f32 to vector<8x96xf32>
    %179 = arith.addf %178, %177 : vector<8x96xf32>
    %180 = arith.divf %178, %179 : vector<8x96xf32>
    %181 = vector.extract_strided_slice %174 {offsets = [0, 96], sizes = [8, 32], strides = [1, 1]} : vector<8x128xf32> to vector<8x32xf32>
    %182 = math.tanh %181 : vector<8x32xf32>
    %183 = vector.extract_strided_slice %180 {offsets = [0, 0], sizes = [8, 32], strides = [1, 1]} : vector<8x96xf32> to vector<8x32xf32>
    %184 = vector.extract_strided_slice %180 {offsets = [0, 32], sizes = [8, 32], strides = [1, 1]} : vector<8x96xf32> to vector<8x32xf32>
    %185 = vector.extract_strided_slice %180 {offsets = [0, 64], sizes = [8, 32], strides = [1, 1]} : vector<8x96xf32> to vector<8x32xf32>
    %186 = arith.mulf %184, %137 : vector<8x32xf32>
    %187 = arith.mulf %183, %182 : vector<8x32xf32>
    %188 = arith.addf %186, %187 : vector<8x32xf32>
    %189 = math.tanh %188 : vector<8x32xf32>
    %190 = arith.mulf %185, %189 : vector<8x32xf32>
    %191 = vector.extract_strided_slice %171 {offsets = [0, 128], sizes = [8, 128], strides = [1, 1]} : vector<8x256xf32> to vector<8x128xf32>
    %cst_49 = arith.constant dense<0.000000e+00> : vector<8x128xf32>
    %192 = tpu.matmul %158, %9, %cst_49 {dimension_numbers = #tpu.dot_dimension_numbers<[1], [0], [0], [1], [0, 0, 1, 1], [], []>} : vector<8x32xf32>, vector<32x128xf32>, vector<8x128xf32> -> vector<8x128xf32>
    %193 = arith.addf %191, %192 : vector<8x128xf32>
    %194 = vector.extract_strided_slice %193 {offsets = [0, 0], sizes = [8, 96], strides = [1, 1]} : vector<8x128xf32> to vector<8x96xf32>
    %195 = arith.negf %194 : vector<8x96xf32>
    %196 = math.exp %195 : vector<8x96xf32>
    %cst_50 = arith.constant 1.000000e+00 : f32
    %197 = vector.broadcast %cst_50 : f32 to vector<8x96xf32>
    %198 = arith.addf %197, %196 : vector<8x96xf32>
    %199 = arith.divf %197, %198 : vector<8x96xf32>
    %200 = vector.extract_strided_slice %193 {offsets = [0, 96], sizes = [8, 32], strides = [1, 1]} : vector<8x128xf32> to vector<8x32xf32>
    %201 = math.tanh %200 : vector<8x32xf32>
    %202 = vector.extract_strided_slice %199 {offsets = [0, 0], sizes = [8, 32], strides = [1, 1]} : vector<8x96xf32> to vector<8x32xf32>
    %203 = vector.extract_strided_slice %199 {offsets = [0, 32], sizes = [8, 32], strides = [1, 1]} : vector<8x96xf32> to vector<8x32xf32>
    %204 = vector.extract_strided_slice %199 {offsets = [0, 64], sizes = [8, 32], strides = [1, 1]} : vector<8x96xf32> to vector<8x32xf32>
    %205 = arith.mulf %203, %156 : vector<8x32xf32>
    %206 = arith.mulf %202, %201 : vector<8x32xf32>
    %207 = arith.addf %205, %206 : vector<8x32xf32>
    %208 = math.tanh %207 : vector<8x32xf32>
    %209 = arith.mulf %204, %208 : vector<8x32xf32>
    %210 = arith.index_cast %164 : i32 to index
    %c0_51 = arith.constant 0 : index
    %211 = vector.load %arg13[%210, %c0_51] : memref<64x64xf32, #tpu.memory_space<vmem>>, vector<8x32xf32>
    tpu.vector_store %arg13[%210, %c0_51], %190 {strides = array<i32>} : memref<64x64xf32, #tpu.memory_space<vmem>>, vector<8x32xf32>,
    %212 = arith.index_cast %167 : i32 to index
    %c32_52 = arith.constant 32 : index
    %213 = vector.load %arg13[%212, %c32_52] : memref<64x64xf32, #tpu.memory_space<vmem>>, vector<8x32xf32>
    tpu.vector_store %arg13[%212, %c32_52], %209 {strides = array<i32>} : memref<64x64xf32, #tpu.memory_space<vmem>>, vector<8x32xf32>,
    %c4_i32 = arith.constant 4 : i32
    %c8_i32_53 = arith.constant 8 : i32
    %214 = arith.muli %c4_i32, %c8_i32_53 : i32
    %215 = tpu.assume_multiple %214, 8 : i32
    %c7_i32_54 = arith.constant 7 : i32
    %216 = arith.subi %c7_i32_54, %c4_i32 : i32
    %c8_i32_55 = arith.constant 8 : i32
    %217 = arith.muli %216, %c8_i32_55 : i32
    %218 = tpu.assume_multiple %217, 8 : i32
    %219 = arith.index_cast %215 : i32 to index
    %c0_56 = arith.constant 0 : index
    %220 = vector.load %arg12[%219, %c0_56] : memref<64x256xf32, #tpu.memory_space<vmem>>, vector<8x256xf32>
    %221 = arith.index_cast %218 : i32 to index
    %c0_57 = arith.constant 0 : index
    %222 = vector.load %arg12[%221, %c0_57] : memref<64x256xf32, #tpu.memory_space<vmem>>, vector<8x256xf32>
    %223 = vector.extract_strided_slice %220 {offsets = [0, 0], sizes = [8, 128], strides = [1, 1]} : vector<8x256xf32> to vector<8x128xf32>
    %cst_58 = arith.constant dense<0.000000e+00> : vector<8x128xf32>
    %224 = tpu.matmul %190, %8, %cst_58 {dimension_numbers = #tpu.dot_dimension_numbers<[1], [0], [0], [1], [0, 0, 1, 1], [], []>} : vector<8x32xf32>, vector<32x128xf32>, vector<8x128xf32> -> vector<8x128xf32>
    %225 = arith.addf %223, %224 : vector<8x128xf32>
    %226 = vector.extract_strided_slice %225 {offsets = [0, 0], sizes = [8, 96], strides = [1, 1]} : vector<8x128xf32> to vector<8x96xf32>
    %227 = arith.negf %226 : vector<8x96xf32>
    %228 = math.exp %227 : vector<8x96xf32>
    %cst_59 = arith.constant 1.000000e+00 : f32
    %229 = vector.broadcast %cst_59 : f32 to vector<8x96xf32>
    %230 = arith.addf %229, %228 : vector<8x96xf32>
    %231 = arith.divf %229, %230 : vector<8x96xf32>
    %232 = vector.extract_strided_slice %225 {offsets = [0, 96], sizes = [8, 32], strides = [1, 1]} : vector<8x128xf32> to vector<8x32xf32>
    %233 = math.tanh %232 : vector<8x32xf32>
    %234 = vector.extract_strided_slice %231 {offsets = [0, 0], sizes = [8, 32], strides = [1, 1]} : vector<8x96xf32> to vector<8x32xf32>
    %235 = vector.extract_strided_slice %231 {offsets = [0, 32], sizes = [8, 32], strides = [1, 1]} : vector<8x96xf32> to vector<8x32xf32>
    %236 = vector.extract_strided_slice %231 {offsets = [0, 64], sizes = [8, 32], strides = [1, 1]} : vector<8x96xf32> to vector<8x32xf32>
    %237 = arith.mulf %235, %188 : vector<8x32xf32>
    %238 = arith.mulf %234, %233 : vector<8x32xf32>
    %239 = arith.addf %237, %238 : vector<8x32xf32>
    %240 = math.tanh %239 : vector<8x32xf32>
    %241 = arith.mulf %236, %240 : vector<8x32xf32>
    %242 = vector.extract_strided_slice %222 {offsets = [0, 128], sizes = [8, 128], strides = [1, 1]} : vector<8x256xf32> to vector<8x128xf32>
    %cst_60 = arith.constant dense<0.000000e+00> : vector<8x128xf32>
    %243 = tpu.matmul %209, %9, %cst_60 {dimension_numbers = #tpu.dot_dimension_numbers<[1], [0], [0], [1], [0, 0, 1, 1], [], []>} : vector<8x32xf32>, vector<32x128xf32>, vector<8x128xf32> -> vector<8x128xf32>
    %244 = arith.addf %242, %243 : vector<8x128xf32>
    %245 = vector.extract_strided_slice %244 {offsets = [0, 0], sizes = [8, 96], strides = [1, 1]} : vector<8x128xf32> to vector<8x96xf32>
    %246 = arith.negf %245 : vector<8x96xf32>
    %247 = math.exp %246 : vector<8x96xf32>
    %cst_61 = arith.constant 1.000000e+00 : f32
    %248 = vector.broadcast %cst_61 : f32 to vector<8x96xf32>
    %249 = arith.addf %248, %247 : vector<8x96xf32>
    %250 = arith.divf %248, %249 : vector<8x96xf32>
    %251 = vector.extract_strided_slice %244 {offsets = [0, 96], sizes = [8, 32], strides = [1, 1]} : vector<8x128xf32> to vector<8x32xf32>
    %252 = math.tanh %251 : vector<8x32xf32>
    %253 = vector.extract_strided_slice %250 {offsets = [0, 0], sizes = [8, 32], strides = [1, 1]} : vector<8x96xf32> to vector<8x32xf32>
    %254 = vector.extract_strided_slice %250 {offsets = [0, 32], sizes = [8, 32], strides = [1, 1]} : vector<8x96xf32> to vector<8x32xf32>
    %255 = vector.extract_strided_slice %250 {offsets = [0, 64], sizes = [8, 32], strides = [1, 1]} : vector<8x96xf32> to vector<8x32xf32>
    %256 = arith.mulf %254, %207 : vector<8x32xf32>
    %257 = arith.mulf %253, %252 : vector<8x32xf32>
    %258 = arith.addf %256, %257 : vector<8x32xf32>
    %259 = math.tanh %258 : vector<8x32xf32>
    %260 = arith.mulf %255, %259 : vector<8x32xf32>
    %261 = arith.index_cast %215 : i32 to index
    %c0_62 = arith.constant 0 : index
    %262 = vector.load %arg13[%261, %c0_62] : memref<64x64xf32, #tpu.memory_space<vmem>>, vector<8x32xf32>
    tpu.vector_store %arg13[%261, %c0_62], %241 {strides = array<i32>} : memref<64x64xf32, #tpu.memory_space<vmem>>, vector<8x32xf32>,
    %263 = arith.index_cast %218 : i32 to index
    %c32_63 = arith.constant 32 : index
    %264 = vector.load %arg13[%263, %c32_63] : memref<64x64xf32, #tpu.memory_space<vmem>>, vector<8x32xf32>
    tpu.vector_store %arg13[%263, %c32_63], %260 {strides = array<i32>} : memref<64x64xf32, #tpu.memory_space<vmem>>, vector<8x32xf32>,
    %c5_i32 = arith.constant 5 : i32
    %c8_i32_64 = arith.constant 8 : i32
    %265 = arith.muli %c5_i32, %c8_i32_64 : i32
    %266 = tpu.assume_multiple %265, 8 : i32
    %c7_i32_65 = arith.constant 7 : i32
    %267 = arith.subi %c7_i32_65, %c5_i32 : i32
    %c8_i32_66 = arith.constant 8 : i32
    %268 = arith.muli %267, %c8_i32_66 : i32
    %269 = tpu.assume_multiple %268, 8 : i32
    %270 = arith.index_cast %266 : i32 to index
    %c0_67 = arith.constant 0 : index
    %271 = vector.load %arg12[%270, %c0_67] : memref<64x256xf32, #tpu.memory_space<vmem>>, vector<8x256xf32>
    %272 = arith.index_cast %269 : i32 to index
    %c0_68 = arith.constant 0 : index
    %273 = vector.load %arg12[%272, %c0_68] : memref<64x256xf32, #tpu.memory_space<vmem>>, vector<8x256xf32>
    %274 = vector.extract_strided_slice %271 {offsets = [0, 0], sizes = [8, 128], strides = [1, 1]} : vector<8x256xf32> to vector<8x128xf32>
    %cst_69 = arith.constant dense<0.000000e+00> : vector<8x128xf32>
    %275 = tpu.matmul %241, %8, %cst_69 {dimension_numbers = #tpu.dot_dimension_numbers<[1], [0], [0], [1], [0, 0, 1, 1], [], []>} : vector<8x32xf32>, vector<32x128xf32>, vector<8x128xf32> -> vector<8x128xf32>
    %276 = arith.addf %274, %275 : vector<8x128xf32>
    %277 = vector.extract_strided_slice %276 {offsets = [0, 0], sizes = [8, 96], strides = [1, 1]} : vector<8x128xf32> to vector<8x96xf32>
    %278 = arith.negf %277 : vector<8x96xf32>
    %279 = math.exp %278 : vector<8x96xf32>
    %cst_70 = arith.constant 1.000000e+00 : f32
    %280 = vector.broadcast %cst_70 : f32 to vector<8x96xf32>
    %281 = arith.addf %280, %279 : vector<8x96xf32>
    %282 = arith.divf %280, %281 : vector<8x96xf32>
    %283 = vector.extract_strided_slice %276 {offsets = [0, 96], sizes = [8, 32], strides = [1, 1]} : vector<8x128xf32> to vector<8x32xf32>
    %284 = math.tanh %283 : vector<8x32xf32>
    %285 = vector.extract_strided_slice %282 {offsets = [0, 0], sizes = [8, 32], strides = [1, 1]} : vector<8x96xf32> to vector<8x32xf32>
    %286 = vector.extract_strided_slice %282 {offsets = [0, 32], sizes = [8, 32], strides = [1, 1]} : vector<8x96xf32> to vector<8x32xf32>
    %287 = vector.extract_strided_slice %282 {offsets = [0, 64], sizes = [8, 32], strides = [1, 1]} : vector<8x96xf32> to vector<8x32xf32>
    %288 = arith.mulf %286, %239 : vector<8x32xf32>
    %289 = arith.mulf %285, %284 : vector<8x32xf32>
    %290 = arith.addf %288, %289 : vector<8x32xf32>
    %291 = math.tanh %290 : vector<8x32xf32>
    %292 = arith.mulf %287, %291 : vector<8x32xf32>
    %293 = vector.extract_strided_slice %273 {offsets = [0, 128], sizes = [8, 128], strides = [1, 1]} : vector<8x256xf32> to vector<8x128xf32>
    %cst_71 = arith.constant dense<0.000000e+00> : vector<8x128xf32>
    %294 = tpu.matmul %260, %9, %cst_71 {dimension_numbers = #tpu.dot_dimension_numbers<[1], [0], [0], [1], [0, 0, 1, 1], [], []>} : vector<8x32xf32>, vector<32x128xf32>, vector<8x128xf32> -> vector<8x128xf32>
    %295 = arith.addf %293, %294 : vector<8x128xf32>
    %296 = vector.extract_strided_slice %295 {offsets = [0, 0], sizes = [8, 96], strides = [1, 1]} : vector<8x128xf32> to vector<8x96xf32>
    %297 = arith.negf %296 : vector<8x96xf32>
    %298 = math.exp %297 : vector<8x96xf32>
    %cst_72 = arith.constant 1.000000e+00 : f32
    %299 = vector.broadcast %cst_72 : f32 to vector<8x96xf32>
    %300 = arith.addf %299, %298 : vector<8x96xf32>
    %301 = arith.divf %299, %300 : vector<8x96xf32>
    %302 = vector.extract_strided_slice %295 {offsets = [0, 96], sizes = [8, 32], strides = [1, 1]} : vector<8x128xf32> to vector<8x32xf32>
    %303 = math.tanh %302 : vector<8x32xf32>
    %304 = vector.extract_strided_slice %301 {offsets = [0, 0], sizes = [8, 32], strides = [1, 1]} : vector<8x96xf32> to vector<8x32xf32>
    %305 = vector.extract_strided_slice %301 {offsets = [0, 32], sizes = [8, 32], strides = [1, 1]} : vector<8x96xf32> to vector<8x32xf32>
    %306 = vector.extract_strided_slice %301 {offsets = [0, 64], sizes = [8, 32], strides = [1, 1]} : vector<8x96xf32> to vector<8x32xf32>
    %307 = arith.mulf %305, %258 : vector<8x32xf32>
    %308 = arith.mulf %304, %303 : vector<8x32xf32>
    %309 = arith.addf %307, %308 : vector<8x32xf32>
    %310 = math.tanh %309 : vector<8x32xf32>
    %311 = arith.mulf %306, %310 : vector<8x32xf32>
    %312 = arith.index_cast %266 : i32 to index
    %c0_73 = arith.constant 0 : index
    %313 = vector.load %arg13[%312, %c0_73] : memref<64x64xf32, #tpu.memory_space<vmem>>, vector<8x32xf32>
    tpu.vector_store %arg13[%312, %c0_73], %292 {strides = array<i32>} : memref<64x64xf32, #tpu.memory_space<vmem>>, vector<8x32xf32>,
    %314 = arith.index_cast %269 : i32 to index
    %c32_74 = arith.constant 32 : index
    %315 = vector.load %arg13[%314, %c32_74] : memref<64x64xf32, #tpu.memory_space<vmem>>, vector<8x32xf32>
    tpu.vector_store %arg13[%314, %c32_74], %311 {strides = array<i32>} : memref<64x64xf32, #tpu.memory_space<vmem>>, vector<8x32xf32>,
    %c6_i32 = arith.constant 6 : i32
    %c8_i32_75 = arith.constant 8 : i32
    %316 = arith.muli %c6_i32, %c8_i32_75 : i32
    %317 = tpu.assume_multiple %316, 8 : i32
    %c7_i32_76 = arith.constant 7 : i32
    %318 = arith.subi %c7_i32_76, %c6_i32 : i32
    %c8_i32_77 = arith.constant 8 : i32
    %319 = arith.muli %318, %c8_i32_77 : i32
    %320 = tpu.assume_multiple %319, 8 : i32
    %321 = arith.index_cast %317 : i32 to index
    %c0_78 = arith.constant 0 : index
    %322 = vector.load %arg12[%321, %c0_78] : memref<64x256xf32, #tpu.memory_space<vmem>>, vector<8x256xf32>
    %323 = arith.index_cast %320 : i32 to index
    %c0_79 = arith.constant 0 : index
    %324 = vector.load %arg12[%323, %c0_79] : memref<64x256xf32, #tpu.memory_space<vmem>>, vector<8x256xf32>
    %325 = vector.extract_strided_slice %322 {offsets = [0, 0], sizes = [8, 128], strides = [1, 1]} : vector<8x256xf32> to vector<8x128xf32>
    %cst_80 = arith.constant dense<0.000000e+00> : vector<8x128xf32>
    %326 = tpu.matmul %292, %8, %cst_80 {dimension_numbers = #tpu.dot_dimension_numbers<[1], [0], [0], [1], [0, 0, 1, 1], [], []>} : vector<8x32xf32>, vector<32x128xf32>, vector<8x128xf32> -> vector<8x128xf32>
    %327 = arith.addf %325, %326 : vector<8x128xf32>
    %328 = vector.extract_strided_slice %327 {offsets = [0, 0], sizes = [8, 96], strides = [1, 1]} : vector<8x128xf32> to vector<8x96xf32>
    %329 = arith.negf %328 : vector<8x96xf32>
    %330 = math.exp %329 : vector<8x96xf32>
    %cst_81 = arith.constant 1.000000e+00 : f32
    %331 = vector.broadcast %cst_81 : f32 to vector<8x96xf32>
    %332 = arith.addf %331, %330 : vector<8x96xf32>
    %333 = arith.divf %331, %332 : vector<8x96xf32>
    %334 = vector.extract_strided_slice %327 {offsets = [0, 96], sizes = [8, 32], strides = [1, 1]} : vector<8x128xf32> to vector<8x32xf32>
    %335 = math.tanh %334 : vector<8x32xf32>
    %336 = vector.extract_strided_slice %333 {offsets = [0, 0], sizes = [8, 32], strides = [1, 1]} : vector<8x96xf32> to vector<8x32xf32>
    %337 = vector.extract_strided_slice %333 {offsets = [0, 32], sizes = [8, 32], strides = [1, 1]} : vector<8x96xf32> to vector<8x32xf32>
    %338 = vector.extract_strided_slice %333 {offsets = [0, 64], sizes = [8, 32], strides = [1, 1]} : vector<8x96xf32> to vector<8x32xf32>
    %339 = arith.mulf %337, %290 : vector<8x32xf32>
    %340 = arith.mulf %336, %335 : vector<8x32xf32>
    %341 = arith.addf %339, %340 : vector<8x32xf32>
    %342 = math.tanh %341 : vector<8x32xf32>
    %343 = arith.mulf %338, %342 : vector<8x32xf32>
    %344 = vector.extract_strided_slice %324 {offsets = [0, 128], sizes = [8, 128], strides = [1, 1]} : vector<8x256xf32> to vector<8x128xf32>
    %cst_82 = arith.constant dense<0.000000e+00> : vector<8x128xf32>
    %345 = tpu.matmul %311, %9, %cst_82 {dimension_numbers = #tpu.dot_dimension_numbers<[1], [0], [0], [1], [0, 0, 1, 1], [], []>} : vector<8x32xf32>, vector<32x128xf32>, vector<8x128xf32> -> vector<8x128xf32>
    %346 = arith.addf %344, %345 : vector<8x128xf32>
    %347 = vector.extract_strided_slice %346 {offsets = [0, 0], sizes = [8, 96], strides = [1, 1]} : vector<8x128xf32> to vector<8x96xf32>
    %348 = arith.negf %347 : vector<8x96xf32>
    %349 = math.exp %348 : vector<8x96xf32>
    %cst_83 = arith.constant 1.000000e+00 : f32
    %350 = vector.broadcast %cst_83 : f32 to vector<8x96xf32>
    %351 = arith.addf %350, %349 : vector<8x96xf32>
    %352 = arith.divf %350, %351 : vector<8x96xf32>
    %353 = vector.extract_strided_slice %346 {offsets = [0, 96], sizes = [8, 32], strides = [1, 1]} : vector<8x128xf32> to vector<8x32xf32>
    %354 = math.tanh %353 : vector<8x32xf32>
    %355 = vector.extract_strided_slice %352 {offsets = [0, 0], sizes = [8, 32], strides = [1, 1]} : vector<8x96xf32> to vector<8x32xf32>
    %356 = vector.extract_strided_slice %352 {offsets = [0, 32], sizes = [8, 32], strides = [1, 1]} : vector<8x96xf32> to vector<8x32xf32>
    %357 = vector.extract_strided_slice %352 {offsets = [0, 64], sizes = [8, 32], strides = [1, 1]} : vector<8x96xf32> to vector<8x32xf32>
    %358 = arith.mulf %356, %309 : vector<8x32xf32>
    %359 = arith.mulf %355, %354 : vector<8x32xf32>
    %360 = arith.addf %358, %359 : vector<8x32xf32>
    %361 = math.tanh %360 : vector<8x32xf32>
    %362 = arith.mulf %357, %361 : vector<8x32xf32>
    %363 = arith.index_cast %317 : i32 to index
    %c0_84 = arith.constant 0 : index
    %364 = vector.load %arg13[%363, %c0_84] : memref<64x64xf32, #tpu.memory_space<vmem>>, vector<8x32xf32>
    tpu.vector_store %arg13[%363, %c0_84], %343 {strides = array<i32>} : memref<64x64xf32, #tpu.memory_space<vmem>>, vector<8x32xf32>,
    %365 = arith.index_cast %320 : i32 to index
    %c32_85 = arith.constant 32 : index
    %366 = vector.load %arg13[%365, %c32_85] : memref<64x64xf32, #tpu.memory_space<vmem>>, vector<8x32xf32>
    tpu.vector_store %arg13[%365, %c32_85], %362 {strides = array<i32>} : memref<64x64xf32, #tpu.memory_space<vmem>>, vector<8x32xf32>,
    %c7_i32_86 = arith.constant 7 : i32
    %c8_i32_87 = arith.constant 8 : i32
    %367 = arith.muli %c7_i32_86, %c8_i32_87 : i32
    %368 = tpu.assume_multiple %367, 8 : i32
    %c7_i32_88 = arith.constant 7 : i32
    %369 = arith.subi %c7_i32_88, %c7_i32_86 : i32
    %c8_i32_89 = arith.constant 8 : i32
    %370 = arith.muli %369, %c8_i32_89 : i32
    %371 = tpu.assume_multiple %370, 8 : i32
    %372 = arith.index_cast %368 : i32 to index
    %c0_90 = arith.constant 0 : index
    %373 = vector.load %arg12[%372, %c0_90] : memref<64x256xf32, #tpu.memory_space<vmem>>, vector<8x256xf32>
    %374 = arith.index_cast %371 : i32 to index
    %c0_91 = arith.constant 0 : index
    %375 = vector.load %arg12[%374, %c0_91] : memref<64x256xf32, #tpu.memory_space<vmem>>, vector<8x256xf32>
    %376 = vector.extract_strided_slice %373 {offsets = [0, 0], sizes = [8, 128], strides = [1, 1]} : vector<8x256xf32> to vector<8x128xf32>
    %cst_92 = arith.constant dense<0.000000e+00> : vector<8x128xf32>
    %377 = tpu.matmul %343, %8, %cst_92 {dimension_numbers = #tpu.dot_dimension_numbers<[1], [0], [0], [1], [0, 0, 1, 1], [], []>} : vector<8x32xf32>, vector<32x128xf32>, vector<8x128xf32> -> vector<8x128xf32>
    %378 = arith.addf %376, %377 : vector<8x128xf32>
    %379 = vector.extract_strided_slice %378 {offsets = [0, 0], sizes = [8, 96], strides = [1, 1]} : vector<8x128xf32> to vector<8x96xf32>
    %380 = arith.negf %379 : vector<8x96xf32>
    %381 = math.exp %380 : vector<8x96xf32>
    %cst_93 = arith.constant 1.000000e+00 : f32
    %382 = vector.broadcast %cst_93 : f32 to vector<8x96xf32>
    %383 = arith.addf %382, %381 : vector<8x96xf32>
    %384 = arith.divf %382, %383 : vector<8x96xf32>
    %385 = vector.extract_strided_slice %378 {offsets = [0, 96], sizes = [8, 32], strides = [1, 1]} : vector<8x128xf32> to vector<8x32xf32>
    %386 = math.tanh %385 : vector<8x32xf32>
    %387 = vector.extract_strided_slice %384 {offsets = [0, 0], sizes = [8, 32], strides = [1, 1]} : vector<8x96xf32> to vector<8x32xf32>
    %388 = vector.extract_strided_slice %384 {offsets = [0, 32], sizes = [8, 32], strides = [1, 1]} : vector<8x96xf32> to vector<8x32xf32>
    %389 = vector.extract_strided_slice %384 {offsets = [0, 64], sizes = [8, 32], strides = [1, 1]} : vector<8x96xf32> to vector<8x32xf32>
    %390 = arith.mulf %388, %341 : vector<8x32xf32>
    %391 = arith.mulf %387, %386 : vector<8x32xf32>
    %392 = arith.addf %390, %391 : vector<8x32xf32>
    %393 = math.tanh %392 : vector<8x32xf32>
    %394 = arith.mulf %389, %393 : vector<8x32xf32>
    %395 = vector.extract_strided_slice %375 {offsets = [0, 128], sizes = [8, 128], strides = [1, 1]} : vector<8x256xf32> to vector<8x128xf32>
    %cst_94 = arith.constant dense<0.000000e+00> : vector<8x128xf32>
    %396 = tpu.matmul %362, %9, %cst_94 {dimension_numbers = #tpu.dot_dimension_numbers<[1], [0], [0], [1], [0, 0, 1, 1], [], []>} : vector<8x32xf32>, vector<32x128xf32>, vector<8x128xf32> -> vector<8x128xf32>
    %397 = arith.addf %395, %396 : vector<8x128xf32>
    %398 = vector.extract_strided_slice %397 {offsets = [0, 0], sizes = [8, 96], strides = [1, 1]} : vector<8x128xf32> to vector<8x96xf32>
    %399 = arith.negf %398 : vector<8x96xf32>
    %400 = math.exp %399 : vector<8x96xf32>
    %cst_95 = arith.constant 1.000000e+00 : f32
    %401 = vector.broadcast %cst_95 : f32 to vector<8x96xf32>
    %402 = arith.addf %401, %400 : vector<8x96xf32>
    %403 = arith.divf %401, %402 : vector<8x96xf32>
    %404 = vector.extract_strided_slice %397 {offsets = [0, 96], sizes = [8, 32], strides = [1, 1]} : vector<8x128xf32> to vector<8x32xf32>
    %405 = math.tanh %404 : vector<8x32xf32>
    %406 = vector.extract_strided_slice %403 {offsets = [0, 0], sizes = [8, 32], strides = [1, 1]} : vector<8x96xf32> to vector<8x32xf32>
    %407 = vector.extract_strided_slice %403 {offsets = [0, 32], sizes = [8, 32], strides = [1, 1]} : vector<8x96xf32> to vector<8x32xf32>
    %408 = vector.extract_strided_slice %403 {offsets = [0, 64], sizes = [8, 32], strides = [1, 1]} : vector<8x96xf32> to vector<8x32xf32>
    %409 = arith.mulf %407, %360 : vector<8x32xf32>
    %410 = arith.mulf %406, %405 : vector<8x32xf32>
    %411 = arith.addf %409, %410 : vector<8x32xf32>
    %412 = math.tanh %411 : vector<8x32xf32>
    %413 = arith.mulf %408, %412 : vector<8x32xf32>
    %414 = arith.index_cast %368 : i32 to index
    %c0_96 = arith.constant 0 : index
    %415 = vector.load %arg13[%414, %c0_96] : memref<64x64xf32, #tpu.memory_space<vmem>>, vector<8x32xf32>
    tpu.vector_store %arg13[%414, %c0_96], %394 {strides = array<i32>} : memref<64x64xf32, #tpu.memory_space<vmem>>, vector<8x32xf32>,
    %416 = arith.index_cast %371 : i32 to index
    %c32_97 = arith.constant 32 : index
    %417 = vector.load %arg13[%416, %c32_97] : memref<64x64xf32, #tpu.memory_space<vmem>>, vector<8x32xf32>
    tpu.vector_store %arg13[%416, %c32_97], %413 {strides = array<i32>} : memref<64x64xf32, #tpu.memory_space<vmem>>, vector<8x32xf32>,
    %c8_i32_98 = arith.constant 8 : i32
    %c0_99 = arith.constant 0 : index
    %c0_100 = arith.constant 0 : index
    %418 = vector.load %arg13[%c0_99, %c0_100] : memref<64x64xf32, #tpu.memory_space<vmem>>, vector<64x64xf32>
    %c0_101 = arith.constant 0 : index
    %c0_102 = arith.constant 0 : index
    %419 = vector.load %arg5[%c0_101, %c0_102] : memref<64x256xf32, #tpu.memory_space<vmem>>, vector<64x256xf32>
    %cst_103 = arith.constant dense<0.000000e+00> : vector<64x256xf32>
    %420 = tpu.matmul %418, %419, %cst_103 {dimension_numbers = #tpu.dot_dimension_numbers<[1], [0], [0], [1], [0, 0, 1, 1], [], []>} : vector<64x64xf32>, vector<64x256xf32>, vector<64x256xf32> -> vector<64x256xf32>
    %c0_104 = arith.constant 0 : index
    %c0_105 = arith.constant 0 : index
    %421 = vector.load %arg6[%c0_104, %c0_105] : memref<1x256xf32, #tpu.memory_space<vmem>>, vector<1x256xf32>
    %422 = vector.broadcast %421 : vector<1x256xf32> to vector<64x256xf32>
    %423 = arith.addf %420, %422 : vector<64x256xf32>
    %c0_106 = arith.constant 0 : index
    %c0_107 = arith.constant 0 : index
    %424 = vector.load %arg14[%c0_106, %c0_107] : memref<64x256xf32, #tpu.memory_space<vmem>>, vector<64x256xf32>
    tpu.vector_store %arg14[%c0_106, %c0_107], %423 {strides = array<i32>} : memref<64x256xf32, #tpu.memory_space<vmem>>, vector<64x256xf32>,
    %c0_108 = arith.constant 0 : index
    %c0_109 = arith.constant 0 : index
    %425 = vector.load %arg7[%c0_108, %c0_109] : memref<32x128xf32, #tpu.memory_space<vmem>>, vector<32x128xf32>
    %c0_110 = arith.constant 0 : index
    %c0_111 = arith.constant 0 : index
    %426 = vector.load %arg8[%c0_110, %c0_111] : memref<32x128xf32, #tpu.memory_space<vmem>>, vector<32x128xf32>
    %c0_i32_112 = arith.constant 0 : i32
    %c8_i32_113 = arith.constant 8 : i32
    %427 = arith.muli %c0_i32_112, %c8_i32_113 : i32
    %428 = tpu.assume_multiple %427, 8 : i32
    %c7_i32_114 = arith.constant 7 : i32
    %429 = arith.subi %c7_i32_114, %c0_i32_112 : i32
    %c8_i32_115 = arith.constant 8 : i32
    %430 = arith.muli %429, %c8_i32_115 : i32
    %431 = tpu.assume_multiple %430, 8 : i32
    %432 = arith.index_cast %428 : i32 to index
    %c0_116 = arith.constant 0 : index
    %433 = vector.load %arg14[%432, %c0_116] : memref<64x256xf32, #tpu.memory_space<vmem>>, vector<8x256xf32>
    %434 = arith.index_cast %431 : i32 to index
    %c0_117 = arith.constant 0 : index
    %435 = vector.load %arg14[%434, %c0_117] : memref<64x256xf32, #tpu.memory_space<vmem>>, vector<8x256xf32>
    %436 = vector.extract_strided_slice %433 {offsets = [0, 0], sizes = [8, 128], strides = [1, 1]} : vector<8x256xf32> to vector<8x128xf32>
    %cst_118 = arith.constant dense<0.000000e+00> : vector<8x128xf32>
    %437 = tpu.matmul %0, %425, %cst_118 {dimension_numbers = #tpu.dot_dimension_numbers<[1], [0], [0], [1], [0, 0, 1, 1], [], []>} : vector<8x32xf32>, vector<32x128xf32>, vector<8x128xf32> -> vector<8x128xf32>
    %438 = arith.addf %436, %437 : vector<8x128xf32>
    %439 = vector.extract_strided_slice %438 {offsets = [0, 0], sizes = [8, 96], strides = [1, 1]} : vector<8x128xf32> to vector<8x96xf32>
    %440 = arith.negf %439 : vector<8x96xf32>
    %441 = math.exp %440 : vector<8x96xf32>
    %cst_119 = arith.constant 1.000000e+00 : f32
    %442 = vector.broadcast %cst_119 : f32 to vector<8x96xf32>
    %443 = arith.addf %442, %441 : vector<8x96xf32>
    %444 = arith.divf %442, %443 : vector<8x96xf32>
    %445 = vector.extract_strided_slice %438 {offsets = [0, 96], sizes = [8, 32], strides = [1, 1]} : vector<8x128xf32> to vector<8x32xf32>
    %446 = math.tanh %445 : vector<8x32xf32>
    %447 = vector.extract_strided_slice %444 {offsets = [0, 0], sizes = [8, 32], strides = [1, 1]} : vector<8x96xf32> to vector<8x32xf32>
    %448 = vector.extract_strided_slice %444 {offsets = [0, 32], sizes = [8, 32], strides = [1, 1]} : vector<8x96xf32> to vector<8x32xf32>
    %449 = vector.extract_strided_slice %444 {offsets = [0, 64], sizes = [8, 32], strides = [1, 1]} : vector<8x96xf32> to vector<8x32xf32>
    %450 = arith.mulf %448, %0 : vector<8x32xf32>
    %451 = arith.mulf %447, %446 : vector<8x32xf32>
    %452 = arith.addf %450, %451 : vector<8x32xf32>
    %453 = math.tanh %452 : vector<8x32xf32>
    %454 = arith.mulf %449, %453 : vector<8x32xf32>
    %455 = vector.extract_strided_slice %435 {offsets = [0, 128], sizes = [8, 128], strides = [1, 1]} : vector<8x256xf32> to vector<8x128xf32>
    %cst_120 = arith.constant dense<0.000000e+00> : vector<8x128xf32>
    %456 = tpu.matmul %0, %426, %cst_120 {dimension_numbers = #tpu.dot_dimension_numbers<[1], [0], [0], [1], [0, 0, 1, 1], [], []>} : vector<8x32xf32>, vector<32x128xf32>, vector<8x128xf32> -> vector<8x128xf32>
    %457 = arith.addf %455, %456 : vector<8x128xf32>
    %458 = vector.extract_strided_slice %457 {offsets = [0, 0], sizes = [8, 96], strides = [1, 1]} : vector<8x128xf32> to vector<8x96xf32>
    %459 = arith.negf %458 : vector<8x96xf32>
    %460 = math.exp %459 : vector<8x96xf32>
    %cst_121 = arith.constant 1.000000e+00 : f32
    %461 = vector.broadcast %cst_121 : f32 to vector<8x96xf32>
    %462 = arith.addf %461, %460 : vector<8x96xf32>
    %463 = arith.divf %461, %462 : vector<8x96xf32>
    %464 = vector.extract_strided_slice %457 {offsets = [0, 96], sizes = [8, 32], strides = [1, 1]} : vector<8x128xf32> to vector<8x32xf32>
    %465 = math.tanh %464 : vector<8x32xf32>
    %466 = vector.extract_strided_slice %463 {offsets = [0, 0], sizes = [8, 32], strides = [1, 1]} : vector<8x96xf32> to vector<8x32xf32>
    %467 = vector.extract_strided_slice %463 {offsets = [0, 32], sizes = [8, 32], strides = [1, 1]} : vector<8x96xf32> to vector<8x32xf32>
    %468 = vector.extract_strided_slice %463 {offsets = [0, 64], sizes = [8, 32], strides = [1, 1]} : vector<8x96xf32> to vector<8x32xf32>
    %469 = arith.mulf %467, %0 : vector<8x32xf32>
    %470 = arith.mulf %466, %465 : vector<8x32xf32>
    %471 = arith.addf %469, %470 : vector<8x32xf32>
    %472 = math.tanh %471 : vector<8x32xf32>
    %473 = arith.mulf %468, %472 : vector<8x32xf32>
    %c1_i32_122 = arith.constant 1 : i32
    %c8_i32_123 = arith.constant 8 : i32
    %474 = arith.muli %c1_i32_122, %c8_i32_123 : i32
    %475 = tpu.assume_multiple %474, 8 : i32
    %c7_i32_124 = arith.constant 7 : i32
    %476 = arith.subi %c7_i32_124, %c1_i32_122 : i32
    %c8_i32_125 = arith.constant 8 : i32
    %477 = arith.muli %476, %c8_i32_125 : i32
    %478 = tpu.assume_multiple %477, 8 : i32
    %479 = arith.index_cast %475 : i32 to index
    %c0_126 = arith.constant 0 : index
    %480 = vector.load %arg14[%479, %c0_126] : memref<64x256xf32, #tpu.memory_space<vmem>>, vector<8x256xf32>
    %481 = arith.index_cast %478 : i32 to index
    %c0_127 = arith.constant 0 : index
    %482 = vector.load %arg14[%481, %c0_127] : memref<64x256xf32, #tpu.memory_space<vmem>>, vector<8x256xf32>
    %483 = vector.extract_strided_slice %480 {offsets = [0, 0], sizes = [8, 128], strides = [1, 1]} : vector<8x256xf32> to vector<8x128xf32>
    %cst_128 = arith.constant dense<0.000000e+00> : vector<8x128xf32>
    %484 = tpu.matmul %454, %425, %cst_128 {dimension_numbers = #tpu.dot_dimension_numbers<[1], [0], [0], [1], [0, 0, 1, 1], [], []>} : vector<8x32xf32>, vector<32x128xf32>, vector<8x128xf32> -> vector<8x128xf32>
    %485 = arith.addf %483, %484 : vector<8x128xf32>
    %486 = vector.extract_strided_slice %485 {offsets = [0, 0], sizes = [8, 96], strides = [1, 1]} : vector<8x128xf32> to vector<8x96xf32>
    %487 = arith.negf %486 : vector<8x96xf32>
    %488 = math.exp %487 : vector<8x96xf32>
    %cst_129 = arith.constant 1.000000e+00 : f32
    %489 = vector.broadcast %cst_129 : f32 to vector<8x96xf32>
    %490 = arith.addf %489, %488 : vector<8x96xf32>
    %491 = arith.divf %489, %490 : vector<8x96xf32>
    %492 = vector.extract_strided_slice %485 {offsets = [0, 96], sizes = [8, 32], strides = [1, 1]} : vector<8x128xf32> to vector<8x32xf32>
    %493 = math.tanh %492 : vector<8x32xf32>
    %494 = vector.extract_strided_slice %491 {offsets = [0, 0], sizes = [8, 32], strides = [1, 1]} : vector<8x96xf32> to vector<8x32xf32>
    %495 = vector.extract_strided_slice %491 {offsets = [0, 32], sizes = [8, 32], strides = [1, 1]} : vector<8x96xf32> to vector<8x32xf32>
    %496 = vector.extract_strided_slice %491 {offsets = [0, 64], sizes = [8, 32], strides = [1, 1]} : vector<8x96xf32> to vector<8x32xf32>
    %497 = arith.mulf %495, %452 : vector<8x32xf32>
    %498 = arith.mulf %494, %493 : vector<8x32xf32>
    %499 = arith.addf %497, %498 : vector<8x32xf32>
    %500 = math.tanh %499 : vector<8x32xf32>
    %501 = arith.mulf %496, %500 : vector<8x32xf32>
    %502 = vector.extract_strided_slice %482 {offsets = [0, 128], sizes = [8, 128], strides = [1, 1]} : vector<8x256xf32> to vector<8x128xf32>
    %cst_130 = arith.constant dense<0.000000e+00> : vector<8x128xf32>
    %503 = tpu.matmul %473, %426, %cst_130 {dimension_numbers = #tpu.dot_dimension_numbers<[1], [0], [0], [1], [0, 0, 1, 1], [], []>} : vector<8x32xf32>, vector<32x128xf32>, vector<8x128xf32> -> vector<8x128xf32>
    %504 = arith.addf %502, %503 : vector<8x128xf32>
    %505 = vector.extract_strided_slice %504 {offsets = [0, 0], sizes = [8, 96], strides = [1, 1]} : vector<8x128xf32> to vector<8x96xf32>
    %506 = arith.negf %505 : vector<8x96xf32>
    %507 = math.exp %506 : vector<8x96xf32>
    %cst_131 = arith.constant 1.000000e+00 : f32
    %508 = vector.broadcast %cst_131 : f32 to vector<8x96xf32>
    %509 = arith.addf %508, %507 : vector<8x96xf32>
    %510 = arith.divf %508, %509 : vector<8x96xf32>
    %511 = vector.extract_strided_slice %504 {offsets = [0, 96], sizes = [8, 32], strides = [1, 1]} : vector<8x128xf32> to vector<8x32xf32>
    %512 = math.tanh %511 : vector<8x32xf32>
    %513 = vector.extract_strided_slice %510 {offsets = [0, 0], sizes = [8, 32], strides = [1, 1]} : vector<8x96xf32> to vector<8x32xf32>
    %514 = vector.extract_strided_slice %510 {offsets = [0, 32], sizes = [8, 32], strides = [1, 1]} : vector<8x96xf32> to vector<8x32xf32>
    %515 = vector.extract_strided_slice %510 {offsets = [0, 64], sizes = [8, 32], strides = [1, 1]} : vector<8x96xf32> to vector<8x32xf32>
    %516 = arith.mulf %514, %471 : vector<8x32xf32>
    %517 = arith.mulf %513, %512 : vector<8x32xf32>
    %518 = arith.addf %516, %517 : vector<8x32xf32>
    %519 = math.tanh %518 : vector<8x32xf32>
    %520 = arith.mulf %515, %519 : vector<8x32xf32>
    %c2_i32_132 = arith.constant 2 : i32
    %c8_i32_133 = arith.constant 8 : i32
    %521 = arith.muli %c2_i32_132, %c8_i32_133 : i32
    %522 = tpu.assume_multiple %521, 8 : i32
    %c7_i32_134 = arith.constant 7 : i32
    %523 = arith.subi %c7_i32_134, %c2_i32_132 : i32
    %c8_i32_135 = arith.constant 8 : i32
    %524 = arith.muli %523, %c8_i32_135 : i32
    %525 = tpu.assume_multiple %524, 8 : i32
    %526 = arith.index_cast %522 : i32 to index
    %c0_136 = arith.constant 0 : index
    %527 = vector.load %arg14[%526, %c0_136] : memref<64x256xf32, #tpu.memory_space<vmem>>, vector<8x256xf32>
    %528 = arith.index_cast %525 : i32 to index
    %c0_137 = arith.constant 0 : index
    %529 = vector.load %arg14[%528, %c0_137] : memref<64x256xf32, #tpu.memory_space<vmem>>, vector<8x256xf32>
    %530 = vector.extract_strided_slice %527 {offsets = [0, 0], sizes = [8, 128], strides = [1, 1]} : vector<8x256xf32> to vector<8x128xf32>
    %cst_138 = arith.constant dense<0.000000e+00> : vector<8x128xf32>
    %531 = tpu.matmul %501, %425, %cst_138 {dimension_numbers = #tpu.dot_dimension_numbers<[1], [0], [0], [1], [0, 0, 1, 1], [], []>} : vector<8x32xf32>, vector<32x128xf32>, vector<8x128xf32> -> vector<8x128xf32>
    %532 = arith.addf %530, %531 : vector<8x128xf32>
    %533 = vector.extract_strided_slice %532 {offsets = [0, 0], sizes = [8, 96], strides = [1, 1]} : vector<8x128xf32> to vector<8x96xf32>
    %534 = arith.negf %533 : vector<8x96xf32>
    %535 = math.exp %534 : vector<8x96xf32>
    %cst_139 = arith.constant 1.000000e+00 : f32
    %536 = vector.broadcast %cst_139 : f32 to vector<8x96xf32>
    %537 = arith.addf %536, %535 : vector<8x96xf32>
    %538 = arith.divf %536, %537 : vector<8x96xf32>
    %539 = vector.extract_strided_slice %532 {offsets = [0, 96], sizes = [8, 32], strides = [1, 1]} : vector<8x128xf32> to vector<8x32xf32>
    %540 = math.tanh %539 : vector<8x32xf32>
    %541 = vector.extract_strided_slice %538 {offsets = [0, 0], sizes = [8, 32], strides = [1, 1]} : vector<8x96xf32> to vector<8x32xf32>
    %542 = vector.extract_strided_slice %538 {offsets = [0, 32], sizes = [8, 32], strides = [1, 1]} : vector<8x96xf32> to vector<8x32xf32>
    %543 = vector.extract_strided_slice %538 {offsets = [0, 64], sizes = [8, 32], strides = [1, 1]} : vector<8x96xf32> to vector<8x32xf32>
    %544 = arith.mulf %542, %499 : vector<8x32xf32>
    %545 = arith.mulf %541, %540 : vector<8x32xf32>
    %546 = arith.addf %544, %545 : vector<8x32xf32>
    %547 = math.tanh %546 : vector<8x32xf32>
    %548 = arith.mulf %543, %547 : vector<8x32xf32>
    %549 = vector.extract_strided_slice %529 {offsets = [0, 128], sizes = [8, 128], strides = [1, 1]} : vector<8x256xf32> to vector<8x128xf32>
    %cst_140 = arith.constant dense<0.000000e+00> : vector<8x128xf32>
    %550 = tpu.matmul %520, %426, %cst_140 {dimension_numbers = #tpu.dot_dimension_numbers<[1], [0], [0], [1], [0, 0, 1, 1], [], []>} : vector<8x32xf32>, vector<32x128xf32>, vector<8x128xf32> -> vector<8x128xf32>
    %551 = arith.addf %549, %550 : vector<8x128xf32>
    %552 = vector.extract_strided_slice %551 {offsets = [0, 0], sizes = [8, 96], strides = [1, 1]} : vector<8x128xf32> to vector<8x96xf32>
    %553 = arith.negf %552 : vector<8x96xf32>
    %554 = math.exp %553 : vector<8x96xf32>
    %cst_141 = arith.constant 1.000000e+00 : f32
    %555 = vector.broadcast %cst_141 : f32 to vector<8x96xf32>
    %556 = arith.addf %555, %554 : vector<8x96xf32>
    %557 = arith.divf %555, %556 : vector<8x96xf32>
    %558 = vector.extract_strided_slice %551 {offsets = [0, 96], sizes = [8, 32], strides = [1, 1]} : vector<8x128xf32> to vector<8x32xf32>
    %559 = math.tanh %558 : vector<8x32xf32>
    %560 = vector.extract_strided_slice %557 {offsets = [0, 0], sizes = [8, 32], strides = [1, 1]} : vector<8x96xf32> to vector<8x32xf32>
    %561 = vector.extract_strided_slice %557 {offsets = [0, 32], sizes = [8, 32], strides = [1, 1]} : vector<8x96xf32> to vector<8x32xf32>
    %562 = vector.extract_strided_slice %557 {offsets = [0, 64], sizes = [8, 32], strides = [1, 1]} : vector<8x96xf32> to vector<8x32xf32>
    %563 = arith.mulf %561, %518 : vector<8x32xf32>
    %564 = arith.mulf %560, %559 : vector<8x32xf32>
    %565 = arith.addf %563, %564 : vector<8x32xf32>
    %566 = math.tanh %565 : vector<8x32xf32>
    %567 = arith.mulf %562, %566 : vector<8x32xf32>
    %c3_i32_142 = arith.constant 3 : i32
    %c8_i32_143 = arith.constant 8 : i32
    %568 = arith.muli %c3_i32_142, %c8_i32_143 : i32
    %569 = tpu.assume_multiple %568, 8 : i32
    %c7_i32_144 = arith.constant 7 : i32
    %570 = arith.subi %c7_i32_144, %c3_i32_142 : i32
    %c8_i32_145 = arith.constant 8 : i32
    %571 = arith.muli %570, %c8_i32_145 : i32
    %572 = tpu.assume_multiple %571, 8 : i32
    %573 = arith.index_cast %569 : i32 to index
    %c0_146 = arith.constant 0 : index
    %574 = vector.load %arg14[%573, %c0_146] : memref<64x256xf32, #tpu.memory_space<vmem>>, vector<8x256xf32>
    %575 = arith.index_cast %572 : i32 to index
    %c0_147 = arith.constant 0 : index
    %576 = vector.load %arg14[%575, %c0_147] : memref<64x256xf32, #tpu.memory_space<vmem>>, vector<8x256xf32>
    %577 = vector.extract_strided_slice %574 {offsets = [0, 0], sizes = [8, 128], strides = [1, 1]} : vector<8x256xf32> to vector<8x128xf32>
    %cst_148 = arith.constant dense<0.000000e+00> : vector<8x128xf32>
    %578 = tpu.matmul %548, %425, %cst_148 {dimension_numbers = #tpu.dot_dimension_numbers<[1], [0], [0], [1], [0, 0, 1, 1], [], []>} : vector<8x32xf32>, vector<32x128xf32>, vector<8x128xf32> -> vector<8x128xf32>
    %579 = arith.addf %577, %578 : vector<8x128xf32>
    %580 = vector.extract_strided_slice %579 {offsets = [0, 0], sizes = [8, 96], strides = [1, 1]} : vector<8x128xf32> to vector<8x96xf32>
    %581 = arith.negf %580 : vector<8x96xf32>
    %582 = math.exp %581 : vector<8x96xf32>
    %cst_149 = arith.constant 1.000000e+00 : f32
    %583 = vector.broadcast %cst_149 : f32 to vector<8x96xf32>
    %584 = arith.addf %583, %582 : vector<8x96xf32>
    %585 = arith.divf %583, %584 : vector<8x96xf32>
    %586 = vector.extract_strided_slice %579 {offsets = [0, 96], sizes = [8, 32], strides = [1, 1]} : vector<8x128xf32> to vector<8x32xf32>
    %587 = math.tanh %586 : vector<8x32xf32>
    %588 = vector.extract_strided_slice %585 {offsets = [0, 0], sizes = [8, 32], strides = [1, 1]} : vector<8x96xf32> to vector<8x32xf32>
    %589 = vector.extract_strided_slice %585 {offsets = [0, 32], sizes = [8, 32], strides = [1, 1]} : vector<8x96xf32> to vector<8x32xf32>
    %590 = vector.extract_strided_slice %585 {offsets = [0, 64], sizes = [8, 32], strides = [1, 1]} : vector<8x96xf32> to vector<8x32xf32>
    %591 = arith.mulf %589, %546 : vector<8x32xf32>
    %592 = arith.mulf %588, %587 : vector<8x32xf32>
    %593 = arith.addf %591, %592 : vector<8x32xf32>
    %594 = math.tanh %593 : vector<8x32xf32>
    %595 = arith.mulf %590, %594 : vector<8x32xf32>
    %596 = vector.extract_strided_slice %576 {offsets = [0, 128], sizes = [8, 128], strides = [1, 1]} : vector<8x256xf32> to vector<8x128xf32>
    %cst_150 = arith.constant dense<0.000000e+00> : vector<8x128xf32>
    %597 = tpu.matmul %567, %426, %cst_150 {dimension_numbers = #tpu.dot_dimension_numbers<[1], [0], [0], [1], [0, 0, 1, 1], [], []>} : vector<8x32xf32>, vector<32x128xf32>, vector<8x128xf32> -> vector<8x128xf32>
    %598 = arith.addf %596, %597 : vector<8x128xf32>
    %599 = vector.extract_strided_slice %598 {offsets = [0, 0], sizes = [8, 96], strides = [1, 1]} : vector<8x128xf32> to vector<8x96xf32>
    %600 = arith.negf %599 : vector<8x96xf32>
    %601 = math.exp %600 : vector<8x96xf32>
    %cst_151 = arith.constant 1.000000e+00 : f32
    %602 = vector.broadcast %cst_151 : f32 to vector<8x96xf32>
    %603 = arith.addf %602, %601 : vector<8x96xf32>
    %604 = arith.divf %602, %603 : vector<8x96xf32>
    %605 = vector.extract_strided_slice %598 {offsets = [0, 96], sizes = [8, 32], strides = [1, 1]} : vector<8x128xf32> to vector<8x32xf32>
    %606 = math.tanh %605 : vector<8x32xf32>
    %607 = vector.extract_strided_slice %604 {offsets = [0, 0], sizes = [8, 32], strides = [1, 1]} : vector<8x96xf32> to vector<8x32xf32>
    %608 = vector.extract_strided_slice %604 {offsets = [0, 32], sizes = [8, 32], strides = [1, 1]} : vector<8x96xf32> to vector<8x32xf32>
    %609 = vector.extract_strided_slice %604 {offsets = [0, 64], sizes = [8, 32], strides = [1, 1]} : vector<8x96xf32> to vector<8x32xf32>
    %610 = arith.mulf %608, %565 : vector<8x32xf32>
    %611 = arith.mulf %607, %606 : vector<8x32xf32>
    %612 = arith.addf %610, %611 : vector<8x32xf32>
    %613 = math.tanh %612 : vector<8x32xf32>
    %614 = arith.mulf %609, %613 : vector<8x32xf32>
    %c4_i32_152 = arith.constant 4 : i32
    %c8_i32_153 = arith.constant 8 : i32
    %615 = arith.muli %c4_i32_152, %c8_i32_153 : i32
    %616 = tpu.assume_multiple %615, 8 : i32
    %c7_i32_154 = arith.constant 7 : i32
    %617 = arith.subi %c7_i32_154, %c4_i32_152 : i32
    %c8_i32_155 = arith.constant 8 : i32
    %618 = arith.muli %617, %c8_i32_155 : i32
    %619 = tpu.assume_multiple %618, 8 : i32
    %620 = arith.index_cast %616 : i32 to index
    %c0_156 = arith.constant 0 : index
    %621 = vector.load %arg14[%620, %c0_156] : memref<64x256xf32, #tpu.memory_space<vmem>>, vector<8x256xf32>
    %622 = arith.index_cast %619 : i32 to index
    %c0_157 = arith.constant 0 : index
    %623 = vector.load %arg14[%622, %c0_157] : memref<64x256xf32, #tpu.memory_space<vmem>>, vector<8x256xf32>
    %624 = vector.extract_strided_slice %621 {offsets = [0, 0], sizes = [8, 128], strides = [1, 1]} : vector<8x256xf32> to vector<8x128xf32>
    %cst_158 = arith.constant dense<0.000000e+00> : vector<8x128xf32>
    %625 = tpu.matmul %595, %425, %cst_158 {dimension_numbers = #tpu.dot_dimension_numbers<[1], [0], [0], [1], [0, 0, 1, 1], [], []>} : vector<8x32xf32>, vector<32x128xf32>, vector<8x128xf32> -> vector<8x128xf32>
    %626 = arith.addf %624, %625 : vector<8x128xf32>
    %627 = vector.extract_strided_slice %626 {offsets = [0, 0], sizes = [8, 96], strides = [1, 1]} : vector<8x128xf32> to vector<8x96xf32>
    %628 = arith.negf %627 : vector<8x96xf32>
    %629 = math.exp %628 : vector<8x96xf32>
    %cst_159 = arith.constant 1.000000e+00 : f32
    %630 = vector.broadcast %cst_159 : f32 to vector<8x96xf32>
    %631 = arith.addf %630, %629 : vector<8x96xf32>
    %632 = arith.divf %630, %631 : vector<8x96xf32>
    %633 = vector.extract_strided_slice %626 {offsets = [0, 96], sizes = [8, 32], strides = [1, 1]} : vector<8x128xf32> to vector<8x32xf32>
    %634 = math.tanh %633 : vector<8x32xf32>
    %635 = vector.extract_strided_slice %632 {offsets = [0, 0], sizes = [8, 32], strides = [1, 1]} : vector<8x96xf32> to vector<8x32xf32>
    %636 = vector.extract_strided_slice %632 {offsets = [0, 32], sizes = [8, 32], strides = [1, 1]} : vector<8x96xf32> to vector<8x32xf32>
    %637 = vector.extract_strided_slice %632 {offsets = [0, 64], sizes = [8, 32], strides = [1, 1]} : vector<8x96xf32> to vector<8x32xf32>
    %638 = arith.mulf %636, %593 : vector<8x32xf32>
    %639 = arith.mulf %635, %634 : vector<8x32xf32>
    %640 = arith.addf %638, %639 : vector<8x32xf32>
    %641 = math.tanh %640 : vector<8x32xf32>
    %642 = arith.mulf %637, %641 : vector<8x32xf32>
    %643 = vector.extract_strided_slice %623 {offsets = [0, 128], sizes = [8, 128], strides = [1, 1]} : vector<8x256xf32> to vector<8x128xf32>
    %cst_160 = arith.constant dense<0.000000e+00> : vector<8x128xf32>
    %644 = tpu.matmul %614, %426, %cst_160 {dimension_numbers = #tpu.dot_dimension_numbers<[1], [0], [0], [1], [0, 0, 1, 1], [], []>} : vector<8x32xf32>, vector<32x128xf32>, vector<8x128xf32> -> vector<8x128xf32>
    %645 = arith.addf %643, %644 : vector<8x128xf32>
    %646 = vector.extract_strided_slice %645 {offsets = [0, 0], sizes = [8, 96], strides = [1, 1]} : vector<8x128xf32> to vector<8x96xf32>
    %647 = arith.negf %646 : vector<8x96xf32>
    %648 = math.exp %647 : vector<8x96xf32>
    %cst_161 = arith.constant 1.000000e+00 : f32
    %649 = vector.broadcast %cst_161 : f32 to vector<8x96xf32>
    %650 = arith.addf %649, %648 : vector<8x96xf32>
    %651 = arith.divf %649, %650 : vector<8x96xf32>
    %652 = vector.extract_strided_slice %645 {offsets = [0, 96], sizes = [8, 32], strides = [1, 1]} : vector<8x128xf32> to vector<8x32xf32>
    %653 = math.tanh %652 : vector<8x32xf32>
    %654 = vector.extract_strided_slice %651 {offsets = [0, 0], sizes = [8, 32], strides = [1, 1]} : vector<8x96xf32> to vector<8x32xf32>
    %655 = vector.extract_strided_slice %651 {offsets = [0, 32], sizes = [8, 32], strides = [1, 1]} : vector<8x96xf32> to vector<8x32xf32>
    %656 = vector.extract_strided_slice %651 {offsets = [0, 64], sizes = [8, 32], strides = [1, 1]} : vector<8x96xf32> to vector<8x32xf32>
    %657 = arith.mulf %655, %612 : vector<8x32xf32>
    %658 = arith.mulf %654, %653 : vector<8x32xf32>
    %659 = arith.addf %657, %658 : vector<8x32xf32>
    %660 = math.tanh %659 : vector<8x32xf32>
    %661 = arith.mulf %656, %660 : vector<8x32xf32>
    %c5_i32_162 = arith.constant 5 : i32
    %c8_i32_163 = arith.constant 8 : i32
    %662 = arith.muli %c5_i32_162, %c8_i32_163 : i32
    %663 = tpu.assume_multiple %662, 8 : i32
    %c7_i32_164 = arith.constant 7 : i32
    %664 = arith.subi %c7_i32_164, %c5_i32_162 : i32
    %c8_i32_165 = arith.constant 8 : i32
    %665 = arith.muli %664, %c8_i32_165 : i32
    %666 = tpu.assume_multiple %665, 8 : i32
    %667 = arith.index_cast %663 : i32 to index
    %c0_166 = arith.constant 0 : index
    %668 = vector.load %arg14[%667, %c0_166] : memref<64x256xf32, #tpu.memory_space<vmem>>, vector<8x256xf32>
    %669 = arith.index_cast %666 : i32 to index
    %c0_167 = arith.constant 0 : index
    %670 = vector.load %arg14[%669, %c0_167] : memref<64x256xf32, #tpu.memory_space<vmem>>, vector<8x256xf32>
    %671 = vector.extract_strided_slice %668 {offsets = [0, 0], sizes = [8, 128], strides = [1, 1]} : vector<8x256xf32> to vector<8x128xf32>
    %cst_168 = arith.constant dense<0.000000e+00> : vector<8x128xf32>
    %672 = tpu.matmul %642, %425, %cst_168 {dimension_numbers = #tpu.dot_dimension_numbers<[1], [0], [0], [1], [0, 0, 1, 1], [], []>} : vector<8x32xf32>, vector<32x128xf32>, vector<8x128xf32> -> vector<8x128xf32>
    %673 = arith.addf %671, %672 : vector<8x128xf32>
    %674 = vector.extract_strided_slice %673 {offsets = [0, 0], sizes = [8, 96], strides = [1, 1]} : vector<8x128xf32> to vector<8x96xf32>
    %675 = arith.negf %674 : vector<8x96xf32>
    %676 = math.exp %675 : vector<8x96xf32>
    %cst_169 = arith.constant 1.000000e+00 : f32
    %677 = vector.broadcast %cst_169 : f32 to vector<8x96xf32>
    %678 = arith.addf %677, %676 : vector<8x96xf32>
    %679 = arith.divf %677, %678 : vector<8x96xf32>
    %680 = vector.extract_strided_slice %673 {offsets = [0, 96], sizes = [8, 32], strides = [1, 1]} : vector<8x128xf32> to vector<8x32xf32>
    %681 = math.tanh %680 : vector<8x32xf32>
    %682 = vector.extract_strided_slice %679 {offsets = [0, 0], sizes = [8, 32], strides = [1, 1]} : vector<8x96xf32> to vector<8x32xf32>
    %683 = vector.extract_strided_slice %679 {offsets = [0, 32], sizes = [8, 32], strides = [1, 1]} : vector<8x96xf32> to vector<8x32xf32>
    %684 = vector.extract_strided_slice %679 {offsets = [0, 64], sizes = [8, 32], strides = [1, 1]} : vector<8x96xf32> to vector<8x32xf32>
    %685 = arith.mulf %683, %640 : vector<8x32xf32>
    %686 = arith.mulf %682, %681 : vector<8x32xf32>
    %687 = arith.addf %685, %686 : vector<8x32xf32>
    %688 = math.tanh %687 : vector<8x32xf32>
    %689 = arith.mulf %684, %688 : vector<8x32xf32>
    %690 = vector.extract_strided_slice %670 {offsets = [0, 128], sizes = [8, 128], strides = [1, 1]} : vector<8x256xf32> to vector<8x128xf32>
    %cst_170 = arith.constant dense<0.000000e+00> : vector<8x128xf32>
    %691 = tpu.matmul %661, %426, %cst_170 {dimension_numbers = #tpu.dot_dimension_numbers<[1], [0], [0], [1], [0, 0, 1, 1], [], []>} : vector<8x32xf32>, vector<32x128xf32>, vector<8x128xf32> -> vector<8x128xf32>
    %692 = arith.addf %690, %691 : vector<8x128xf32>
    %693 = vector.extract_strided_slice %692 {offsets = [0, 0], sizes = [8, 96], strides = [1, 1]} : vector<8x128xf32> to vector<8x96xf32>
    %694 = arith.negf %693 : vector<8x96xf32>
    %695 = math.exp %694 : vector<8x96xf32>
    %cst_171 = arith.constant 1.000000e+00 : f32
    %696 = vector.broadcast %cst_171 : f32 to vector<8x96xf32>
    %697 = arith.addf %696, %695 : vector<8x96xf32>
    %698 = arith.divf %696, %697 : vector<8x96xf32>
    %699 = vector.extract_strided_slice %692 {offsets = [0, 96], sizes = [8, 32], strides = [1, 1]} : vector<8x128xf32> to vector<8x32xf32>
    %700 = math.tanh %699 : vector<8x32xf32>
    %701 = vector.extract_strided_slice %698 {offsets = [0, 0], sizes = [8, 32], strides = [1, 1]} : vector<8x96xf32> to vector<8x32xf32>
    %702 = vector.extract_strided_slice %698 {offsets = [0, 32], sizes = [8, 32], strides = [1, 1]} : vector<8x96xf32> to vector<8x32xf32>
    %703 = vector.extract_strided_slice %698 {offsets = [0, 64], sizes = [8, 32], strides = [1, 1]} : vector<8x96xf32> to vector<8x32xf32>
    %704 = arith.mulf %702, %659 : vector<8x32xf32>
    %705 = arith.mulf %701, %700 : vector<8x32xf32>
    %706 = arith.addf %704, %705 : vector<8x32xf32>
    %707 = math.tanh %706 : vector<8x32xf32>
    %708 = arith.mulf %703, %707 : vector<8x32xf32>
    %c6_i32_172 = arith.constant 6 : i32
    %c8_i32_173 = arith.constant 8 : i32
    %709 = arith.muli %c6_i32_172, %c8_i32_173 : i32
    %710 = tpu.assume_multiple %709, 8 : i32
    %c7_i32_174 = arith.constant 7 : i32
    %711 = arith.subi %c7_i32_174, %c6_i32_172 : i32
    %c8_i32_175 = arith.constant 8 : i32
    %712 = arith.muli %711, %c8_i32_175 : i32
    %713 = tpu.assume_multiple %712, 8 : i32
    %714 = arith.index_cast %710 : i32 to index
    %c0_176 = arith.constant 0 : index
    %715 = vector.load %arg14[%714, %c0_176] : memref<64x256xf32, #tpu.memory_space<vmem>>, vector<8x256xf32>
    %716 = arith.index_cast %713 : i32 to index
    %c0_177 = arith.constant 0 : index
    %717 = vector.load %arg14[%716, %c0_177] : memref<64x256xf32, #tpu.memory_space<vmem>>, vector<8x256xf32>
    %718 = vector.extract_strided_slice %715 {offsets = [0, 0], sizes = [8, 128], strides = [1, 1]} : vector<8x256xf32> to vector<8x128xf32>
    %cst_178 = arith.constant dense<0.000000e+00> : vector<8x128xf32>
    %719 = tpu.matmul %689, %425, %cst_178 {dimension_numbers = #tpu.dot_dimension_numbers<[1], [0], [0], [1], [0, 0, 1, 1], [], []>} : vector<8x32xf32>, vector<32x128xf32>, vector<8x128xf32> -> vector<8x128xf32>
    %720 = arith.addf %718, %719 : vector<8x128xf32>
    %721 = vector.extract_strided_slice %720 {offsets = [0, 0], sizes = [8, 96], strides = [1, 1]} : vector<8x128xf32> to vector<8x96xf32>
    %722 = arith.negf %721 : vector<8x96xf32>
    %723 = math.exp %722 : vector<8x96xf32>
    %cst_179 = arith.constant 1.000000e+00 : f32
    %724 = vector.broadcast %cst_179 : f32 to vector<8x96xf32>
    %725 = arith.addf %724, %723 : vector<8x96xf32>
    %726 = arith.divf %724, %725 : vector<8x96xf32>
    %727 = vector.extract_strided_slice %720 {offsets = [0, 96], sizes = [8, 32], strides = [1, 1]} : vector<8x128xf32> to vector<8x32xf32>
    %728 = math.tanh %727 : vector<8x32xf32>
    %729 = vector.extract_strided_slice %726 {offsets = [0, 0], sizes = [8, 32], strides = [1, 1]} : vector<8x96xf32> to vector<8x32xf32>
    %730 = vector.extract_strided_slice %726 {offsets = [0, 32], sizes = [8, 32], strides = [1, 1]} : vector<8x96xf32> to vector<8x32xf32>
    %731 = vector.extract_strided_slice %726 {offsets = [0, 64], sizes = [8, 32], strides = [1, 1]} : vector<8x96xf32> to vector<8x32xf32>
    %732 = arith.mulf %730, %687 : vector<8x32xf32>
    %733 = arith.mulf %729, %728 : vector<8x32xf32>
    %734 = arith.addf %732, %733 : vector<8x32xf32>
    %735 = math.tanh %734 : vector<8x32xf32>
    %736 = arith.mulf %731, %735 : vector<8x32xf32>
    %737 = vector.extract_strided_slice %717 {offsets = [0, 128], sizes = [8, 128], strides = [1, 1]} : vector<8x256xf32> to vector<8x128xf32>
    %cst_180 = arith.constant dense<0.000000e+00> : vector<8x128xf32>
    %738 = tpu.matmul %708, %426, %cst_180 {dimension_numbers = #tpu.dot_dimension_numbers<[1], [0], [0], [1], [0, 0, 1, 1], [], []>} : vector<8x32xf32>, vector<32x128xf32>, vector<8x128xf32> -> vector<8x128xf32>
    %739 = arith.addf %737, %738 : vector<8x128xf32>
    %740 = vector.extract_strided_slice %739 {offsets = [0, 0], sizes = [8, 96], strides = [1, 1]} : vector<8x128xf32> to vector<8x96xf32>
    %741 = arith.negf %740 : vector<8x96xf32>
    %742 = math.exp %741 : vector<8x96xf32>
    %cst_181 = arith.constant 1.000000e+00 : f32
    %743 = vector.broadcast %cst_181 : f32 to vector<8x96xf32>
    %744 = arith.addf %743, %742 : vector<8x96xf32>
    %745 = arith.divf %743, %744 : vector<8x96xf32>
    %746 = vector.extract_strided_slice %739 {offsets = [0, 96], sizes = [8, 32], strides = [1, 1]} : vector<8x128xf32> to vector<8x32xf32>
    %747 = math.tanh %746 : vector<8x32xf32>
    %748 = vector.extract_strided_slice %745 {offsets = [0, 0], sizes = [8, 32], strides = [1, 1]} : vector<8x96xf32> to vector<8x32xf32>
    %749 = vector.extract_strided_slice %745 {offsets = [0, 32], sizes = [8, 32], strides = [1, 1]} : vector<8x96xf32> to vector<8x32xf32>
    %750 = vector.extract_strided_slice %745 {offsets = [0, 64], sizes = [8, 32], strides = [1, 1]} : vector<8x96xf32> to vector<8x32xf32>
    %751 = arith.mulf %749, %706 : vector<8x32xf32>
    %752 = arith.mulf %748, %747 : vector<8x32xf32>
    %753 = arith.addf %751, %752 : vector<8x32xf32>
    %754 = math.tanh %753 : vector<8x32xf32>
    %755 = arith.mulf %750, %754 : vector<8x32xf32>
    %c7_i32_182 = arith.constant 7 : i32
    %c8_i32_183 = arith.constant 8 : i32
    %756 = arith.muli %c7_i32_182, %c8_i32_183 : i32
    %757 = tpu.assume_multiple %756, 8 : i32
    %c7_i32_184 = arith.constant 7 : i32
    %758 = arith.subi %c7_i32_184, %c7_i32_182 : i32
    %c8_i32_185 = arith.constant 8 : i32
    %759 = arith.muli %758, %c8_i32_185 : i32
    %760 = tpu.assume_multiple %759, 8 : i32
    %761 = arith.index_cast %757 : i32 to index
    %c0_186 = arith.constant 0 : index
    %762 = vector.load %arg14[%761, %c0_186] : memref<64x256xf32, #tpu.memory_space<vmem>>, vector<8x256xf32>
    %763 = arith.index_cast %760 : i32 to index
    %c0_187 = arith.constant 0 : index
    %764 = vector.load %arg14[%763, %c0_187] : memref<64x256xf32, #tpu.memory_space<vmem>>, vector<8x256xf32>
    %765 = vector.extract_strided_slice %762 {offsets = [0, 0], sizes = [8, 128], strides = [1, 1]} : vector<8x256xf32> to vector<8x128xf32>
    %cst_188 = arith.constant dense<0.000000e+00> : vector<8x128xf32>
    %766 = tpu.matmul %736, %425, %cst_188 {dimension_numbers = #tpu.dot_dimension_numbers<[1], [0], [0], [1], [0, 0, 1, 1], [], []>} : vector<8x32xf32>, vector<32x128xf32>, vector<8x128xf32> -> vector<8x128xf32>
    %767 = arith.addf %765, %766 : vector<8x128xf32>
    %768 = vector.extract_strided_slice %767 {offsets = [0, 0], sizes = [8, 96], strides = [1, 1]} : vector<8x128xf32> to vector<8x96xf32>
    %769 = arith.negf %768 : vector<8x96xf32>
    %770 = math.exp %769 : vector<8x96xf32>
    %cst_189 = arith.constant 1.000000e+00 : f32
    %771 = vector.broadcast %cst_189 : f32 to vector<8x96xf32>
    %772 = arith.addf %771, %770 : vector<8x96xf32>
    %773 = arith.divf %771, %772 : vector<8x96xf32>
    %774 = vector.extract_strided_slice %767 {offsets = [0, 96], sizes = [8, 32], strides = [1, 1]} : vector<8x128xf32> to vector<8x32xf32>
    %775 = math.tanh %774 : vector<8x32xf32>
    %776 = vector.extract_strided_slice %773 {offsets = [0, 0], sizes = [8, 32], strides = [1, 1]} : vector<8x96xf32> to vector<8x32xf32>
    %777 = vector.extract_strided_slice %773 {offsets = [0, 32], sizes = [8, 32], strides = [1, 1]} : vector<8x96xf32> to vector<8x32xf32>
    %778 = vector.extract_strided_slice %773 {offsets = [0, 64], sizes = [8, 32], strides = [1, 1]} : vector<8x96xf32> to vector<8x32xf32>
    %779 = arith.mulf %777, %734 : vector<8x32xf32>
    %780 = arith.mulf %776, %775 : vector<8x32xf32>
    %781 = arith.addf %779, %780 : vector<8x32xf32>
    %782 = math.tanh %781 : vector<8x32xf32>
    %783 = arith.mulf %778, %782 : vector<8x32xf32>
    %784 = vector.extract_strided_slice %764 {offsets = [0, 128], sizes = [8, 128], strides = [1, 1]} : vector<8x256xf32> to vector<8x128xf32>
    %cst_190 = arith.constant dense<0.000000e+00> : vector<8x128xf32>
    %785 = tpu.matmul %755, %426, %cst_190 {dimension_numbers = #tpu.dot_dimension_numbers<[1], [0], [0], [1], [0, 0, 1, 1], [], []>} : vector<8x32xf32>, vector<32x128xf32>, vector<8x128xf32> -> vector<8x128xf32>
    %786 = arith.addf %784, %785 : vector<8x128xf32>
    %787 = vector.extract_strided_slice %786 {offsets = [0, 0], sizes = [8, 96], strides = [1, 1]} : vector<8x128xf32> to vector<8x96xf32>
    %788 = arith.negf %787 : vector<8x96xf32>
    %789 = math.exp %788 : vector<8x96xf32>
    %cst_191 = arith.constant 1.000000e+00 : f32
    %790 = vector.broadcast %cst_191 : f32 to vector<8x96xf32>
    %791 = arith.addf %790, %789 : vector<8x96xf32>
    %792 = arith.divf %790, %791 : vector<8x96xf32>
    %793 = vector.extract_strided_slice %786 {offsets = [0, 96], sizes = [8, 32], strides = [1, 1]} : vector<8x128xf32> to vector<8x32xf32>
    %794 = math.tanh %793 : vector<8x32xf32>
    %795 = vector.extract_strided_slice %792 {offsets = [0, 0], sizes = [8, 32], strides = [1, 1]} : vector<8x96xf32> to vector<8x32xf32>
    %796 = vector.extract_strided_slice %792 {offsets = [0, 32], sizes = [8, 32], strides = [1, 1]} : vector<8x96xf32> to vector<8x32xf32>
    %797 = vector.extract_strided_slice %792 {offsets = [0, 64], sizes = [8, 32], strides = [1, 1]} : vector<8x96xf32> to vector<8x32xf32>
    %798 = arith.mulf %796, %753 : vector<8x32xf32>
    %799 = arith.mulf %795, %794 : vector<8x32xf32>
    %800 = arith.addf %798, %799 : vector<8x32xf32>
    %801 = math.tanh %800 : vector<8x32xf32>
    %802 = arith.mulf %797, %801 : vector<8x32xf32>
    %c8_i32_192 = arith.constant 8 : i32
    %803 = tpu.concatenate %783, %802 in 1 : vector<8x32xf32>, vector<8x32xf32> -> vector<8x64xf32>
    %c0_193 = arith.constant 0 : index
    %c0_194 = arith.constant 0 : index
    %804 = vector.load %arg9[%c0_193, %c0_194] : memref<1x64xf32, #tpu.memory_space<vmem>>, vector<1x64xf32>
    %805 = vector.broadcast %804 : vector<1x64xf32> to vector<8x64xf32>
    %806 = arith.mulf %803, %805 : vector<8x64xf32>
    %cst_195 = arith.constant dense<0.000000e+00> : vector<8xf32>
    %807 = vector.multi_reduction <add>, %806, %cst_195 [1] : vector<8x64xf32> to vector<8xf32>
    %808 = vector.shape_cast %807 : vector<8xf32> to vector<8x1xf32>
    %c0_196 = arith.constant 0 : index
    %c0_197 = arith.constant 0 : index
    %809 = memref.load %arg10[%c0_196, %c0_197] : memref<1x1xf32, #tpu.memory_space<smem>>
    %810 = vector.broadcast %809 : f32 to vector<8x1xf32>
    %811 = arith.addf %808, %810 : vector<8x1xf32>
    %812 = arith.negf %811 : vector<8x1xf32>
    %813 = math.exp %812 : vector<8x1xf32>
    %cst_198 = arith.constant 1.000000e+00 : f32
    %814 = vector.broadcast %cst_198 : f32 to vector<8x1xf32>
    %815 = arith.addf %814, %813 : vector<8x1xf32>
    %816 = arith.divf %814, %815 : vector<8x1xf32>
    %c0_199 = arith.constant 0 : index
    %c0_200 = arith.constant 0 : index
    %817 = vector.load %arg11[%c0_199, %c0_200] : memref<8x1xf32, #tpu.memory_space<vmem>>, vector<8x1xf32>
    tpu.vector_store %arg11[%c0_199, %c0_200], %816 {strides = array<i32>} : memref<8x1xf32, #tpu.memory_space<vmem>>, vector<8x1xf32>,
    return
  }
}

</mosaic_0001>

<bundles_post_ra>
// kernel: tpu_custom_call.1
= control target key start
LH: loop header
LB: loop body
LE: loop exit
PB: predicated region body
PF: predicated region fallthrough
CT: control target
= control target key end

     0   :  { %17 = vsyncpa [#allocation7], 0  ;;  %s5777_s0 = inlined_call_operand.vmem [shape: f32[64,32], index: 0, kind: input, shape index: {}]   ;;  %s5778_s1 = inlined_call_operand.vmem [shape: f32[32,256], index: 1, kind: input, shape index: {}]   ;;  %s5779_s2 = inlined_call_operand.vmem [shape: f32[1,256], index: 2, kind: input, shape index: {}]   ;;  %s5780_s3 = inlined_call_operand.vmem [shape: f32[32,128], index: 3, kind: input, shape index: {}]   ;;  %s5781_s4 = inlined_call_operand.hbm [shape: f32[32,128], index: 4, kind: input, shape index: {}]   ;;  %s5782_s5 = inlined_call_operand.hbm [shape: f32[64,256], index: 5, kind: input, shape index: {}]   ;;  %s5783_s6 = inlined_call_operand.vmem [shape: f32[1,256], index: 6, kind: input, shape index: {}]   ;;  %s5784_s7 = inlined_call_operand.hbm [shape: f32[32,128], index: 7, kind: input, shape index: {}]   ;;  %s5785_s8 = inlined_call_operand.hbm [shape: f32[32,128], index: 8, kind: input, shape index: {}]   ;;  %s5786_s9 = inlined_call_operand.vmem [shape: f32[1,64], index: 9, kind: input, shape index: {}]   ;;  %s5787_s10 = inlined_call_operand.<no memory space> [shape: f32[1,1], index: 10, kind: input, shape index: {}]   ;;  %s5788_s11 = inlined_call_operand.vmem [shape: f32[8,1], index: 11, kind: output, shape index: {}]  }
   0x1   :  { %18 = vsyncpa [#allocation9], 0 }
   0x2   :  { %19 = vsyncpa [#allocation12], 0  ;;  %s4810_s17 = smov [#allocation8]  }
   0x3   :  { %s45_s18 = sshll.u32 %s4810_s17, 4  ;;  %s46_s18 = int_to_ptr.vmem [resolvable:$true] %s45_s18 }
   0x4   :  { %s4732_s19 = scalar_lea.vmem %s46_s18, 2048  ;;  %p4737_p1 = scmp.lt.s32.totalorder %s46_s18, %s46_s18 }
   0x5   :  { %p4733_p0 = scmp.ne.s32.totalorder %s46_s18, %s4732_s19  ;;  %p4738_p2 = scmp.lt.s32.totalorder %s4732_s19, %s4732_s19 }
   0x7   :  { %p4739_p3 = por %p4738_p2, %p4737_p1 }
   0x9   :  { %p4740_p4 = pnand %p4739_p3, %p4733_p0 }
   0xb   :  { %4743 = shalt.err (!%p4740_p4)
}
   0xc   :  { %s4811_s20 = smov 256   ;;  %s4812_s21 = smov 16  }
   0xd   :  { %51 = dma.hbm_to_vmem [thread:$0]  %s5782_s5, 2048, %s46_s18, [#allocation9], %s4811_s20, %s4811_s20, %s4812_s21  }
   0xe   :  { %s4813_s24 = smov [#allocation6]  }
   0xf   :  { %s33_s25 = sshll.u32 %s4813_s24, 4  ;;  %s34_s25 = int_to_ptr.vmem [resolvable:$true] %s33_s25 }
  0x10   :  { %s4752_s26 = scalar_lea.vmem %s34_s25, 512  ;;  %p4757_p6 = scmp.lt.s32.totalorder %s34_s25, %s34_s25 }
  0x11   :  { %p4753_p5 = scmp.ne.s32.totalorder %s34_s25, %s4752_s26  ;;  %p4758_p7 = scmp.lt.s32.totalorder %s4752_s26, %s4752_s26 }
  0x13   :  { %p4759_p8 = por %p4758_p7, %p4757_p6 }
  0x15   :  { %p4760_p9 = pnand %p4759_p8, %p4753_p5 }
  0x17   :  { %4763 = shalt.err (!%p4760_p9)
}
  0x18   :  { %s4814_s27 = smov 128   ;;  %s4815_s28 = smov 8  }
  0x19   :  { %39 = dma.hbm_to_vmem [thread:$0]  %s5781_s4, 512, %s34_s25, [#allocation7], %s4814_s27, %s4814_s27, %s4815_s28  }
  0x1a   :  { %s4816_s12 = smov [#allocation10]   ;;  %s4817_s14 = smov [#allocation11]  }
  0x1b   :  { %s59_s13 = sshll.u32 %s4816_s12, 4  ;;  %s71_s5 = sshll.u32 %s4817_s14, 4  ;;  %s60_s13 = int_to_ptr.vmem [resolvable:$true] %s59_s13  ;;  %s72_s5 = int_to_ptr.vmem [resolvable:$true] %s71_s5 }
  0x1c   :  { %s4772_s15 = scalar_lea.vmem %s60_s13, 512  ;;  %p4777_p11 = scmp.lt.s32.totalorder %s60_s13, %s60_s13 }
  0x1d   :  { %p4773_p10 = scmp.ne.s32.totalorder %s60_s13, %s4772_s15  ;;  %p4778_p12 = scmp.lt.s32.totalorder %s4772_s15, %s4772_s15 }
  0x1f   :  { %p4779_p13 = por %p4778_p12, %p4777_p11 }
  0x21   :  { %p4780_p0 = pnand %p4779_p13, %p4773_p10 }
  0x23   :  { %4783 = shalt.err (!%p4780_p0)
}
  0x24   :  { %65 = dma.hbm_to_vmem [thread:$0]  %s5784_s7, 512, %s60_s13, [#allocation9], %s4814_s27, %s4814_s27, %s4815_s28  }
  0x25   :  { %s4792_s18 = scalar_lea.vmem %s72_s5, 512  ;;  %p4797_p2 = scmp.lt.s32.totalorder %s72_s5, %s72_s5 }
  0x26   :  { %p4793_p1 = scmp.ne.s32.totalorder %s72_s5, %s4792_s18  ;;  %p4798_p3 = scmp.lt.s32.totalorder %s4792_s18, %s4792_s18 }
  0x28   :  { %p4799_p4 = por %p4798_p3, %p4797_p2 }
  0x2a   :  { %p4800_p5 = pnand %p4799_p4, %p4793_p1 }
  0x2c   :  { %4803 = shalt.err (!%p4800_p5)
}
  0x2d   :  { %77 = dma.hbm_to_vmem [thread:$0]  %s5785_s8, 512, %s72_s5, [#allocation12], %s4814_s27, %s4814_s27, %s4815_s28  }
  0x2e   :  { %4804 = dma.done.wait [#allocation7], 512  }
  0x2f   :  { %4805 = vsyncadd [#allocation7], 4294966784 }
  0x30   :  { %4806 = dma.done.wait [#allocation9], 2560  }
  0x31   :  { %4807 = vsyncadd [#allocation9], 4294964736 }
  0x32   :  { %4808 = dma.done.wait [#allocation12], 512  }
  0x33   :  { %4809 = vsyncadd [#allocation12], 4294966784  ;;  %v4818_v0 = vmov 0.0   ;;  %vm4819_vm0 = vmmov 0   ;;  %v109_v1 = vld [vmem:[%s5778_s1 + $0x38] sm:$0xff]  ;;  %v108_v2 = vld [vmem:[%s5778_s1 + $0x30] sm:$0xff]  ;;  %v112_v25 = vlaneseq }
  0x34   :  { %4087 = vmatprep.subr.mxu1 %v4818_v0  ;;  %211 = vmatprep.mubr.f32.mxu0 %v4818_v0  ;;  %v107_v3 = vld [vmem:[%s5778_s1 + $0x28] sm:$0xff]  ;;  %v106_v4 = vld [vmem:[%s5778_s1 + $0x20] sm:$0xff]  ;;  %v4914_v5 = vld [vmem:[%s5780_s3 + $0x18] sm:$0xff]  ;;  %vm122_vm1 = vcmask 261120   ;;  %vm495_vm2 = vcmask 523520   ;;  %vm2013_vm3 = vcmask 523264  }
  0x35   :  { %4095 = vmatprep.mubr.msk.f32.mxu1 %vm4819_vm0, %v4818_v0  ;;  %171 = vmatprep.subr.mxu0 %v109_v1  ;;  %v105_v6 = vld [vmem:[%s5778_s1 + $0x18] sm:$0xff]  ;;  %v4923_v7 = vld [vmem:[%s5780_s3 + $0x10] sm:$0xff]  ;;  %v4932_v9 = vld [vmem:[%s5780_s3 + $0x8] sm:$0xff]  ;;  %v5031_v26 = vshrl.u32 %v112_v25, 7  ;;  %vm3826_vm4 = vcmask 7168  }
  0x36   :  { %172 = vmatpush1.msra.mxu0 %v108_v2  ;;  %4088 = vmatpush3.msra.mxu1 %v4914_v5  ;;  %v104_v8 = vld [vmem:[%s5778_s1 + $0x10] sm:$0xff]  ;;  %v103_v10 = vld [vmem:[%s5778_s1 + $0x8] sm:$0xff]  ;;  %v102_v11 = vld [vmem:[%s5778_s1] sm:$0xff] }
  0x37   :  { %173 = vmatprep.subr.mxu0 %v107_v3  ;;  %4089 = vmatprep.subr.mxu1 %v4818_v0  ;;  %v4945_v12 = vld [vmem:[%s5780_s3] sm:$0xff]  ;;  %v4953_v14 = vld [vmem:[#allocation6 + $0x18] sm:$0xff]  ;;  %v95_v15 = vld [vmem:[%s5777_s0 + $0x8] sm:$0xff]  ;;  %v114_v27 = vsub.s32 0, %v5031_v26  ;;  %v118_v29 = vsub.s32 1, %v5031_v26 }
  0x38   :  { %174 = vmatpush1.msra.mxu0 %v106_v4  ;;  %4090 = vmatpush3.msra.mxu1 %v4923_v7  ;;  %v94_v13 = vld [vmem:[%s5777_s0] sm:$0xff]  ;;  %v4962_v16 = vld [vmem:[#allocation6 + $0x10] sm:$0xff]  ;;  %v4968_v17 = vld [vmem:[#allocation6 + $0x8] sm:$0xff] }
  0x39   :  { %175 = vmatprep.subr.mxu0 %v105_v6  ;;  %4091 = vmatprep.subr.mxu1 %v4818_v0  ;;  %v96_v18 = vld [vmem:[%s5777_s0 + $0x10] sm:$0xff]  ;;  %v4978_v19 = vld [vmem:[#allocation6] sm:$0xff]  ;;  %v97_v20 = vld [vmem:[%s5777_s0 + $0x18] sm:$0xff] }
  0x3a   :  { %176 = vmatpush1.msra.mxu0 %v104_v8  ;;  %4092 = vmatpush3.msra.mxu1 %v4932_v9  ;;  %v98_v21 = vld [vmem:[%s5777_s0 + $0x20] sm:$0xff]  ;;  %v99_v22 = vld [vmem:[%s5777_s0 + $0x28] sm:$0xff]  ;;  %v100_v23 = vld [vmem:[%s5777_s0 + $0x30] sm:$0xff] }
  0x3b   :  { %177 = vmatprep.subr.mxu0 %v103_v10  ;;  %4093 = vmatprep.subr.mxu1 %v4818_v0  ;;  %v101_v24 = vld [vmem:[%s5777_s0 + $0x38] sm:$0xff]  ;;  %v110_v28 = vld [vmem:[%s5779_s2] sm:$0x3]  ;;  %s4820_s0 = smov 32   ;;  %s4821_s2 = smov 64  }
  0x3c   :  { %178 = vmatpush1.msra.mxu0 %v102_v11  ;;  %4094 = vmatpush3.msra.mxu1 %v4945_v12  ;;  %v115_v30 = vrot.slane %v110_v28, %v114_v27  ;;  %v119_v31 = vrot.slane %v110_v28, %v118_v29 }
  0x3d   :  { %3849 = vmatmul.mubr.msk.f32.vlgmr.msra.gmra.mxu0 %vm122_vm1, %v94_v13  ;;  %4096 = vmatmul.mubr.f32.vlgmr.msra.gmra.mxu1 %v4818_v0 }
  0x3e   :  { %217 = vmatprep.mubr.f32.mxu0 %v4818_v0  ;;  %4098 = vmatprep.subr.mxu1 %v4818_v0 }
  0x3f   :  { %4099 = vmatpush3.msra.mxu1 %v4953_v14  ;;  %4106 = vmatprep.mubr.msk.f32.mxu1 %vm4819_vm0, %v4818_v0 }
  0x40   :  { %4100 = vmatprep.subr.mxu1 %v4818_v0  ;;  %4131 = vmatprep.subr.mxu0 %v4818_v0 }
  0x41   :  { %3850 = vmatmul.mubr.msk.f32.gmra.mxu0 %vm122_vm1, %v95_v15  ;;  %4101 = vmatpush3.msra.mxu1 %v4962_v16 }
  0x42   :  { %223 = vmatprep.mubr.f32.mxu0 %v4818_v0  ;;  %4102 = vmatprep.subr.mxu1 %v4818_v0 }
  0x43   :  { %4103 = vmatpush3.msra.mxu1 %v4968_v17  ;;  %4132 = vmatpush3.msra.mxu0 %v4914_v5 }
  0x44   :  { %4104 = vmatprep.subr.mxu1 %v4818_v0  ;;  %4133 = vmatprep.subr.mxu0 %v4818_v0 }
  0x45   :  { %3851 = vmatmul.mubr.msk.f32.gmra.mxu0 %vm122_vm1, %v96_v18  ;;  %4105 = vmatpush3.msra.mxu1 %v4978_v19 }
  0x46   :  { %229 = vmatprep.mubr.f32.mxu0 %v4818_v0  ;;  %4107 = vmatmul.mubr.f32.vlgmr.msra.gmra.mxu1 %v4818_v0 }
  0x47   :  { %4109 = vmatprep.subr.mxu1 %v4818_v0  ;;  %4117 = vmatprep.mubr.msk.f32.mxu1 %vm4819_vm0, %v4818_v0 }
  0x48   :  { %4110 = vmatpush3.msra.mxu1 %v4914_v5  ;;  %4134 = vmatpush3.msra.mxu0 %v4923_v7 }
  0x49   :  { %3852 = vmatmul.mubr.msk.f32.gmra.mxu0 %vm122_vm1, %v97_v20  ;;  %4111 = vmatprep.subr.mxu1 %v4818_v0 }
  0x4a   :  { %235 = vmatprep.mubr.f32.mxu0 %v4818_v0  ;;  %4112 = vmatpush3.msra.mxu1 %v4923_v7 }
  0x4b   :  { %4113 = vmatprep.subr.mxu1 %v4818_v0  ;;  %4135 = vmatprep.subr.mxu0 %v4818_v0 }
  0x4c   :  { %4114 = vmatpush3.msra.mxu1 %v4932_v9  ;;  %4136 = vmatpush3.msra.mxu0 %v4932_v9 }
  0x4d   :  { %3853 = vmatmul.mubr.msk.f32.gmra.mxu0 %vm122_vm1, %v98_v21  ;;  %4115 = vmatprep.subr.mxu1 %v4818_v0 }
  0x4e   :  { %241 = vmatprep.mubr.f32.mxu0 %v4818_v0  ;;  %4116 = vmatpush3.msra.mxu1 %v4945_v12 }
  0x4f   :  { %4120 = vmatprep.subr.mxu1 %v4818_v0  ;;  %4137 = vmatprep.subr.mxu0 %v4818_v0 }
  0x50   :  { %4138 = vmatpush3.msra.mxu0 %v4945_v12 }
  0x51   :  { %3854 = vmatmul.mubr.msk.f32.gmra.mxu0 %vm122_vm1, %v99_v22  ;;  %4153 = vmatprep.subr.mxu0 %v4818_v0 }
  0x52   :  { %247 = vmatprep.mubr.f32.mxu0 %v4818_v0 }
  0x55   :  { %3855 = vmatmul.mubr.msk.f32.gmra.mxu0 %vm122_vm1, %v100_v23 }
  0x56   :  { %253 = vmatprep.mubr.f32.mxu0 %v4818_v0 }
  0x59   :  { %3856 = vmatmul.mubr.msk.f32.gmra.mxu0 %vm122_vm1, %v101_v24 }
  0x5a   :  { %4139 = vmatprep.mubr.msk.f32.mxu0 %vm4819_vm0, %v4818_v0 }
  0xfd   :  { %v213_v32 = vpop.f32.mrf.mxu0  ;;  %v361_v33 = vpop.f32.mrf.mxu1 }
  0xfe   :  { %v214_v34 = vadd.f32 %v213_v32, %v115_v30 }
  0xff   :  { %v215_v35 = vpop.f32.mrf.mxu0  ;;  %v4097_v36 = vpop.f32.mrf.mxu1 }
 0x100   :  { %v5042_v37 = vadd.f32 %v215_v35, %v119_v31  ;;  %v365_v38 = vadd.f32 %v361_v33, %v214_v34 }
 0x101   :  { %v219_v39 = vpop.f32.mrf.mxu0 }
 0x102   :  { %4452 = vtanh.f32 %v365_v38  ;;  %v5044_v40 = vadd.f32 %v219_v39, %v115_v30  ;;  %v3857_v13 = vmul.f32 -1.442695, %v365_v38 }
 0x103   :  { %v221_v41 = vpop.f32.mrf.mxu0 }
 0x104   :  { %v5046_v42 = vadd.f32 %v221_v41, %v119_v31 }
 0x105   :  { %v225_v43 = vpop.f32.mrf.mxu0 }
 0x106   :  { %v5048_v44 = vadd.f32 %v225_v43, %v115_v30  ;;  %v456_v45 = vpop.f32.mrf.mxu1 }
 0x107   :  { %v227_v46 = vpop.f32.mrf.mxu0 }
 0x108   :  { %v5050_v47 = vadd.f32 %v227_v46, %v119_v31  ;;  %v4108_v48 = vpop.f32.mrf.mxu1 }
 0x109   :  { %v231_v49 = vpop.f32.mrf.mxu0 }
 0x10a   :  { %v5052_v50 = vadd.f32 %v231_v49, %v115_v30 }
 0x10b   :  { %v233_v51 = vpop.f32.mrf.mxu0 }
 0x10c   :  { %v5054_v52 = vadd.f32 %v233_v51, %v119_v31 }
 0x10d   :  { %v237_v53 = vpop.f32.mrf.mxu0 }
 0x10e   :  { %v5056_v54 = vadd.f32 %v237_v53, %v115_v30 }
 0x10f   :  { %v4453_v55 = vpop.eup %4452  ;;  %v239_v56 = vpop.f32.mrf.mxu0 }
 0x110   :  { %v5058_v57 = vadd.f32 %v239_v56, %v119_v31  ;;  %375 = vrot.lane.b32.xlu0 %v4453_v55, %s4820_s0 }
 0x111   :  { %v243_v58 = vpop.f32.mrf.mxu0 }
 0x112   :  { %v5061_v59 = vadd.f32 %v243_v58, %v115_v30 }
 0x113   :  { %v245_v60 = vpop.f32.mrf.mxu0 }
 0x114   :  { %v5063_v61 = vadd.f32 %v245_v60, %v119_v31 }
 0x115   :  { %v249_v62 = vpop.f32.mrf.mxu0 }
 0x116   :  { %v5065_v63 = vadd.f32 %v249_v62, %v115_v30 }
 0x117   :  { %v251_v1 = vpop.f32.mrf.mxu0 }
 0x118   :  { %v5067_v2 = vadd.f32 %v251_v1, %v119_v31 }
 0x119   :  { %v255_v3 = vpop.f32.mrf.mxu0 }
 0x11a   :  { %v5069_v4 = vadd.f32 %v255_v3, %v115_v30 }
 0x11b   :  { %v257_v6 = vpop.f32.mrf.mxu0 }
 0x11c   :  { %v258_v8 = vadd.f32 %v257_v6, %v119_v31 }
 0x11e   :  { %v460_v10 = vadd.f32 %v456_v45, %v258_v8 }
 0x120   :  { %4454 = vtanh.f32 %v460_v10  ;;  %v3858_v20 = vmul.f32 -1.442695, %v460_v10 }
 0x121   :  { %4456 = vpow2.f32 %v3857_v13 }
 0x12d   :  { %v4455_v11 = vpop.eup %4454 }
 0x12e   :  { %470 = vrot.lane.b32.xlu0 %v4455_v11, %s4820_s0  ;;  %v4457_v15 = vpop.eup %4456 }
 0x12f   :  { %v369_v18 = vadd.f32 1.0, %v4457_v15 }
 0x131   :  { %4458 = vrcp.f32 %v369_v18 }
 0x132   :  { %4460 = vpow2.f32 %v3858_v20 }
 0x13e   :  { %v4459_v21 = vpop.eup %4458 }
 0x13f   :  { %v4461_v24 = vpop.eup %4460  ;;  %v373_v32 = vmul.f32 0.0, %v4459_v21 }
 0x140   :  { %v464_v25 = vadd.f32 1.0, %v4461_v24 }
 0x142   :  { %4462 = vrcp.f32 %v464_v25 }
 0x14f   :  { %v4463_v28 = vpop.eup %4462 }
 0x150   :  { %v468_v36 = vmul.f32 0.0, %v4463_v28 }
 0x182   :  { %v376_v22 = vpop.permute.xlu0 %375 }
 0x183   :  { %v378_v23 = vmul.f32 %v4459_v21, %v376_v22 }
 0x185   :  { %380 = vrot.lane.b32.xlu1 %v378_v23, %s4820_s0 }
 0x1a0   :  { %v471_v30 = vpop.permute.xlu0 %470 }
 0x1a1   :  { %v473_v31 = vmul.f32 %v4463_v28, %v471_v30 }
 0x1a3   :  { %475 = vrot.lane.b32.xlu1 %v473_v31, %s4820_s0 }
 0x1f7   :  { %v381_v33 = vpop.permute.xlu1 %380 }
 0x1f8   :  { %v5074_v34 = vadd.f32 %v381_v33, %v373_v32 }
 0x1fa   :  { %4464 = vtanh.f32 %v5074_v34 }
 0x207   :  { %v4465_v35 = vpop.eup %4464 }
 0x208   :  { %386 = vrot.lane.b32.xlu0 %v4465_v35, %s4820_s0 }
 0x215   :  { %v476_v38 = vpop.permute.xlu1 %475 }
 0x216   :  { %v5078_v39 = vadd.f32 %v476_v38, %v468_v36 }
 0x218   :  { %4466 = vtanh.f32 %v5078_v39 }
 0x225   :  { %v4467_v41 = vpop.eup %4466 }
 0x226   :  { %481 = vrot.lane.b32.xlu1 %v4467_v41, %s4820_s0 }
 0x27a   :  { %v387_v43 = vpop.permute.xlu0 %386 }
 0x27b   :  { %v389_v45 = vmul.f32 %v4459_v21, %v387_v43 }
 0x27d   :  { %486 = vrot.lane.b32.xlu0 %v389_v45, %s4821_s2 }
 0x298   :  { %v482_v46 = vpop.permute.xlu1 %481 }
 0x299   :  { %v5083_v48 = vmul.f32 %v4463_v28, %v482_v46 }
 0x29b   :  { %602 = vrot.lane.b32.xlu1 %v5083_v48, %s4821_s2 }
 0x2ef   :  { %v487_v49 = vpop.permute.xlu0 %486 }
 0x2f0   :  { %489 = vst.msk [vmem:[#allocation3] sm:$0xff] %vm122_vm1, %v487_v49  ;;  %4118 = vmatmul.mubr.msk.f32.vlgmr.msra.gmra.mxu1 %vm122_vm1, %v487_v49 }
 0x2f1   :  { %4121 = vmatpush3.msra.mxu1 %v4953_v14  ;;  %4128 = vmatprep.mubr.msk.f32.mxu1 %vm4819_vm0, %v4818_v0 }
 0x2f2   :  { %4122 = vmatprep.subr.mxu1 %v4818_v0 }
 0x2f3   :  { %4123 = vmatpush3.msra.mxu1 %v4962_v16 }
 0x2f4   :  { %4124 = vmatprep.subr.mxu1 %v4818_v0 }
 0x2f5   :  { %4125 = vmatpush3.msra.mxu1 %v4968_v17 }
 0x2f6   :  { %4126 = vmatprep.subr.mxu1 %v4818_v0 }
 0x2f7   :  { %4127 = vmatpush3.msra.mxu1 %v4978_v19 }
 0x2f8   :  { %4142 = vmatprep.subr.mxu1 %v4818_v0 }
 0x30d   :  { %v603_v51 = vpop.permute.xlu1 %602 }
 0x30e   :  { %4129 = vmatmul.mubr.msk.f32.vlgmr.msra.gmra.mxu1 %vm122_vm1, %v603_v51 }
 0x30f   :  { %4143 = vmatpush3.msra.mxu1 %v4953_v14  ;;  %4150 = vmatprep.mubr.msk.f32.mxu1 %vm4819_vm0, %v4818_v0 }
 0x310   :  { %4144 = vmatprep.subr.mxu1 %v4818_v0 }
 0x311   :  { %4145 = vmatpush3.msra.mxu1 %v4962_v16 }
 0x312   :  { %4146 = vmatprep.subr.mxu1 %v4818_v0 }
 0x313   :  { %4147 = vmatpush3.msra.mxu1 %v4968_v17 }
 0x314   :  { %4148 = vmatprep.subr.mxu1 %v4818_v0 }
 0x315   :  { %4149 = vmatpush3.msra.mxu1 %v4978_v19 }
 0x316   :  { %4164 = vmatprep.subr.mxu1 %v4818_v0 }
 0x3b0   :  { %v573_v53 = vpop.f32.mrf.mxu1 }
 0x3b1   :  { %v577_v55 = vadd.f32 %v573_v53, %v5044_v40 }
 0x3b2   :  { %v4119_v56 = vpop.f32.mrf.mxu1 }
 0x3b3   :  { %4468 = vtanh.f32 %v577_v55  ;;  %v3860_v6 = vmul.f32 -1.442695, %v577_v55 }
 0x3c0   :  { %v4469_v58 = vpop.eup %4468 }
 0x3c1   :  { %587 = vrot.lane.b32.xlu1 %v4469_v58, %s4820_s0 }
 0x3ce   :  { %v672_v60 = vpop.f32.mrf.mxu1 }
 0x3cf   :  { %v676_v62 = vadd.f32 %v672_v60, %v5067_v2 }
 0x3d0   :  { %v4130_v1 = vpop.f32.mrf.mxu1 }
 0x3d1   :  { %4470 = vtanh.f32 %v676_v62  ;;  %v3862_v11 = vmul.f32 -1.442695, %v676_v62 }
 0x3d2   :  { %4472 = vpow2.f32 %v3860_v6 }
 0x3de   :  { %v4471_v3 = vpop.eup %4470 }
 0x3df   :  { %686 = vrot.lane.b32.xlu0 %v4471_v3, %s4820_s0  ;;  %v4473_v8 = vpop.eup %4472 }
 0x3e0   :  { %v581_v10 = vadd.f32 1.0, %v4473_v8 }
 0x3e2   :  { %4474 = vrcp.f32 %v581_v10 }
 0x3e3   :  { %4476 = vpow2.f32 %v3862_v11 }
 0x3ef   :  { %v4475_v40 = vpop.eup %4474 }
 0x3f0   :  { %v4477_v18 = vpop.eup %4476  ;;  %v585_v23 = vmul.f32 %v4475_v40, %v5074_v34 }
 0x3f1   :  { %v680_v20 = vadd.f32 1.0, %v4477_v18 }
 0x3f3   :  { %4478 = vrcp.f32 %v680_v20 }
 0x400   :  { %v4479_v2 = vpop.eup %4478 }
 0x401   :  { %v684_v30 = vmul.f32 %v4479_v2, %v5078_v39 }
 0x433   :  { %v588_v13 = vpop.permute.xlu1 %587 }
 0x434   :  { %v590_v15 = vmul.f32 %v4475_v40, %v588_v13 }
 0x436   :  { %592 = vrot.lane.b32.xlu1 %v590_v15, %s4820_s0 }
 0x451   :  { %v687_v21 = vpop.permute.xlu0 %686 }
 0x452   :  { %v689_v22 = vmul.f32 %v4479_v2, %v687_v21 }
 0x454   :  { %691 = vrot.lane.b32.xlu0 %v689_v22, %s4820_s0 }
 0x4a8   :  { %v593_v24 = vpop.permute.xlu1 %592 }
 0x4a9   :  { %v5117_v25 = vadd.f32 %v593_v24, %v585_v23 }
 0x4ab   :  { %4480 = vtanh.f32 %v5117_v25 }
 0x4b8   :  { %v4481_v28 = vpop.eup %4480 }
 0x4b9   :  { %598 = vrot.lane.b32.xlu1 %v4481_v28, %s4820_s0 }
 0x4c6   :  { %v692_v31 = vpop.permute.xlu0 %691 }
 0x4c7   :  { %v5122_v32 = vadd.f32 %v692_v31, %v684_v30 }
 0x4c9   :  { %4482 = vtanh.f32 %v5122_v32 }
 0x4d6   :  { %v4483_v33 = vpop.eup %4482 }
 0x4d7   :  { %697 = vrot.lane.b32.xlu0 %v4483_v33, %s4820_s0 }
 0x52b   :  { %v599_v35 = vpop.permute.xlu1 %598 }
 0x52c   :  { %v601_v34 = vmul.f32 %v4475_v40, %v599_v35 }
 0x52e   :  { %702 = vrot.lane.b32.xlu1 %v601_v34, %s4821_s2 }
 0x549   :  { %v698_v36 = vpop.permute.xlu0 %697 }
 0x54a   :  { %v5127_v38 = vmul.f32 %v4479_v2, %v698_v36 }
 0x54c   :  { %818 = vrot.lane.b32.xlu0 %v5127_v38, %s4821_s2 }
 0x5a0   :  { %v703_v41 = vpop.permute.xlu1 %702 }
 0x5a1   :  { %706 = vst.msk [vmem:[#allocation3 + $0x8] sm:$0xff] %vm122_vm1, %v703_v41  ;;  %4140 = vmatmul.mubr.msk.f32.vlgmr.msra.gmra.mxu0 %vm122_vm1, %v703_v41 }
 0x5a2   :  { %4154 = vmatpush3.msra.mxu0 %v4914_v5  ;;  %4161 = vmatprep.mubr.msk.f32.mxu0 %vm4819_vm0, %v4818_v0 }
 0x5a3   :  { %4155 = vmatprep.subr.mxu0 %v4818_v0 }
 0x5a4   :  { %4156 = vmatpush3.msra.mxu0 %v4923_v7 }
 0x5a5   :  { %4157 = vmatprep.subr.mxu0 %v4818_v0 }
 0x5a6   :  { %4158 = vmatpush3.msra.mxu0 %v4932_v9 }
 0x5a7   :  { %4159 = vmatprep.subr.mxu0 %v4818_v0 }
 0x5a8   :  { %4160 = vmatpush3.msra.mxu0 %v4945_v12 }
 0x5a9   :  { %4175 = vmatprep.subr.mxu0 %v4818_v0 }
 0x5be   :  { %v819_v39 = vpop.permute.xlu0 %818 }
 0x5bf   :  { %4151 = vmatmul.mubr.msk.f32.vlgmr.msra.gmra.mxu1 %vm122_vm1, %v819_v39 }
 0x5c0   :  { %4165 = vmatpush3.msra.mxu1 %v4953_v14  ;;  %4172 = vmatprep.mubr.msk.f32.mxu1 %vm4819_vm0, %v4818_v0 }
 0x5c1   :  { %4166 = vmatprep.subr.mxu1 %v4818_v0 }
 0x5c2   :  { %4167 = vmatpush3.msra.mxu1 %v4962_v16 }
 0x5c3   :  { %4168 = vmatprep.subr.mxu1 %v4818_v0 }
 0x5c4   :  { %4169 = vmatpush3.msra.mxu1 %v4968_v17 }
 0x5c5   :  { %4170 = vmatprep.subr.mxu1 %v4818_v0 }
 0x5c6   :  { %4171 = vmatpush3.msra.mxu1 %v4978_v19 }
 0x5c7   :  { %4186 = vmatprep.subr.mxu1 %v4818_v0 }
 0x661   :  { %v789_v43 = vpop.f32.mrf.mxu0 }
 0x662   :  { %v793_v45 = vadd.f32 %v789_v43, %v5048_v44 }
 0x663   :  { %v4141_v46 = vpop.f32.mrf.mxu0 }
 0x664   :  { %4484 = vtanh.f32 %v793_v45  ;;  %v3864_v58 = vmul.f32 -1.442695, %v793_v45 }
 0x671   :  { %v4485_v49 = vpop.eup %4484 }
 0x672   :  { %803 = vrot.lane.b32.xlu1 %v4485_v49, %s4820_s0 }
 0x67f   :  { %v888_v51 = vpop.f32.mrf.mxu1 }
 0x680   :  { %v892_v53 = vadd.f32 %v888_v51, %v5063_v61 }
 0x681   :  { %v4152_v55 = vpop.f32.mrf.mxu1 }
 0x682   :  { %4486 = vtanh.f32 %v892_v53  ;;  %v3866_v1 = vmul.f32 -1.442695, %v892_v53 }
 0x683   :  { %4488 = vpow2.f32 %v3864_v58 }
 0x68f   :  { %v4487_v56 = vpop.eup %4486 }
 0x690   :  { %902 = vrot.lane.b32.xlu0 %v4487_v56, %s4820_s0  ;;  %v4489_v60 = vpop.eup %4488 }
 0x691   :  { %v797_v62 = vadd.f32 1.0, %v4489_v60 }
 0x693   :  { %4490 = vrcp.f32 %v797_v62 }
 0x694   :  { %4492 = vpow2.f32 %v3866_v1 }
 0x6a0   :  { %v4491_v44 = vpop.eup %4490 }
 0x6a1   :  { %v4493_v8 = vpop.eup %4492  ;;  %v801_v13 = vmul.f32 %v4491_v44, %v5117_v25 }
 0x6a2   :  { %v896_v10 = vadd.f32 1.0, %v4493_v8 }
 0x6a4   :  { %4494 = vrcp.f32 %v896_v10 }
 0x6b1   :  { %v4495_v61 = vpop.eup %4494 }
 0x6b2   :  { %v900_v2 = vmul.f32 %v4495_v61, %v5122_v32 }
 0x6e4   :  { %v804_v3 = vpop.permute.xlu1 %803 }
 0x6e5   :  { %v806_v6 = vmul.f32 %v4491_v44, %v804_v3 }
 0x6e7   :  { %808 = vrot.lane.b32.xlu1 %v806_v6, %s4820_s0 }
 0x702   :  { %v903_v11 = vpop.permute.xlu0 %902 }
 0x703   :  { %v905_v40 = vmul.f32 %v4495_v61, %v903_v11 }
 0x705   :  { %907 = vrot.lane.b32.xlu0 %v905_v40, %s4820_s0 }
 0x759   :  { %v809_v15 = vpop.permute.xlu1 %808 }
 0x75a   :  { %v5161_v18 = vadd.f32 %v809_v15, %v801_v13 }
 0x75c   :  { %4496 = vtanh.f32 %v5161_v18 }
 0x769   :  { %v4497_v20 = vpop.eup %4496 }
 0x76a   :  { %814 = vrot.lane.b32.xlu1 %v4497_v20, %s4820_s0 }
 0x777   :  { %v908_v21 = vpop.permute.xlu0 %907 }
 0x778   :  { %v5166_v22 = vadd.f32 %v908_v21, %v900_v2 }
 0x77a   :  { %4498 = vtanh.f32 %v5166_v22 }
 0x787   :  { %v4499_v23 = vpop.eup %4498 }
 0x788   :  { %913 = vrot.lane.b32.xlu0 %v4499_v23, %s4820_s0 }
 0x7dc   :  { %v815_v24 = vpop.permute.xlu1 %814 }
 0x7dd   :  { %v817_v25 = vmul.f32 %v4491_v44, %v815_v24 }
 0x7df   :  { %918 = vrot.lane.b32.xlu1 %v817_v25, %s4821_s2 }
 0x7fa   :  { %v914_v28 = vpop.permute.xlu0 %913 }
 0x7fb   :  { %v5171_v30 = vmul.f32 %v4495_v61, %v914_v28 }
 0x7fd   :  { %1034 = vrot.lane.b32.xlu0 %v5171_v30, %s4821_s2 }
 0x851   :  { %v919_v31 = vpop.permute.xlu1 %918 }
 0x852   :  { %922 = vst.msk [vmem:[#allocation3 + $0x10] sm:$0xff] %vm122_vm1, %v919_v31  ;;  %4162 = vmatmul.mubr.msk.f32.vlgmr.msra.gmra.mxu0 %vm122_vm1, %v919_v31 }
 0x853   :  { %4176 = vmatpush3.msra.mxu0 %v4914_v5  ;;  %4183 = vmatprep.mubr.msk.f32.mxu0 %vm4819_vm0, %v4818_v0 }
 0x854   :  { %4177 = vmatprep.subr.mxu0 %v4818_v0 }
 0x855   :  { %4178 = vmatpush3.msra.mxu0 %v4923_v7 }
 0x856   :  { %4179 = vmatprep.subr.mxu0 %v4818_v0 }
 0x857   :  { %4180 = vmatpush3.msra.mxu0 %v4932_v9 }
 0x858   :  { %4181 = vmatprep.subr.mxu0 %v4818_v0 }
 0x859   :  { %4182 = vmatpush3.msra.mxu0 %v4945_v12 }
 0x85a   :  { %4197 = vmatprep.subr.mxu0 %v4818_v0 }
 0x86f   :  { %v1035_v32 = vpop.permute.xlu0 %1034 }
 0x870   :  { %4173 = vmatmul.mubr.msk.f32.vlgmr.msra.gmra.mxu1 %vm122_vm1, %v1035_v32 }
 0x871   :  { %4187 = vmatpush3.msra.mxu1 %v4953_v14  ;;  %4194 = vmatprep.mubr.msk.f32.mxu1 %vm4819_vm0, %v4818_v0 }
 0x872   :  { %4188 = vmatprep.subr.mxu1 %v4818_v0 }
 0x873   :  { %4189 = vmatpush3.msra.mxu1 %v4962_v16 }
 0x874   :  { %4190 = vmatprep.subr.mxu1 %v4818_v0 }
 0x875   :  { %4191 = vmatpush3.msra.mxu1 %v4968_v17 }
 0x876   :  { %4192 = vmatprep.subr.mxu1 %v4818_v0 }
 0x877   :  { %4193 = vmatpush3.msra.mxu1 %v4978_v19 }
 0x878   :  { %4208 = vmatprep.subr.mxu1 %v4818_v0 }
 0x912   :  { %v1005_v33 = vpop.f32.mrf.mxu0 }
 0x913   :  { %v1009_v35 = vadd.f32 %v1005_v33, %v5052_v50 }
 0x914   :  { %v4163_v34 = vpop.f32.mrf.mxu0 }
 0x915   :  { %4500 = vtanh.f32 %v1009_v35  ;;  %v3868_v46 = vmul.f32 -1.442695, %v1009_v35 }
 0x922   :  { %v4501_v36 = vpop.eup %4500 }
 0x923   :  { %1019 = vrot.lane.b32.xlu1 %v4501_v36, %s4820_s0 }
 0x930   :  { %v1104_v41 = vpop.f32.mrf.mxu1 }
 0x931   :  { %v1108_v39 = vadd.f32 %v1104_v41, %v5058_v57 }
 0x932   :  { %v4174_v43 = vpop.f32.mrf.mxu1 }
 0x933   :  { %4502 = vtanh.f32 %v1108_v39  ;;  %v3870_v53 = vmul.f32 -1.442695, %v1108_v39 }
 0x934   :  { %4504 = vpow2.f32 %v3868_v46 }
 0x940   :  { %v4503_v45 = vpop.eup %4502 }
 0x941   :  { %1118 = vrot.lane.b32.xlu0 %v4503_v45, %s4820_s0  ;;  %v4505_v49 = vpop.eup %4504 }
 0x942   :  { %v1013_v51 = vadd.f32 1.0, %v4505_v49 }
 0x944   :  { %4506 = vrcp.f32 %v1013_v51 }
 0x945   :  { %4508 = vpow2.f32 %v3870_v53 }
 0x951   :  { %v4507_v50 = vpop.eup %4506 }
 0x952   :  { %v4509_v58 = vpop.eup %4508  ;;  %v1017_v44 = vmul.f32 %v4507_v50, %v5161_v18 }
 0x953   :  { %v1112_v60 = vadd.f32 1.0, %v4509_v58 }
 0x955   :  { %4510 = vrcp.f32 %v1112_v60 }
 0x962   :  { %v4511_v57 = vpop.eup %4510 }
 0x963   :  { %v1116_v10 = vmul.f32 %v4511_v57, %v5166_v22 }
 0x995   :  { %v1020_v55 = vpop.permute.xlu1 %1019 }
 0x996   :  { %v1022_v56 = vmul.f32 %v4507_v50, %v1020_v55 }
 0x998   :  { %1024 = vrot.lane.b32.xlu1 %v1022_v56, %s4820_s0 }
 0x9b3   :  { %v1119_v62 = vpop.permute.xlu0 %1118 }
 0x9b4   :  { %v1121_v1 = vmul.f32 %v4511_v57, %v1119_v62 }
 0x9b6   :  { %1123 = vrot.lane.b32.xlu0 %v1121_v1, %s4820_s0 }
 0xa0a   :  { %v1025_v3 = vpop.permute.xlu1 %1024 }
 0xa0b   :  { %v5205_v6 = vadd.f32 %v1025_v3, %v1017_v44 }
 0xa0d   :  { %4512 = vtanh.f32 %v5205_v6 }
 0xa1a   :  { %v4513_v8 = vpop.eup %4512 }
 0xa1b   :  { %1030 = vrot.lane.b32.xlu1 %v4513_v8, %s4820_s0 }
 0xa28   :  { %v1124_v61 = vpop.permute.xlu0 %1123 }
 0xa29   :  { %v5210_v11 = vadd.f32 %v1124_v61, %v1116_v10 }
 0xa2b   :  { %4514 = vtanh.f32 %v5210_v11 }
 0xa38   :  { %v4515_v40 = vpop.eup %4514 }
 0xa39   :  { %1129 = vrot.lane.b32.xlu0 %v4515_v40, %s4820_s0 }
 0xa8d   :  { %v1031_v13 = vpop.permute.xlu1 %1030 }
 0xa8e   :  { %v1033_v15 = vmul.f32 %v4507_v50, %v1031_v13 }
 0xa90   :  { %1134 = vrot.lane.b32.xlu1 %v1033_v15, %s4821_s2 }
 0xaab   :  { %v1130_v18 = vpop.permute.xlu0 %1129 }
 0xaac   :  { %v5215_v20 = vmul.f32 %v4511_v57, %v1130_v18 }
 0xaae   :  { %1244 = vrot.lane.b32.xlu0 %v5215_v20, %s4821_s2 }
 0xb02   :  { %v1135_v2 = vpop.permute.xlu1 %1134 }
 0xb03   :  { %1138 = vst.msk [vmem:[#allocation3 + $0x18] sm:$0xff] %vm122_vm1, %v1135_v2  ;;  %4184 = vmatmul.mubr.msk.f32.vlgmr.msra.gmra.mxu0 %vm122_vm1, %v1135_v2 }
 0xb04   :  { %4198 = vmatpush3.msra.mxu0 %v4914_v5  ;;  %4205 = vmatprep.mubr.msk.f32.mxu0 %vm4819_vm0, %v4818_v0 }
 0xb05   :  { %4199 = vmatprep.subr.mxu0 %v4818_v0 }
 0xb06   :  { %4200 = vmatpush3.msra.mxu0 %v4923_v7 }
 0xb07   :  { %4201 = vmatprep.subr.mxu0 %v4818_v0 }
 0xb08   :  { %4202 = vmatpush3.msra.mxu0 %v4932_v9 }
 0xb09   :  { %4203 = vmatprep.subr.mxu0 %v4818_v0 }
 0xb0a   :  { %4204 = vmatpush3.msra.mxu0 %v4945_v12 }
 0xb0b   :  { %4219 = vmatprep.subr.mxu0 %v4818_v0 }
 0xb20   :  { %v1245_v21 = vpop.permute.xlu0 %1244 }
 0xb21   :  { %4195 = vmatmul.mubr.msk.f32.vlgmr.msra.gmra.mxu1 %vm122_vm1, %v1245_v21 }
 0xb22   :  { %4209 = vmatpush3.msra.mxu1 %v4953_v14  ;;  %4216 = vmatprep.mubr.msk.f32.mxu1 %vm4819_vm0, %v4818_v0 }
 0xb23   :  { %4210 = vmatprep.subr.mxu1 %v4818_v0 }
 0xb24   :  { %4211 = vmatpush3.msra.mxu1 %v4962_v16 }
 0xb25   :  { %4212 = vmatprep.subr.mxu1 %v4818_v0 }
 0xb26   :  { %4213 = vmatpush3.msra.mxu1 %v4968_v17 }
 0xb27   :  { %4214 = vmatprep.subr.mxu1 %v4818_v0 }
 0xb28   :  { %4215 = vmatpush3.msra.mxu1 %v4978_v19 }
 0xb29   :  { %4230 = vmatprep.subr.mxu1 %v4818_v0 }
 0xbc3   :  { %v1215_v22 = vpop.f32.mrf.mxu0 }
 0xbc4   :  { %v1219_v23 = vadd.f32 %v1215_v22, %v5056_v54 }
 0xbc5   :  { %v4185_v24 = vpop.f32.mrf.mxu0 }
 0xbc6   :  { %4516 = vtanh.f32 %v1219_v23  ;;  %v3872_v35 = vmul.f32 -1.442695, %v1219_v23 }
 0xbd3   :  { %v4517_v25 = vpop.eup %4516 }
 0xbd4   :  { %1229 = vrot.lane.b32.xlu1 %v4517_v25, %s4820_s0 }
 0xbe1   :  { %v1314_v28 = vpop.f32.mrf.mxu1 }
 0xbe2   :  { %v1318_v31 = vadd.f32 %v1314_v28, %v5054_v52 }
 0xbe3   :  { %v4196_v32 = vpop.f32.mrf.mxu1 }
 0xbe4   :  { %4518 = vtanh.f32 %v1318_v31  ;;  %v3874_v41 = vmul.f32 -1.442695, %v1318_v31 }
 0xbe5   :  { %4520 = vpow2.f32 %v3872_v35 }
 0xbf1   :  { %v4519_v33 = vpop.eup %4518 }
 0xbf2   :  { %1328 = vrot.lane.b32.xlu0 %v4519_v33, %s4820_s0  ;;  %v4521_v34 = vpop.eup %4520 }
 0xbf3   :  { %v1223_v36 = vadd.f32 1.0, %v4521_v34 }
 0xbf5   :  { %4522 = vrcp.f32 %v1223_v36 }
 0xbf6   :  { %4524 = vpow2.f32 %v3874_v41 }
 0xc02   :  { %v4523_v54 = vpop.eup %4522 }
 0xc03   :  { %v4525_v45 = vpop.eup %4524  ;;  %v1227_v53 = vmul.f32 %v4523_v54, %v5205_v6 }
 0xc04   :  { %v1322_v46 = vadd.f32 1.0, %v4525_v45 }
 0xc06   :  { %4526 = vrcp.f32 %v1322_v46 }
 0xc13   :  { %v4527_v52 = vpop.eup %4526 }
 0xc14   :  { %v1326_v58 = vmul.f32 %v4527_v52, %v5210_v11 }
 0xc46   :  { %v1230_v39 = vpop.permute.xlu1 %1229 }
 0xc47   :  { %v1232_v43 = vmul.f32 %v4523_v54, %v1230_v39 }
 0xc49   :  { %1234 = vrot.lane.b32.xlu1 %v1232_v43, %s4820_s0 }
 0xc64   :  { %v1329_v49 = vpop.permute.xlu0 %1328 }
 0xc65   :  { %v1331_v51 = vmul.f32 %v4527_v52, %v1329_v49  ;;  %v4712_v49 = vld [vmem:[%s5780_s3 + $0x18] sm:$0xff] }
 0xc67   :  { %1333 = vrot.lane.b32.xlu0 %v1331_v51, %s4820_s0  ;;  %v4713_v51 = vld [vmem:[%s5780_s3 + $0x10] sm:$0xff] }
 0xcbb   :  { %v1235_v50 = vpop.permute.xlu1 %1234 }
 0xcbc   :  { %v5249_v55 = vadd.f32 %v1235_v50, %v1227_v53  ;;  %v4714_v53 = vld [vmem:[%s5780_s3 + $0x8] sm:$0xff]  ;;  %v4715_v50 = vld [vmem:[%s5780_s3] sm:$0xff]  ;;  %s4822_s3 = smov 96  }
 0xcbe   :  { %4528 = vtanh.f32 %v5249_v55 }
 0xccb   :  { %v4529_v56 = vpop.eup %4528 }
 0xccc   :  { %1240 = vrot.lane.b32.xlu1 %v4529_v56, %s4820_s0  ;;  %v4716_v56 = vld [vmem:[#allocation6 + $0x18] sm:$0xff] }
 0xcd9   :  { %v1334_v60 = vpop.permute.xlu0 %1333 }
 0xcda   :  { %v5254_v57 = vadd.f32 %v1334_v60, %v1326_v58 }
 0xcdc   :  { %4530 = vtanh.f32 %v5254_v57 }
 0xce9   :  { %v4531_v62 = vpop.eup %4530 }
 0xcea   :  { %1339 = vrot.lane.b32.xlu0 %v4531_v62, %s4820_s0 }
 0xd3e   :  { %v1241_v1 = vpop.permute.xlu1 %1240 }
 0xd3f   :  { %v1243_v44 = vmul.f32 %v4523_v54, %v1241_v1 }
 0xd41   :  { %1344 = vrot.lane.b32.xlu1 %v1243_v44, %s4821_s2 }
 0xd5c   :  { %v1340_v3 = vpop.permute.xlu0 %1339 }
 0xd5d   :  { %v5259_v6 = vmul.f32 %v4527_v52, %v1340_v3 }
 0xd5f   :  { %1452 = vrot.lane.b32.xlu0 %v5259_v6, %s4821_s2 }
 0xdb3   :  { %v5263_v8 = vpop.permute.xlu1 %1344 }
 0xdb4   :  { %4206 = vmatmul.mubr.msk.f32.vlgmr.msra.gmra.mxu0 %vm122_vm1, %v5263_v8 }
 0xdb5   :  { %4220 = vmatpush3.msra.mxu0 %v4914_v5  ;;  %4227 = vmatprep.mubr.msk.f32.mxu0 %vm4819_vm0, %v4818_v0 }
 0xdb6   :  { %4221 = vmatprep.subr.mxu0 %v4818_v0 }
 0xdb7   :  { %4222 = vmatpush3.msra.mxu0 %v4923_v7 }
 0xdb8   :  { %4223 = vmatprep.subr.mxu0 %v4818_v0 }
 0xdb9   :  { %4224 = vmatpush3.msra.mxu0 %v4932_v9 }
 0xdba   :  { %4225 = vmatprep.subr.mxu0 %v4818_v0 }
 0xdbb   :  { %4226 = vmatpush3.msra.mxu0 %v4945_v12 }
 0xdbc   :  { %4241 = vmatprep.subr.mxu0 %v4818_v0 }
 0xdd1   :  { %v1453_v10 = vpop.permute.xlu0 %1452 }
 0xdd2   :  { %4217 = vmatmul.mubr.msk.f32.vlgmr.msra.gmra.mxu1 %vm122_vm1, %v1453_v10 }
 0xdd3   :  { %4231 = vmatpush3.msra.mxu1 %v4953_v14  ;;  %4238 = vmatprep.mubr.msk.f32.mxu1 %vm4819_vm0, %v4818_v0 }
 0xdd4   :  { %4232 = vmatprep.subr.mxu1 %v4818_v0 }
 0xdd5   :  { %4233 = vmatpush3.msra.mxu1 %v4962_v16 }
 0xdd6   :  { %4234 = vmatprep.subr.mxu1 %v4818_v0 }
 0xdd7   :  { %4235 = vmatpush3.msra.mxu1 %v4968_v17 }
 0xdd8   :  { %4236 = vmatprep.subr.mxu1 %v4818_v0 }
 0xdd9   :  { %4237 = vmatpush3.msra.mxu1 %v4978_v19 }
 0xdda   :  { %4252 = vmatprep.subr.mxu1 %v4818_v0 }
 0xe74   :  { %v1423_v5 = vpop.f32.mrf.mxu0 }
 0xe75   :  { %v1427_v7 = vadd.f32 %v1423_v5, %v5061_v59 }
 0xe76   :  { %v4207_v9 = vpop.f32.mrf.mxu0 }
 0xe77   :  { %4532 = vtanh.f32 %v1427_v7  ;;  %v3876_v13 = vmul.f32 -1.442695, %v1427_v7 }
 0xe84   :  { %v4533_v12 = vpop.eup %4532 }
 0xe85   :  { %1437 = vrot.lane.b32.xlu1 %v4533_v12, %s4820_s0 }
 0xe92   :  { %v1522_v14 = vpop.f32.mrf.mxu1 }
 0xe93   :  { %v1526_v61 = vadd.f32 %v1522_v14, %v5050_v47 }
 0xe94   :  { %v4218_v11 = vpop.f32.mrf.mxu1 }
 0xe95   :  { %4534 = vtanh.f32 %v1526_v61  ;;  %v3878_v2 = vmul.f32 -1.442695, %v1526_v61 }
 0xe96   :  { %4536 = vpow2.f32 %v3876_v13 }
 0xea2   :  { %v4535_v40 = vpop.eup %4534 }
 0xea3   :  { %1536 = vrot.lane.b32.xlu0 %v4535_v40, %s4820_s0  ;;  %v4537_v15 = vpop.eup %4536 }
 0xea4   :  { %v1431_v18 = vadd.f32 1.0, %v4537_v15 }
 0xea6   :  { %4538 = vrcp.f32 %v1431_v18 }
 0xea7   :  { %4540 = vpow2.f32 %v3878_v2 }
 0xeb3   :  { %v4539_v59 = vpop.eup %4538 }
 0xeb4   :  { %v4541_v23 = vpop.eup %4540  ;;  %v1435_v31 = vmul.f32 %v4539_v59, %v5249_v55 }
 0xeb5   :  { %v1530_v24 = vadd.f32 1.0, %v4541_v23 }
 0xeb7   :  { %4542 = vrcp.f32 %v1530_v24 }
 0xec4   :  { %v4543_v47 = vpop.eup %4542 }
 0xec5   :  { %v1534_v34 = vmul.f32 %v4543_v47, %v5254_v57 }
 0xef7   :  { %v1438_v21 = vpop.permute.xlu1 %1437 }
 0xef8   :  { %v1440_v22 = vmul.f32 %v4539_v59, %v1438_v21 }
 0xefa   :  { %1442 = vrot.lane.b32.xlu1 %v1440_v22, %s4820_s0 }
 0xf15   :  { %v1537_v25 = vpop.permute.xlu0 %1536 }
 0xf16   :  { %v1539_v28 = vmul.f32 %v4543_v47, %v1537_v25 }
 0xf18   :  { %1541 = vrot.lane.b32.xlu0 %v1539_v28, %s4820_s0 }
 0xf6c   :  { %v1443_v32 = vpop.permute.xlu1 %1442 }
 0xf6d   :  { %v5295_v33 = vadd.f32 %v1443_v32, %v1435_v31 }
 0xf6f   :  { %4544 = vtanh.f32 %v5295_v33 }
 0xf7c   :  { %v4545_v35 = vpop.eup %4544 }
 0xf7d   :  { %1448 = vrot.lane.b32.xlu1 %v4545_v35, %s4820_s0 }
 0xf8a   :  { %v1542_v36 = vpop.permute.xlu0 %1541 }
 0xf8b   :  { %v5300_v41 = vadd.f32 %v1542_v36, %v1534_v34 }
 0xf8d   :  { %4546 = vtanh.f32 %v5300_v41 }
 0xf9a   :  { %v4547_v54 = vpop.eup %4546 }
 0xf9b   :  { %1547 = vrot.lane.b32.xlu0 %v4547_v54, %s4820_s0 }
 0xfef   :  { %v1449_v39 = vpop.permute.xlu1 %1448 }
 0xff0   :  { %v1451_v43 = vmul.f32 %v4539_v59, %v1449_v39 }
 0xff2   :  { %1552 = vrot.lane.b32.xlu1 %v1451_v43, %s4821_s2 }
0x100d   :  { %v1548_v45 = vpop.permute.xlu0 %1547 }
0x100e   :  { %v5305_v46 = vmul.f32 %v4543_v47, %v1548_v45 }
0x1010   :  { %1660 = vrot.lane.b32.xlu0 %v5305_v46, %s4821_s2 }
0x1064   :  { %v5309_v52 = vpop.permute.xlu1 %1552 }
0x1065   :  { %4228 = vmatmul.mubr.msk.f32.vlgmr.msra.gmra.mxu0 %vm122_vm1, %v5309_v52 }
0x1066   :  { %4242 = vmatpush3.msra.mxu0 %v4712_v49  ;;  %4249 = vmatprep.mubr.msk.f32.mxu0 %vm4819_vm0, %v4818_v0 }
0x1067   :  { %4243 = vmatprep.subr.mxu0 %v4818_v0 }
0x1068   :  { %4244 = vmatpush3.msra.mxu0 %v4713_v51 }
0x1069   :  { %4245 = vmatprep.subr.mxu0 %v4818_v0 }
0x106a   :  { %4246 = vmatpush3.msra.mxu0 %v4714_v53 }
0x106b   :  { %4247 = vmatprep.subr.mxu0 %v4818_v0 }
0x106c   :  { %4248 = vmatpush3.msra.mxu0 %v4715_v50 }
0x1082   :  { %v1661_v55 = vpop.permute.xlu0 %1660 }
0x1083   :  { %4239 = vmatmul.mubr.msk.f32.vlgmr.msra.gmra.mxu1 %vm122_vm1, %v1661_v55 }
0x1084   :  { %4253 = vmatpush3.msra.mxu1 %v4716_v56  ;;  %4260 = vmatprep.mubr.msk.f32.mxu1 %vm4819_vm0, %v4818_v0 }
0x1085   :  { %4254 = vmatprep.subr.mxu1 %v4818_v0 }
0x1086   :  { %4255 = vmatpush3.msra.mxu1 %v4962_v16 }
0x1087   :  { %4256 = vmatprep.subr.mxu1 %v4818_v0 }
0x1088   :  { %4257 = vmatpush3.msra.mxu1 %v4968_v17 }
0x1089   :  { %4258 = vmatprep.subr.mxu1 %v4818_v0 }
0x108a   :  { %4259 = vmatpush3.msra.mxu1 %v4978_v19 }
0x108b   :  { %4263 = vmatprep.subr.mxu1 %v4818_v0 }
0x1125   :  { %v1631_v58 = vpop.f32.mrf.mxu0 }
0x1126   :  { %v1635_v60 = vadd.f32 %v1631_v58, %v5065_v63 }
0x1127   :  { %v4229_v57 = vpop.f32.mrf.mxu0 }
0x1128   :  { %4548 = vtanh.f32 %v1635_v60  ;;  %v3880_v3 = vmul.f32 -1.442695, %v1635_v60 }
0x1135   :  { %v4549_v62 = vpop.eup %4548 }
0x1136   :  { %1645 = vrot.lane.b32.xlu1 %v4549_v62, %s4820_s0 }
0x1143   :  { %v1730_v1 = vpop.f32.mrf.mxu1 }
0x1144   :  { %v1734_v16 = vadd.f32 %v1730_v1, %v5046_v42 }
0x1145   :  { %v4240_v44 = vpop.f32.mrf.mxu1 }
0x1146   :  { %4550 = vtanh.f32 %v1734_v16  ;;  %v3882_v5 = vmul.f32 -1.442695, %v1734_v16 }
0x1147   :  { %4552 = vpow2.f32 %v3880_v3 }
0x1153   :  { %v4551_v17 = vpop.eup %4550 }
0x1154   :  { %1744 = vrot.lane.b32.xlu0 %v4551_v17, %s4820_s0  ;;  %v4553_v19 = vpop.eup %4552 }
0x1155   :  { %v1639_v10 = vadd.f32 1.0, %v4553_v19 }
0x1157   :  { %4554 = vrcp.f32 %v1639_v10  ;;  %v2000_v10 = vld [vmem:[#allocation8 + $0x78] sm:$0xff] }
0x1158   :  { %4556 = vpow2.f32 %v3882_v5  ;;  %v1999_v5 = vld [vmem:[#allocation8 + $0x70] sm:$0xff]  ;;  %2054 = vmatprep.subr.mxu0 %v2000_v10 }
0x1164   :  { %v4555_v63 = vpop.eup %4554 }
0x1165   :  { %v4557_v12 = vpop.eup %4556  ;;  %v1643_v40 = vmul.f32 %v4555_v63, %v5295_v33 }
0x1166   :  { %v1738_v14 = vadd.f32 1.0, %v4557_v12  ;;  %v1993_v12 = vld [vmem:[#allocation8 + $0x40] sm:$0xff] }
0x1168   :  { %4558 = vrcp.f32 %v1738_v14 }
0x1175   :  { %v4559_v42 = vpop.eup %4558 }
0x1176   :  { %v1742_v2 = vmul.f32 %v4559_v42, %v5300_v41 }
0x11a8   :  { %v1646_v7 = vpop.permute.xlu1 %1645 }
0x11a9   :  { %v1648_v9 = vmul.f32 %v4555_v63, %v1646_v7  ;;  %v1997_v7 = vld [vmem:[#allocation8 + $0x60] sm:$0xff] }
0x11ab   :  { %1650 = vrot.lane.b32.xlu1 %v1648_v9, %s4820_s0  ;;  %v1994_v9 = vld [vmem:[#allocation8 + $0x48] sm:$0xff] }
0x11c6   :  { %v1745_v61 = vpop.permute.xlu0 %1744 }
0x11c7   :  { %v1747_v11 = vmul.f32 %v4559_v42, %v1745_v61 }
0x11c9   :  { %1749 = vrot.lane.b32.xlu0 %v1747_v11, %s4820_s0 }
0x121d   :  { %v1651_v13 = vpop.permute.xlu1 %1650 }
0x121e   :  { %v1653_v15 = vadd.f32 %v1651_v13, %v1643_v40  ;;  %v1992_v40 = vld [vmem:[#allocation8 + $0x38] sm:$0xff]  ;;  %v1991_v13 = vld [vmem:[#allocation8 + $0x30] sm:$0xff] }
0x1220   :  { %4560 = vtanh.f32 %v1653_v15 }
0x122d   :  { %v4561_v18 = vpop.eup %4560 }
0x122e   :  { %1656 = vrot.lane.b32.xlu1 %v4561_v18, %s4820_s0  ;;  %v1989_v18 = vld [vmem:[#allocation8 + $0x20] sm:$0xff] }
0x123b   :  { %v1750_v59 = vpop.permute.xlu0 %1749 }
0x123c   :  { %v1752_v21 = vadd.f32 %v1750_v59, %v1742_v2  ;;  %v5389_v2 = vld [vmem:[#allocation10 + $0x18] sm:$0xff] }
0x123d   :  { %v1988_v59 = vld [vmem:[#allocation8 + $0x18] sm:$0xff] }
0x123e   :  { %4562 = vtanh.f32 %v1752_v21 }
0x124b   :  { %v4563_v22 = vpop.eup %4562 }
0x124c   :  { %1755 = vrot.lane.b32.xlu0 %v4563_v22, %s4820_s0  ;;  %v1986_v22 = vld [vmem:[#allocation8 + $0x8] sm:$0xff] }
0x12a0   :  { %v1657_v23 = vpop.permute.xlu1 %1656 }
0x12a1   :  { %v1659_v24 = vmul.f32 %v4555_v63, %v1657_v23  ;;  %v1998_v63 = vld [vmem:[#allocation8 + $0x68] sm:$0xff]  ;;  %v1985_v23 = vld [vmem:[#allocation8] sm:$0xff] }
0x12a3   :  { %1760 = vrot.lane.b32.xlu1 %v1659_v24, %s4821_s2  ;;  %v5396_v24 = vld [vmem:[#allocation10 + $0x8] sm:$0xff] }
0x12be   :  { %v1756_v47 = vpop.permute.xlu0 %1755 }
0x12bf   :  { %v1758_v25 = vmul.f32 %v4559_v42, %v1756_v47  ;;  %v5401_v47 = vld [vmem:[#allocation10] sm:$0xff] }
0x12c1   :  { %1868 = vrot.lane.b32.xlu0 %v1758_v25, %s4821_s2 }
0x1315   :  { %v5352_v28 = vpop.permute.xlu1 %1760 }
0x1316   :  { %4250 = vmatmul.mubr.msk.f32.vlgmr.msra.gmra.mxu0 %vm122_vm1, %v5352_v28 }
0x1317   :  { %2102 = vmatprep.mubr.f32.mxu0 %v4818_v0  ;;  %2055 = vmatpush1.msra.mxu0 %v1999_v5 }
0x1318   :  { %2056 = vmatprep.subr.mxu0 %v1998_v63 }
0x1319   :  { %2057 = vmatpush1.msra.mxu0 %v1997_v7 }
0x1333   :  { %v1869_v31 = vpop.permute.xlu0 %1868 }
0x1334   :  { %4261 = vmatmul.mubr.msk.f32.vlgmr.msra.gmra.mxu1 %vm122_vm1, %v1869_v31 }
0x1335   :  { %4271 = vmatprep.mubr.msk.f32.mxu1 %vm4819_vm0, %v4818_v0  ;;  %4264 = vmatpush3.msra.mxu1 %v5389_v2 }
0x1336   :  { %4265 = vmatprep.subr.mxu1 %v4818_v0 }
0x13d6   :  { %v1839_v32 = vpop.f32.mrf.mxu0 }
0x13d7   :  { %v1843_v33 = vadd.f32 %v1839_v32, %v5069_v4 }
0x13d8   :  { %v4251_v35 = vpop.f32.mrf.mxu0 }
0x13d9   :  { %4564 = vtanh.f32 %v1843_v33  ;;  %v3884_v43 = vmul.f32 -1.442695, %v1843_v33  ;;  %v5419_v33 = vld [vmem:[#allocation11 + $0x18] sm:$0xff]  ;;  %v5423_v35 = vld [vmem:[#allocation11 + $0x10] sm:$0xff] }
0x13e6   :  { %v4565_v34 = vpop.eup %4564 }
0x13e7   :  { %1853 = vrot.lane.b32.xlu1 %v4565_v34, %s4820_s0 }
0x13f4   :  { %v1938_v36 = vpop.f32.mrf.mxu1 }
0x13f5   :  { %v1942_v41 = vadd.f32 %v1938_v36, %v5042_v37 }
0x13f6   :  { %v4262_v54 = vpop.f32.mrf.mxu1 }
0x13f7   :  { %4566 = vtanh.f32 %v1942_v41  ;;  %v3886_v51 = vmul.f32 -1.442695, %v1942_v41 }
0x13f8   :  { %4568 = vpow2.f32 %v3884_v43 }
0x1404   :  { %v4567_v39 = vpop.eup %4566 }
0x1405   :  { %1952 = vrot.lane.b32.xlu0 %v4567_v39, %s4820_s0  ;;  %v4569_v45 = vpop.eup %4568 }
0x1406   :  { %v1847_v49 = vadd.f32 1.0, %v4569_v45 }
0x1408   :  { %4570 = vrcp.f32 %v1847_v49 }
0x1409   :  { %4572 = vpow2.f32 %v3886_v51 }
0x1415   :  { %v5364_v4 = vpop.eup %4570 }
0x1416   :  { %v4573_v37 = vpop.eup %4572  ;;  %v1851_v57 = vmul.f32 %v5364_v4, %v1653_v15  ;;  %v1990_v15 = vld [vmem:[#allocation8 + $0x28] sm:$0xff] }
0x1417   :  { %v1946_v55 = vadd.f32 1.0, %v4573_v37 }
0x1419   :  { %4574 = vrcp.f32 %v1946_v55 }
0x1426   :  { %v5368_v56 = vpop.eup %4574 }
0x1427   :  { %v1950_v44 = vmul.f32 %v5368_v56, %v1752_v21  ;;  %v5393_v21 = vld [vmem:[#allocation10 + $0x10] sm:$0xff] }
0x1428   :  { %4266 = vmatpush3.msra.mxu1 %v5393_v21 }
0x1429   :  { %4267 = vmatprep.subr.mxu1 %v4818_v0 }
0x142a   :  { %4268 = vmatpush3.msra.mxu1 %v5396_v24 }
0x142b   :  { %4269 = vmatprep.subr.mxu1 %v4818_v0 }
0x142c   :  { %4270 = vmatpush3.msra.mxu1 %v5401_v47 }
0x142d   :  { %4272 = vmatmul.mubr.f32.vlgmr.msra.gmra.mxu1 %v4818_v0  ;;  %4274 = vmatprep.subr.mxu1 %v4818_v0 }
0x142e   :  { %4282 = vmatprep.mubr.msk.f32.mxu1 %vm4819_vm0, %v4818_v0  ;;  %4275 = vmatpush3.msra.mxu1 %v5419_v33 }
0x142f   :  { %4276 = vmatprep.subr.mxu1 %v4818_v0 }
0x1430   :  { %4277 = vmatpush3.msra.mxu1 %v5423_v35 }
0x1431   :  { %4278 = vmatprep.subr.mxu1 %v4818_v0 }
0x1459   :  { %v1854_v53 = vpop.permute.xlu1 %1853 }
0x145a   :  { %v1856_v50 = vmul.f32 %v5364_v4, %v1854_v53 }
0x145c   :  { %1858 = vrot.lane.b32.xlu1 %v1856_v50, %s4820_s0 }
0x1477   :  { %v1953_v58 = vpop.permute.xlu0 %1952 }
0x1478   :  { %v1955_v60 = vmul.f32 %v5368_v56, %v1953_v58 }
0x147a   :  { %1957 = vrot.lane.b32.xlu0 %v1955_v60, %s4820_s0 }
0x14ce   :  { %v1859_v62 = vpop.permute.xlu1 %1858 }
0x14cf   :  { %v1861_v1 = vadd.f32 %v1859_v62, %v1851_v57 }
0x14d1   :  { %4576 = vtanh.f32 %v1861_v1 }
0x14de   :  { %v4577_v16 = vpop.eup %4576 }
0x14df   :  { %1864 = vrot.lane.b32.xlu1 %v4577_v16, %s4820_s0 }
0x14e3   :  { %1765 = vrot.lane.b32.xlu1 %v1758_v25, %s4822_s3 }
0x14e7   :  { %1349 = vrot.lane.b32.xlu1 %v5259_v6, %s4822_s3  ;;  %v1996_v6 = vld [vmem:[#allocation8 + $0x58] sm:$0xff] }
0x14e8   :  { %2058 = vmatprep.subr.mxu0 %v1996_v6 }
0x14eb   :  { %924 = vrot.lane.b32.xlu1 %v5171_v30, %s4822_s3  ;;  %v1995_v30 = vld [vmem:[#allocation8 + $0x50] sm:$0xff] }
0x14ec   :  { %v1958_v17 = vpop.permute.xlu0 %1957  ;;  %2059 = vmatpush1.msra.mxu0 %v1995_v30 }
0x14ed   :  { %v1960_v3 = vadd.f32 %v1958_v17, %v1950_v44  ;;  %2060 = vmatprep.subr.mxu0 %v1994_v9  ;;  %v2249_v53 = vpop.f32.mrf.mxu1 }
0x14ee   :  { %2061 = vmatpush1.msra.mxu0 %v1993_v12 }
0x14ef   :  { %4578 = vtanh.f32 %v1960_v3  ;;  %491 = vrot.lane.b32.xlu1 %v5083_v48, %s4822_s3  ;;  %2062 = vmatprep.subr.mxu0 %v1992_v40  ;;  %v4273_v50 = vpop.f32.mrf.mxu1 }
0x14f0   :  { %2063 = vmatpush1.msra.mxu0 %v1991_v13 }
0x14f1   :  { %2064 = vmatprep.subr.mxu0 %v1990_v15 }
0x14f2   :  { %2065 = vmatpush1.msra.mxu0 %v1989_v18 }
0x14f3   :  { %2066 = vmatprep.subr.mxu0 %v1988_v59 }
0x14fc   :  { %v4579_v19 = vpop.eup %4578 }
0x14fd   :  { %1963 = vrot.lane.b32.xlu0 %v4579_v19, %s4820_s0 }
0x1551   :  { %v1865_v48 = vpop.permute.xlu1 %1864 }
0x1552   :  { %v1867_v32 = vmul.f32 %v5364_v4, %v1865_v48 }
0x1555   :  { %v1766_v14 = vpop.permute.xlu1 %1765 }
0x1556   :  { %1768 = vst.msk [vmem:[#allocation3 + $0x8] sm:$0xff] %vm495_vm2, %v1766_v14 }
0x1559   :  { %v1350_v42 = vpop.permute.xlu1 %1349 }
0x155a   :  { %1352 = vst.msk [vmem:[#allocation3 + $0x18] sm:$0xff] %vm495_vm2, %v1350_v42 }
0x155d   :  { %v925_v61 = vpop.permute.xlu1 %924  ;;  %v1978_v39 = vld [vmem:[#allocation3 + $0x8] sm:$0xff] }
0x155e   :  { %928 = vst.msk [vmem:[#allocation3 + $0x28] sm:$0xff] %vm495_vm2, %v925_v61 }
0x155f   :  { %1555 = vst.msk [vmem:[#allocation3 + $0x28] sm:$0xff] %vm122_vm1, %v5309_v52  ;;  %v1987_v52 = vld [vmem:[#allocation8 + $0x10] sm:$0xff] }
0x1560   :  { %2067 = vmatpush1.msra.mxu0 %v1987_v52 }
0x1561   :  { %v492_v11 = vpop.permute.xlu1 %491  ;;  %2068 = vmatprep.subr.mxu0 %v1986_v22  ;;  %v1980_v45 = vld [vmem:[#allocation3 + $0x18] sm:$0xff] }
0x1562   :  { %496 = vst.msk [vmem:[#allocation3 + $0x38] sm:$0xff] %vm495_vm2, %v492_v11  ;;  %2069 = vmatpush1.msra.mxu0 %v1985_v23 }
0x1563   :  { %4318 = vmatprep.subr.mxu0 %v4818_v0 }
0x1566   :  { %v1982_v49 = vld [vmem:[#allocation3 + $0x28] sm:$0xff] }
0x156f   :  { %v1964_v25 = vpop.permute.xlu0 %1963 }
0x1570   :  { %v1966_v31 = vmul.f32 %v5368_v56, %v1964_v25  ;;  %v2001_v56 = vld [vmem:[%s5783_s6] sm:$0x3] }
0x1571   :  { %v2006_v58 = vrot.slane %v2001_v56, %v114_v27  ;;  %v2010_v60 = vrot.slane %v2001_v56, %v118_v29 }
0x1572   :  { %1973 = vrot.lane.b32.xlu0 %v1966_v31, %s4822_s3 }
0x1576   :  { %1557 = vrot.lane.b32.xlu0 %v5305_v46, %s4822_s3  ;;  %v5426_v46 = vld [vmem:[#allocation11 + $0x8] sm:$0xff] }
0x1577   :  { %4279 = vmatpush3.msra.mxu1 %v5426_v46 }
0x1578   :  { %4280 = vmatprep.subr.mxu1 %v4818_v0 }
0x157a   :  { %1140 = vrot.lane.b32.xlu0 %v5215_v20, %s4822_s3 }
0x157e   :  { %708 = vrot.lane.b32.xlu0 %v5127_v38, %s4822_s3  ;;  %v5431_v38 = vld [vmem:[#allocation11] sm:$0xff] }
0x157f   :  { %4281 = vmatpush3.msra.mxu1 %v5431_v38 }
0x1580   :  { %4283 = vmatmul.mubr.f32.vlgmr.msra.gmra.mxu1 %v4818_v0  ;;  %4285 = vmatprep.subr.mxu1 %v4818_v0 }
0x1581   :  { %4286 = vmatpush3.msra.mxu1 %v5389_v2  ;;  %4293 = vmatprep.mubr.msk.f32.mxu1 %vm4819_vm0, %v4818_v0 }
0x1582   :  { %1968 = vrot.lane.b32.xlu0 %v1867_v32, %s4821_s2  ;;  %4287 = vmatprep.subr.mxu1 %v4818_v0 }
0x1583   :  { %4288 = vmatpush3.msra.mxu1 %v5393_v21 }
0x1584   :  { %4289 = vmatprep.subr.mxu1 %v4818_v0 }
0x1585   :  { %4290 = vmatpush3.msra.mxu1 %v5396_v24 }
0x1586   :  { %4291 = vmatprep.subr.mxu1 %v4818_v0 }
0x1587   :  { %4292 = vmatpush3.msra.mxu1 %v5401_v47 }
0x1588   :  { %4296 = vmatprep.subr.mxu1 %v4818_v0 }
0x15e4   :  { %v1974_v20 = vpop.permute.xlu0 %1973 }
0x15e5   :  { %1976 = vst.msk [vmem:[#allocation3] sm:$0xff] %vm495_vm2, %v1974_v20 }
0x15e8   :  { %v1558_v34 = vpop.permute.xlu0 %1557 }
0x15e9   :  { %1560 = vst.msk [vmem:[#allocation3 + $0x10] sm:$0xff] %vm495_vm2, %v1558_v34 }
0x15ec   :  { %v1141_v36 = vpop.permute.xlu0 %1140  ;;  %v1977_v41 = vld [vmem:[#allocation3] sm:$0xff] }
0x15ed   :  { %1144 = vst.msk [vmem:[#allocation3 + $0x20] sm:$0xff] %vm495_vm2, %v1141_v36  ;;  %3887 = vmatmul.mubr.msk.f32.vlgmr.msra.gmra.mxu0 %vm2013_vm3, %v1977_v41 }
0x15ee   :  { %1347 = vst.msk [vmem:[#allocation3 + $0x20] sm:$0xff] %vm122_vm1, %v5263_v8  ;;  %2108 = vmatprep.mubr.f32.mxu0 %v4818_v0  ;;  %4319 = vmatpush3.msra.mxu0 %v5419_v33 }
0x15ef   :  { %4320 = vmatprep.subr.mxu0 %v4818_v0 }
0x15f0   :  { %v709_v54 = vpop.permute.xlu0 %708  ;;  %4321 = vmatpush3.msra.mxu0 %v5423_v35  ;;  %v1979_v43 = vld [vmem:[#allocation3 + $0x10] sm:$0xff] }
0x15f1   :  { %712 = vst.msk [vmem:[#allocation3 + $0x30] sm:$0xff] %vm495_vm2, %v709_v54  ;;  %3888 = vmatmul.mubr.msk.f32.gmra.mxu0 %vm2013_vm3, %v1978_v39  ;;  %4322 = vmatprep.subr.mxu0 %v4818_v0 }
0x15f2   :  { %1763 = vst.msk [vmem:[#allocation3 + $0x30] sm:$0xff] %vm122_vm1, %v5352_v28  ;;  %2114 = vmatprep.mubr.f32.mxu0 %v4818_v0  ;;  %4323 = vmatpush3.msra.mxu0 %v5426_v46 }
0x15f3   :  { %4324 = vmatprep.subr.mxu0 %v4818_v0 }
0x15f4   :  { %v1969_v8 = vpop.permute.xlu0 %1968  ;;  %4325 = vmatpush3.msra.mxu0 %v5431_v38 }
0x15f5   :  { %1971 = vst.msk [vmem:[#allocation3 + $0x38] sm:$0xff] %vm122_vm1, %v1969_v8  ;;  %3889 = vmatmul.mubr.msk.f32.gmra.mxu0 %vm2013_vm3, %v1979_v43  ;;  %4340 = vmatprep.subr.mxu0 %v4818_v0  ;;  %v1981_v28 = vld [vmem:[#allocation3 + $0x20] sm:$0xff] }
0x15f6   :  { %2120 = vmatprep.mubr.f32.mxu0 %v4818_v0 }
0x15f9   :  { %3890 = vmatmul.mubr.msk.f32.gmra.mxu0 %vm2013_vm3, %v1980_v45  ;;  %v1983_v51 = vld [vmem:[#allocation3 + $0x30] sm:$0xff] }
0x15fa   :  { %2126 = vmatprep.mubr.f32.mxu0 %v4818_v0 }
0x15fc   :  { %v1984_v4 = vld [vmem:[#allocation3 + $0x38] sm:$0xff] }
0x15fd   :  { %3891 = vmatmul.mubr.msk.f32.gmra.mxu0 %vm2013_vm3, %v1981_v28 }
0x15fe   :  { %2132 = vmatprep.mubr.f32.mxu0 %v4818_v0 }
0x1601   :  { %3892 = vmatmul.mubr.msk.f32.gmra.mxu0 %vm2013_vm3, %v1982_v49 }
0x1602   :  { %2138 = vmatprep.mubr.f32.mxu0 %v4818_v0 }
0x1605   :  { %3893 = vmatmul.mubr.msk.f32.gmra.mxu0 %vm2013_vm3, %v1983_v51 }
0x1606   :  { %2144 = vmatprep.mubr.f32.mxu0 %v4818_v0 }
0x1609   :  { %3894 = vmatmul.mubr.msk.f32.gmra.mxu0 %vm2013_vm3, %v1984_v4 }
0x160a   :  { %4326 = vmatprep.mubr.msk.f32.mxu0 %vm4819_vm0, %v4818_v0 }
0x1640   :  { %v2344_v37 = vpop.f32.mrf.mxu1 }
0x1642   :  { %v4284_v55 = vpop.f32.mrf.mxu1 }
0x16ad   :  { %v2104_v57 = vpop.f32.mrf.mxu0 }
0x16ae   :  { %v2105_v62 = vadd.f32 %v2104_v57, %v2006_v58 }
0x16af   :  { %v2106_v1 = vpop.f32.mrf.mxu0 }
0x16b0   :  { %v5487_v16 = vadd.f32 %v2106_v1, %v2010_v60  ;;  %v2253_v44 = vadd.f32 %v2249_v53, %v2105_v62 }
0x16b1   :  { %v2110_v17 = vpop.f32.mrf.mxu0 }
0x16b2   :  { %4580 = vtanh.f32 %v2253_v44  ;;  %v5489_v3 = vadd.f32 %v2110_v17, %v2006_v58  ;;  %v3895_v34 = vmul.f32 -1.442695, %v2253_v44 }
0x16b3   :  { %v2112_v19 = vpop.f32.mrf.mxu0 }
0x16b4   :  { %v5491_v10 = vadd.f32 %v2112_v19, %v2010_v60 }
0x16b5   :  { %v2116_v5 = vpop.f32.mrf.mxu0 }
0x16b6   :  { %v5493_v63 = vadd.f32 %v2116_v5, %v2006_v58 }
0x16b7   :  { %v2118_v27 = vpop.f32.mrf.mxu0 }
0x16b8   :  { %v5495_v7 = vadd.f32 %v2118_v27, %v2010_v60 }
0x16b9   :  { %v2122_v26 = vpop.f32.mrf.mxu0 }
0x16ba   :  { %v5497_v29 = vadd.f32 %v2122_v26, %v2006_v58 }
0x16bb   :  { %v2124_v6 = vpop.f32.mrf.mxu0 }
0x16bc   :  { %v5499_v30 = vadd.f32 %v2124_v6, %v2010_v60 }
0x16bd   :  { %v2128_v9 = vpop.f32.mrf.mxu0 }
0x16be   :  { %v5501_v12 = vadd.f32 %v2128_v9, %v2006_v58 }
0x16bf   :  { %v4581_v48 = vpop.eup %4580  ;;  %v2130_v14 = vpop.f32.mrf.mxu0 }
0x16c0   :  { %v5503_v42 = vadd.f32 %v2130_v14, %v2010_v60  ;;  %2263 = vrot.lane.b32.xlu1 %v4581_v48, %s4820_s0 }
0x16c1   :  { %v2134_v61 = vpop.f32.mrf.mxu0 }
0x16c2   :  { %v5506_v11 = vadd.f32 %v2134_v61, %v2006_v58 }
0x16c3   :  { %v2136_v40 = vpop.f32.mrf.mxu0 }
0x16c4   :  { %v5508_v13 = vadd.f32 %v2136_v40, %v2010_v60 }
0x16c5   :  { %v2140_v15 = vpop.f32.mrf.mxu0 }
0x16c6   :  { %v5510_v18 = vadd.f32 %v2140_v15, %v2006_v58 }
0x16c7   :  { %v2142_v59 = vpop.f32.mrf.mxu0 }
0x16c8   :  { %v5512_v52 = vadd.f32 %v2142_v59, %v2010_v60 }
0x16c9   :  { %v2146_v22 = vpop.f32.mrf.mxu0 }
0x16ca   :  { %v5514_v23 = vadd.f32 %v2146_v22, %v2006_v58 }
0x16cb   :  { %v2148_v25 = vpop.f32.mrf.mxu0 }
0x16cc   :  { %v2149_v31 = vadd.f32 %v2148_v25, %v2010_v60 }
0x16ce   :  { %v2348_v32 = vadd.f32 %v2344_v37, %v2149_v31 }
0x16d0   :  { %4582 = vtanh.f32 %v2348_v32  ;;  %v3896_v54 = vmul.f32 -1.442695, %v2348_v32 }
0x16d1   :  { %4584 = vpow2.f32 %v3895_v34 }
0x16dd   :  { %v4583_v20 = vpop.eup %4582 }
0x16de   :  { %2358 = vrot.lane.b32.xlu0 %v4583_v20, %s4820_s0  ;;  %v4585_v36 = vpop.eup %4584 }
0x16df   :  { %v2257_v41 = vadd.f32 1.0, %v4585_v36 }
0x16e1   :  { %4586 = vrcp.f32 %v2257_v41 }
0x16e2   :  { %4588 = vpow2.f32 %v3896_v54 }
0x16ee   :  { %v4587_v39 = vpop.eup %4586 }
0x16ef   :  { %v4589_v45 = vpop.eup %4588  ;;  %v2261_v53 = vmul.f32 0.0, %v4587_v39 }
0x16f0   :  { %v2352_v28 = vadd.f32 1.0, %v4589_v45 }
0x16f2   :  { %4590 = vrcp.f32 %v2352_v28 }
0x16ff   :  { %v4591_v49 = vpop.eup %4590 }
0x1700   :  { %v2356_v56 = vmul.f32 0.0, %v4591_v49 }
0x1732   :  { %v2264_v8 = vpop.permute.xlu1 %2263 }
0x1733   :  { %v2266_v43 = vmul.f32 %v4587_v39, %v2264_v8 }
0x1735   :  { %2268 = vrot.lane.b32.xlu1 %v2266_v43, %s4820_s0 }
0x1750   :  { %v2359_v51 = vpop.permute.xlu0 %2358 }
0x1751   :  { %v2361_v4 = vmul.f32 %v4591_v49, %v2359_v51 }
0x1753   :  { %2363 = vrot.lane.b32.xlu0 %v2361_v4, %s4820_s0 }
0x17a7   :  { %v2269_v50 = vpop.permute.xlu1 %2268 }
0x17a8   :  { %v5519_v37 = vadd.f32 %v2269_v50, %v2261_v53 }
0x17aa   :  { %4592 = vtanh.f32 %v5519_v37 }
0x17b7   :  { %v4593_v55 = vpop.eup %4592 }
0x17b8   :  { %2274 = vrot.lane.b32.xlu1 %v4593_v55, %s4820_s0 }
0x17c5   :  { %v2364_v58 = vpop.permute.xlu0 %2363 }
0x17c6   :  { %v5523_v60 = vadd.f32 %v2364_v58, %v2356_v56 }
0x17c8   :  { %4594 = vtanh.f32 %v5523_v60 }
0x17d5   :  { %v4595_v57 = vpop.eup %4594 }
0x17d6   :  { %2369 = vrot.lane.b32.xlu0 %v4595_v57, %s4820_s0 }
0x182a   :  { %v2275_v62 = vpop.permute.xlu1 %2274 }
0x182b   :  { %v2277_v1 = vmul.f32 %v4587_v39, %v2275_v62 }
0x182d   :  { %2382 = vrot.lane.b32.xlu1 %v2277_v1, %s4821_s2 }
0x1848   :  { %v2370_v44 = vpop.permute.xlu0 %2369 }
0x1849   :  { %v2372_v17 = vmul.f32 %v4591_v49, %v2370_v44 }
0x184b   :  { %2482 = vrot.lane.b32.xlu0 %v2372_v17, %s4821_s2 }
0x189f   :  { %v2383_v19 = vpop.permute.xlu1 %2382 }
0x18a0   :  { %4294 = vmatmul.mubr.msk.f32.vlgmr.msra.gmra.mxu1 %vm122_vm1, %v2383_v19 }
0x18a1   :  { %4297 = vmatpush3.msra.mxu1 %v5419_v33  ;;  %4304 = vmatprep.mubr.msk.f32.mxu1 %vm4819_vm0, %v4818_v0 }
0x18a2   :  { %4298 = vmatprep.subr.mxu1 %v4818_v0 }
0x18a3   :  { %4299 = vmatpush3.msra.mxu1 %v5423_v35 }
0x18a4   :  { %4300 = vmatprep.subr.mxu1 %v4818_v0 }
0x18a5   :  { %4301 = vmatpush3.msra.mxu1 %v5426_v46 }
0x18a6   :  { %4302 = vmatprep.subr.mxu1 %v4818_v0 }
0x18a7   :  { %4303 = vmatpush3.msra.mxu1 %v5431_v38 }
0x18a8   :  { %4307 = vmatprep.subr.mxu1 %v4818_v0 }
0x18bd   :  { %v2483_v5 = vpop.permute.xlu0 %2482 }
0x18be   :  { %4305 = vmatmul.mubr.msk.f32.vlgmr.msra.gmra.mxu1 %vm122_vm1, %v2483_v5 }
0x18bf   :  { %4308 = vmatpush3.msra.mxu1 %v5389_v2  ;;  %4315 = vmatprep.mubr.msk.f32.mxu1 %vm4819_vm0, %v4818_v0 }
0x18c0   :  { %4309 = vmatprep.subr.mxu1 %v4818_v0 }
0x18c1   :  { %4310 = vmatpush3.msra.mxu1 %v5393_v21 }
0x18c2   :  { %4311 = vmatprep.subr.mxu1 %v4818_v0 }
0x18c3   :  { %4312 = vmatpush3.msra.mxu1 %v5396_v24 }
0x18c4   :  { %4313 = vmatprep.subr.mxu1 %v4818_v0 }
0x18c5   :  { %4314 = vmatpush3.msra.mxu1 %v5401_v47 }
0x18c6   :  { %4329 = vmatprep.subr.mxu1 %v4818_v0 }
0x1960   :  { %v2452_v27 = vpop.f32.mrf.mxu1 }
0x1961   :  { %v2456_v26 = vadd.f32 %v2452_v27, %v5489_v3 }
0x1962   :  { %v4295_v6 = vpop.f32.mrf.mxu1 }
0x1963   :  { %4596 = vtanh.f32 %v2456_v26  ;;  %v3898_v15 = vmul.f32 -1.442695, %v2456_v26 }
0x1970   :  { %v4597_v9 = vpop.eup %4596 }
0x1971   :  { %2466 = vrot.lane.b32.xlu1 %v4597_v9, %s4820_s0 }
0x197e   :  { %v2552_v48 = vpop.f32.mrf.mxu1 }
0x197f   :  { %v2556_v14 = vadd.f32 %v2552_v48, %v5512_v52 }
0x1980   :  { %v4306_v61 = vpop.f32.mrf.mxu1 }
0x1981   :  { %4598 = vtanh.f32 %v2556_v14  ;;  %v3900_v25 = vmul.f32 -1.442695, %v2556_v14 }
0x1982   :  { %4600 = vpow2.f32 %v3898_v15 }
0x198e   :  { %v4599_v40 = vpop.eup %4598 }
0x198f   :  { %2566 = vrot.lane.b32.xlu0 %v4599_v40, %s4820_s0  ;;  %v4601_v59 = vpop.eup %4600 }
0x1990   :  { %v2460_v22 = vadd.f32 1.0, %v4601_v59 }
0x1992   :  { %4602 = vrcp.f32 %v2460_v22 }
0x1993   :  { %4604 = vpow2.f32 %v3900_v25 }
0x199f   :  { %v4603_v3 = vpop.eup %4602 }
0x19a0   :  { %v4605_v20 = vpop.eup %4604  ;;  %v2464_v54 = vmul.f32 %v4603_v3, %v5519_v37 }
0x19a1   :  { %v2560_v34 = vadd.f32 1.0, %v4605_v20 }
0x19a3   :  { %4606 = vrcp.f32 %v2560_v34 }
0x19b0   :  { %v4607_v52 = vpop.eup %4606 }
0x19b1   :  { %v2564_v45 = vmul.f32 %v4607_v52, %v5523_v60 }
0x19e3   :  { %v2467_v31 = vpop.permute.xlu1 %2466 }
0x19e4   :  { %v2469_v32 = vmul.f32 %v4603_v3, %v2467_v31 }
0x19e6   :  { %2471 = vrot.lane.b32.xlu1 %v2469_v32, %s4820_s0 }
0x1a01   :  { %v2567_v36 = vpop.permute.xlu0 %2566 }
0x1a02   :  { %v2569_v41 = vmul.f32 %v4607_v52, %v2567_v36 }
0x1a04   :  { %2571 = vrot.lane.b32.xlu0 %v2569_v41, %s4820_s0 }
0x1a58   :  { %v2472_v39 = vpop.permute.xlu1 %2471 }
0x1a59   :  { %v5558_v8 = vadd.f32 %v2472_v39, %v2464_v54 }
0x1a5b   :  { %4608 = vtanh.f32 %v5558_v8 }
0x1a68   :  { %v4609_v43 = vpop.eup %4608 }
0x1a69   :  { %2477 = vrot.lane.b32.xlu1 %v4609_v43, %s4820_s0 }
0x1a76   :  { %v2572_v28 = vpop.permute.xlu0 %2571 }
0x1a77   :  { %v5563_v49 = vadd.f32 %v2572_v28, %v2564_v45 }
0x1a79   :  { %4610 = vtanh.f32 %v5563_v49 }
0x1a86   :  { %v4611_v51 = vpop.eup %4610 }
0x1a87   :  { %2577 = vrot.lane.b32.xlu0 %v4611_v51, %s4820_s0 }
0x1adb   :  { %v2478_v4 = vpop.permute.xlu1 %2477 }
0x1adc   :  { %v2480_v53 = vmul.f32 %v4603_v3, %v2478_v4 }
0x1ade   :  { %2590 = vrot.lane.b32.xlu1 %v2480_v53, %s4821_s2 }
0x1af9   :  { %v2578_v50 = vpop.permute.xlu0 %2577 }
0x1afa   :  { %v2580_v37 = vmul.f32 %v4607_v52, %v2578_v50 }
0x1afc   :  { %2690 = vrot.lane.b32.xlu0 %v2580_v37, %s4821_s2 }
0x1b50   :  { %v2591_v55 = vpop.permute.xlu1 %2590 }
0x1b51   :  { %4316 = vmatmul.mubr.msk.f32.vlgmr.msra.gmra.mxu1 %vm122_vm1, %v2591_v55 }
0x1b52   :  { %4330 = vmatpush3.msra.mxu1 %v5389_v2  ;;  %4337 = vmatprep.mubr.msk.f32.mxu1 %vm4819_vm0, %v4818_v0 }
0x1b53   :  { %4331 = vmatprep.subr.mxu1 %v4818_v0 }
0x1b54   :  { %4332 = vmatpush3.msra.mxu1 %v5393_v21 }
0x1b55   :  { %4333 = vmatprep.subr.mxu1 %v4818_v0 }
0x1b56   :  { %4334 = vmatpush3.msra.mxu1 %v5396_v24 }
0x1b57   :  { %4335 = vmatprep.subr.mxu1 %v4818_v0 }
0x1b58   :  { %4336 = vmatpush3.msra.mxu1 %v5401_v47 }
0x1b59   :  { %4351 = vmatprep.subr.mxu1 %v4818_v0 }
0x1b6e   :  { %v2691_v56 = vpop.permute.xlu0 %2690 }
0x1b6f   :  { %4327 = vmatmul.mubr.msk.f32.vlgmr.msra.gmra.mxu0 %vm122_vm1, %v2691_v56 }
0x1b70   :  { %4341 = vmatpush3.msra.mxu0 %v5419_v33  ;;  %4348 = vmatprep.mubr.msk.f32.mxu0 %vm4819_vm0, %v4818_v0 }
0x1b71   :  { %4342 = vmatprep.subr.mxu0 %v4818_v0 }
0x1b72   :  { %4343 = vmatpush3.msra.mxu0 %v5423_v35 }
0x1b73   :  { %4344 = vmatprep.subr.mxu0 %v4818_v0 }
0x1b74   :  { %4345 = vmatpush3.msra.mxu0 %v5426_v46 }
0x1b75   :  { %4346 = vmatprep.subr.mxu0 %v4818_v0 }
0x1b76   :  { %4347 = vmatpush3.msra.mxu0 %v5431_v38 }
0x1b77   :  { %4362 = vmatprep.subr.mxu0 %v4818_v0 }
0x1c11   :  { %v2660_v58 = vpop.f32.mrf.mxu1 }
0x1c12   :  { %v2664_v60 = vadd.f32 %v2660_v58, %v5493_v63 }
0x1c13   :  { %v4317_v57 = vpop.f32.mrf.mxu1 }
0x1c14   :  { %4612 = vtanh.f32 %v2664_v60  ;;  %v3902_v5 = vmul.f32 -1.442695, %v2664_v60 }
0x1c21   :  { %v4613_v62 = vpop.eup %4612 }
0x1c22   :  { %2674 = vrot.lane.b32.xlu1 %v4613_v62, %s4820_s0 }
0x1c2f   :  { %v2760_v1 = vpop.f32.mrf.mxu0 }
0x1c30   :  { %v2764_v44 = vadd.f32 %v2760_v1, %v5508_v13 }
0x1c31   :  { %v4328_v17 = vpop.f32.mrf.mxu0 }
0x1c32   :  { %4614 = vtanh.f32 %v2764_v44  ;;  %v3904_v6 = vmul.f32 -1.442695, %v2764_v44 }
0x1c33   :  { %4616 = vpow2.f32 %v3902_v5 }
0x1c3f   :  { %v4615_v19 = vpop.eup %4614 }
0x1c40   :  { %2774 = vrot.lane.b32.xlu0 %v4615_v19, %s4820_s0  ;;  %v4617_v27 = vpop.eup %4616 }
0x1c41   :  { %v2668_v26 = vadd.f32 1.0, %v4617_v27 }
0x1c43   :  { %4618 = vrcp.f32 %v2668_v26 }
0x1c44   :  { %4620 = vpow2.f32 %v3904_v6 }
0x1c50   :  { %v4619_v63 = vpop.eup %4618 }
0x1c51   :  { %v4621_v14 = vpop.eup %4620  ;;  %v2672_v59 = vmul.f32 %v4619_v63, %v5558_v8 }
0x1c52   :  { %v2768_v61 = vadd.f32 1.0, %v4621_v14 }
0x1c54   :  { %4622 = vrcp.f32 %v2768_v61 }
0x1c61   :  { %v4623_v13 = vpop.eup %4622 }
0x1c62   :  { %v2772_v31 = vmul.f32 %v4623_v13, %v5563_v49 }
0x1c94   :  { %v2675_v9 = vpop.permute.xlu1 %2674 }
0x1c95   :  { %v2677_v48 = vmul.f32 %v4619_v63, %v2675_v9 }
0x1c97   :  { %2679 = vrot.lane.b32.xlu1 %v2677_v48, %s4820_s0 }
0x1cb2   :  { %v2775_v40 = vpop.permute.xlu0 %2774 }
0x1cb3   :  { %v2777_v15 = vmul.f32 %v4623_v13, %v2775_v40 }
0x1cb5   :  { %2779 = vrot.lane.b32.xlu0 %v2777_v15, %s4820_s0 }
0x1d09   :  { %v2680_v22 = vpop.permute.xlu1 %2679 }
0x1d0a   :  { %v5598_v25 = vadd.f32 %v2680_v22, %v2672_v59 }
0x1d0c   :  { %4624 = vtanh.f32 %v5598_v25 }
0x1d19   :  { %v4625_v3 = vpop.eup %4624 }
0x1d1a   :  { %2685 = vrot.lane.b32.xlu1 %v4625_v3, %s4820_s0 }
0x1d27   :  { %v2780_v32 = vpop.permute.xlu0 %2779 }
0x1d28   :  { %v5603_v20 = vadd.f32 %v2780_v32, %v2772_v31 }
0x1d2a   :  { %4626 = vtanh.f32 %v5603_v20 }
0x1d37   :  { %v4627_v34 = vpop.eup %4626 }
0x1d38   :  { %2785 = vrot.lane.b32.xlu0 %v4627_v34, %s4820_s0 }
0x1d8c   :  { %v2686_v52 = vpop.permute.xlu1 %2685 }
0x1d8d   :  { %v2688_v36 = vmul.f32 %v4619_v63, %v2686_v52 }
0x1d8f   :  { %2798 = vrot.lane.b32.xlu1 %v2688_v36, %s4821_s2 }
0x1daa   :  { %v2786_v41 = vpop.permute.xlu0 %2785 }
0x1dab   :  { %v2788_v54 = vmul.f32 %v4623_v13, %v2786_v41 }
0x1dad   :  { %2898 = vrot.lane.b32.xlu0 %v2788_v54, %s4821_s2 }
0x1e01   :  { %v2799_v39 = vpop.permute.xlu1 %2798 }
0x1e02   :  { %4338 = vmatmul.mubr.msk.f32.vlgmr.msra.gmra.mxu1 %vm122_vm1, %v2799_v39 }
0x1e03   :  { %4352 = vmatpush3.msra.mxu1 %v5389_v2  ;;  %4359 = vmatprep.mubr.msk.f32.mxu1 %vm4819_vm0, %v4818_v0 }
0x1e04   :  { %4353 = vmatprep.subr.mxu1 %v4818_v0 }
0x1e05   :  { %4354 = vmatpush3.msra.mxu1 %v5393_v21 }
0x1e06   :  { %4355 = vmatprep.subr.mxu1 %v4818_v0 }
0x1e07   :  { %4356 = vmatpush3.msra.mxu1 %v5396_v24 }
0x1e08   :  { %4357 = vmatprep.subr.mxu1 %v4818_v0 }
0x1e09   :  { %4358 = vmatpush3.msra.mxu1 %v5401_v47 }
0x1e0a   :  { %4373 = vmatprep.subr.mxu1 %v4818_v0 }
0x1e1f   :  { %v2899_v8 = vpop.permute.xlu0 %2898 }
0x1e20   :  { %4349 = vmatmul.mubr.msk.f32.vlgmr.msra.gmra.mxu0 %vm122_vm1, %v2899_v8 }
0x1e21   :  { %4363 = vmatpush3.msra.mxu0 %v5419_v33  ;;  %4370 = vmatprep.mubr.msk.f32.mxu0 %vm4819_vm0, %v4818_v0 }
0x1e22   :  { %4364 = vmatprep.subr.mxu0 %v4818_v0 }
0x1e23   :  { %4365 = vmatpush3.msra.mxu0 %v5423_v35 }
0x1e24   :  { %4366 = vmatprep.subr.mxu0 %v4818_v0 }
0x1e25   :  { %4367 = vmatpush3.msra.mxu0 %v5426_v46 }
0x1e26   :  { %4368 = vmatprep.subr.mxu0 %v4818_v0 }
0x1e27   :  { %4369 = vmatpush3.msra.mxu0 %v5431_v38 }
0x1e28   :  { %4384 = vmatprep.subr.mxu0 %v4818_v0 }
0x1ec2   :  { %v2868_v43 = vpop.f32.mrf.mxu1 }
0x1ec3   :  { %v2872_v45 = vadd.f32 %v2868_v43, %v5497_v29 }
0x1ec4   :  { %v4339_v28 = vpop.f32.mrf.mxu1 }
0x1ec5   :  { %4628 = vtanh.f32 %v2872_v45  ;;  %v3906_v37 = vmul.f32 -1.442695, %v2872_v45 }
0x1ed2   :  { %v4629_v49 = vpop.eup %4628 }
0x1ed3   :  { %2882 = vrot.lane.b32.xlu1 %v4629_v49, %s4820_s0 }
0x1ee0   :  { %v2968_v51 = vpop.f32.mrf.mxu0 }
0x1ee1   :  { %v2972_v4 = vadd.f32 %v2968_v51, %v5503_v42 }
0x1ee2   :  { %v4350_v53 = vpop.f32.mrf.mxu0 }
0x1ee3   :  { %4630 = vtanh.f32 %v2972_v4  ;;  %v3908_v58 = vmul.f32 -1.442695, %v2972_v4 }
0x1ee4   :  { %4632 = vpow2.f32 %v3906_v37 }
0x1ef0   :  { %v4631_v50 = vpop.eup %4630 }
0x1ef1   :  { %2982 = vrot.lane.b32.xlu0 %v4631_v50, %s4820_s0  ;;  %v4633_v55 = vpop.eup %4632 }
0x1ef2   :  { %v2876_v56 = vadd.f32 1.0, %v4633_v55 }
0x1ef4   :  { %4634 = vrcp.f32 %v2876_v56 }
0x1ef5   :  { %4636 = vpow2.f32 %v3908_v58 }
0x1f01   :  { %v4635_v29 = vpop.eup %4634 }
0x1f02   :  { %v4637_v62 = vpop.eup %4636  ;;  %v2880_v19 = vmul.f32 %v4635_v29, %v5598_v25 }
0x1f03   :  { %v2976_v1 = vadd.f32 1.0, %v4637_v62 }
0x1f05   :  { %4638 = vrcp.f32 %v2976_v1 }
0x1f12   :  { %v4639_v42 = vpop.eup %4638 }
0x1f13   :  { %v2980_v6 = vmul.f32 %v4639_v42, %v5603_v20 }
0x1f45   :  { %v2883_v60 = vpop.permute.xlu1 %2882 }
0x1f46   :  { %v2885_v57 = vmul.f32 %v4635_v29, %v2883_v60 }
0x1f48   :  { %2887 = vrot.lane.b32.xlu1 %v2885_v57, %s4820_s0 }
0x1f63   :  { %v2983_v44 = vpop.permute.xlu0 %2982 }
0x1f64   :  { %v2985_v17 = vmul.f32 %v4639_v42, %v2983_v44 }
0x1f66   :  { %2987 = vrot.lane.b32.xlu0 %v2985_v17, %s4820_s0 }
0x1fba   :  { %v2888_v5 = vpop.permute.xlu1 %2887 }
0x1fbb   :  { %v5638_v27 = vadd.f32 %v2888_v5, %v2880_v19 }
0x1fbd   :  { %4640 = vtanh.f32 %v5638_v27 }
0x1fca   :  { %v4641_v26 = vpop.eup %4640 }
0x1fcb   :  { %2893 = vrot.lane.b32.xlu1 %v4641_v26, %s4820_s0 }
0x1fd8   :  { %v2988_v63 = vpop.permute.xlu0 %2987 }
0x1fd9   :  { %v5643_v9 = vadd.f32 %v2988_v63, %v2980_v6 }
0x1fdb   :  { %4642 = vtanh.f32 %v5643_v9 }
0x1fe8   :  { %v4643_v48 = vpop.eup %4642 }
0x1fe9   :  { %2993 = vrot.lane.b32.xlu0 %v4643_v48, %s4820_s0 }
0x203d   :  { %v2894_v14 = vpop.permute.xlu1 %2893 }
0x203e   :  { %v2896_v61 = vmul.f32 %v4635_v29, %v2894_v14 }
0x2040   :  { %2998 = vrot.lane.b32.xlu1 %v2896_v61, %s4821_s2 }
0x205b   :  { %v2994_v13 = vpop.permute.xlu0 %2993 }
0x205c   :  { %v2996_v40 = vmul.f32 %v4639_v42, %v2994_v13 }
0x205e   :  { %3098 = vrot.lane.b32.xlu0 %v2996_v40, %s4821_s2 }
0x20b2   :  { %v2999_v15 = vpop.permute.xlu1 %2998 }
0x20b3   :  { %4360 = vmatmul.mubr.msk.f32.vlgmr.msra.gmra.mxu1 %vm122_vm1, %v2999_v15 }
0x20b4   :  { %4374 = vmatpush3.msra.mxu1 %v5389_v2  ;;  %4381 = vmatprep.mubr.msk.f32.mxu1 %vm4819_vm0, %v4818_v0 }
0x20b5   :  { %4375 = vmatprep.subr.mxu1 %v4818_v0 }
0x20b6   :  { %4376 = vmatpush3.msra.mxu1 %v5393_v21 }
0x20b7   :  { %4377 = vmatprep.subr.mxu1 %v4818_v0 }
0x20b8   :  { %4378 = vmatpush3.msra.mxu1 %v5396_v24 }
0x20b9   :  { %4379 = vmatprep.subr.mxu1 %v4818_v0 }
0x20ba   :  { %4380 = vmatpush3.msra.mxu1 %v5401_v47 }
0x20bb   :  { %4395 = vmatprep.subr.mxu1 %v4818_v0 }
0x20d0   :  { %v3099_v59 = vpop.permute.xlu0 %3098 }
0x20d1   :  { %4371 = vmatmul.mubr.msk.f32.vlgmr.msra.gmra.mxu0 %vm122_vm1, %v3099_v59 }
0x20d2   :  { %4385 = vmatpush3.msra.mxu0 %v5419_v33  ;;  %4392 = vmatprep.mubr.msk.f32.mxu0 %vm4819_vm0, %v4818_v0 }
0x20d3   :  { %4386 = vmatprep.subr.mxu0 %v4818_v0 }
0x20d4   :  { %4387 = vmatpush3.msra.mxu0 %v5423_v35 }
0x20d5   :  { %4388 = vmatprep.subr.mxu0 %v4818_v0 }
0x20d6   :  { %4389 = vmatpush3.msra.mxu0 %v5426_v46 }
0x20d7   :  { %4390 = vmatprep.subr.mxu0 %v4818_v0 }
0x20d8   :  { %4391 = vmatpush3.msra.mxu0 %v5431_v38 }
0x20d9   :  { %4406 = vmatprep.subr.mxu0 %v4818_v0 }
0x2173   :  { %v3068_v22 = vpop.f32.mrf.mxu1 }
0x2174   :  { %v3072_v25 = vadd.f32 %v3068_v22, %v5501_v12 }
0x2175   :  { %v4361_v3 = vpop.f32.mrf.mxu1 }
0x2176   :  { %4644 = vtanh.f32 %v3072_v25  ;;  %v3910_v36 = vmul.f32 -1.442695, %v3072_v25 }
0x2183   :  { %v4645_v31 = vpop.eup %4644 }
0x2184   :  { %3082 = vrot.lane.b32.xlu1 %v4645_v31, %s4820_s0 }
0x2191   :  { %v3168_v32 = vpop.f32.mrf.mxu0 }
0x2192   :  { %v3172_v20 = vadd.f32 %v3168_v32, %v5499_v30 }
0x2193   :  { %v4372_v34 = vpop.f32.mrf.mxu0 }
0x2194   :  { %4646 = vtanh.f32 %v3172_v20  ;;  %v3912_v39 = vmul.f32 -1.442695, %v3172_v20 }
0x2195   :  { %4648 = vpow2.f32 %v3910_v36 }
0x21a1   :  { %v4647_v52 = vpop.eup %4646 }
0x21a2   :  { %3182 = vrot.lane.b32.xlu0 %v4647_v52, %s4820_s0  ;;  %v4649_v41 = vpop.eup %4648 }
0x21a3   :  { %v3076_v54 = vadd.f32 1.0, %v4649_v41  ;;  %v4717_v41 = vld [vmem:[#allocation10 + $0x18] sm:$0xff] }
0x21a5   :  { %4650 = vrcp.f32 %v3076_v54  ;;  %v4718_v54 = vld [vmem:[#allocation10 + $0x10] sm:$0xff] }
0x21a6   :  { %4652 = vpow2.f32 %v3912_v39  ;;  %v4719_v39 = vld [vmem:[#allocation10 + $0x8] sm:$0xff] }
0x21b2   :  { %v4651_v12 = vpop.eup %4650 }
0x21b3   :  { %v4653_v45 = vpop.eup %4652  ;;  %v3080_v4 = vmul.f32 %v4651_v12, %v5638_v27 }
0x21b4   :  { %v3176_v28 = vadd.f32 1.0, %v4653_v45  ;;  %v4722_v45 = vld [vmem:[#allocation11 + $0x10] sm:$0xff] }
0x21b6   :  { %4654 = vrcp.f32 %v3176_v28  ;;  %v4723_v28 = vld [vmem:[#allocation11 + $0x8] sm:$0xff] }
0x21c3   :  { %v4655_v30 = vpop.eup %4654 }
0x21c4   :  { %v3180_v55 = vmul.f32 %v4655_v30, %v5643_v9 }
0x21f6   :  { %v3083_v8 = vpop.permute.xlu1 %3082 }
0x21f7   :  { %v3085_v43 = vmul.f32 %v4651_v12, %v3083_v8 }
0x21f9   :  { %3087 = vrot.lane.b32.xlu1 %v3085_v43, %s4820_s0  ;;  %v4721_v43 = vld [vmem:[#allocation11 + $0x18] sm:$0xff] }
0x2214   :  { %v3183_v49 = vpop.permute.xlu0 %3182 }
0x2215   :  { %v3185_v51 = vmul.f32 %v4655_v30, %v3183_v49 }
0x2217   :  { %3187 = vrot.lane.b32.xlu0 %v3185_v51, %s4820_s0 }
0x226b   :  { %v3088_v53 = vpop.permute.xlu1 %3087 }
0x226c   :  { %v5678_v50 = vadd.f32 %v3088_v53, %v3080_v4 }
0x226e   :  { %4656 = vtanh.f32 %v5678_v50 }
0x227b   :  { %v4657_v37 = vpop.eup %4656 }
0x227c   :  { %3093 = vrot.lane.b32.xlu1 %v4657_v37, %s4820_s0 }
0x2289   :  { %v3188_v56 = vpop.permute.xlu0 %3187 }
0x228a   :  { %v5683_v58 = vadd.f32 %v3188_v56, %v3180_v55 }
0x228c   :  { %4658 = vtanh.f32 %v5683_v58 }
0x2299   :  { %v4659_v29 = vpop.eup %4658 }
0x229a   :  { %3193 = vrot.lane.b32.xlu0 %v4659_v29, %s4820_s0 }
0x22ee   :  { %v3094_v60 = vpop.permute.xlu1 %3093 }
0x22ef   :  { %v3096_v57 = vmul.f32 %v4651_v12, %v3094_v60  ;;  %v4720_v12 = vld [vmem:[#allocation10] sm:$0xff] }
0x22f1   :  { %3198 = vrot.lane.b32.xlu1 %v3096_v57, %s4821_s2 }
0x230c   :  { %v3194_v62 = vpop.permute.xlu0 %3193 }
0x230d   :  { %v3196_v1 = vmul.f32 %v4655_v30, %v3194_v62 }
0x230f   :  { %3298 = vrot.lane.b32.xlu0 %v3196_v1, %s4821_s2 }
0x2363   :  { %v3199_v42 = vpop.permute.xlu1 %3198 }
0x2364   :  { %4382 = vmatmul.mubr.msk.f32.vlgmr.msra.gmra.mxu1 %vm122_vm1, %v3199_v42 }
0x2365   :  { %4396 = vmatpush3.msra.mxu1 %v5389_v2  ;;  %4403 = vmatprep.mubr.msk.f32.mxu1 %vm4819_vm0, %v4818_v0 }
0x2366   :  { %4397 = vmatprep.subr.mxu1 %v4818_v0 }
0x2367   :  { %4398 = vmatpush3.msra.mxu1 %v5393_v21 }
0x2368   :  { %4399 = vmatprep.subr.mxu1 %v4818_v0 }
0x2369   :  { %4400 = vmatpush3.msra.mxu1 %v5396_v24 }
0x236a   :  { %4401 = vmatprep.subr.mxu1 %v4818_v0 }
0x236b   :  { %4402 = vmatpush3.msra.mxu1 %v5401_v47 }
0x236c   :  { %4417 = vmatprep.subr.mxu1 %v4818_v0 }
0x2381   :  { %v3299_v44 = vpop.permute.xlu0 %3298 }
0x2382   :  { %4393 = vmatmul.mubr.msk.f32.vlgmr.msra.gmra.mxu0 %vm122_vm1, %v3299_v44 }
0x2383   :  { %4407 = vmatpush3.msra.mxu0 %v5419_v33  ;;  %4414 = vmatprep.mubr.msk.f32.mxu0 %vm4819_vm0, %v4818_v0 }
0x2384   :  { %4408 = vmatprep.subr.mxu0 %v4818_v0 }
0x2385   :  { %4409 = vmatpush3.msra.mxu0 %v5423_v35 }
0x2386   :  { %4410 = vmatprep.subr.mxu0 %v4818_v0 }
0x2387   :  { %4411 = vmatpush3.msra.mxu0 %v5426_v46 }
0x2388   :  { %4412 = vmatprep.subr.mxu0 %v4818_v0 }
0x2389   :  { %4413 = vmatpush3.msra.mxu0 %v5431_v38 }
0x238a   :  { %4428 = vmatprep.subr.mxu0 %v4818_v0 }
0x2424   :  { %v3268_v2 = vpop.f32.mrf.mxu1 }
0x2425   :  { %v3272_v21 = vadd.f32 %v3268_v2, %v5506_v11 }
0x2426   :  { %v4383_v24 = vpop.f32.mrf.mxu1 }
0x2427   :  { %4660 = vtanh.f32 %v3272_v21  ;;  %v3914_v19 = vmul.f32 -1.442695, %v3272_v21 }
0x2434   :  { %v4661_v47 = vpop.eup %4660 }
0x2435   :  { %3282 = vrot.lane.b32.xlu1 %v4661_v47, %s4820_s0 }
0x2442   :  { %v3368_v33 = vpop.f32.mrf.mxu0 }
0x2443   :  { %v3372_v35 = vadd.f32 %v3368_v33, %v5495_v7 }
0x2444   :  { %v4394_v17 = vpop.f32.mrf.mxu0 }
0x2445   :  { %4662 = vtanh.f32 %v3372_v35  ;;  %v3916_v26 = vmul.f32 -1.442695, %v3372_v35 }
0x2446   :  { %4664 = vpow2.f32 %v3914_v19 }
0x2452   :  { %v4663_v46 = vpop.eup %4662 }
0x2453   :  { %3382 = vrot.lane.b32.xlu0 %v4663_v46, %s4820_s0  ;;  %v4665_v5 = vpop.eup %4664 }
0x2454   :  { %v3276_v27 = vadd.f32 1.0, %v4665_v5 }
0x2456   :  { %4666 = vrcp.f32 %v3276_v27 }
0x2457   :  { %4668 = vpow2.f32 %v3916_v26 }
0x2463   :  { %v4667_v11 = vpop.eup %4666 }
0x2464   :  { %v4669_v9 = vpop.eup %4668  ;;  %v3280_v13 = vmul.f32 %v4667_v11, %v5678_v50 }
0x2465   :  { %v3376_v48 = vadd.f32 1.0, %v4669_v9 }
0x2467   :  { %4670 = vrcp.f32 %v3376_v48 }
0x2474   :  { %v4671_v7 = vpop.eup %4670 }
0x2475   :  { %v3380_v22 = vmul.f32 %v4671_v7, %v5683_v58 }
0x24a7   :  { %v3283_v6 = vpop.permute.xlu1 %3282 }
0x24a8   :  { %v3285_v63 = vmul.f32 %v4667_v11, %v3283_v6 }
0x24aa   :  { %3287 = vrot.lane.b32.xlu1 %v3285_v63, %s4820_s0 }
0x24c5   :  { %v3383_v14 = vpop.permute.xlu0 %3382 }
0x24c6   :  { %v3385_v61 = vmul.f32 %v4671_v7, %v3383_v14 }
0x24c8   :  { %3387 = vrot.lane.b32.xlu0 %v3385_v61, %s4820_s0 }
0x251c   :  { %v3288_v40 = vpop.permute.xlu1 %3287 }
0x251d   :  { %v5718_v15 = vadd.f32 %v3288_v40, %v3280_v13 }
0x251f   :  { %4672 = vtanh.f32 %v5718_v15 }
0x252c   :  { %v4673_v59 = vpop.eup %4672 }
0x252d   :  { %3293 = vrot.lane.b32.xlu1 %v4673_v59, %s4820_s0 }
0x253a   :  { %v3388_v25 = vpop.permute.xlu0 %3387 }
0x253b   :  { %v5723_v3 = vadd.f32 %v3388_v25, %v3380_v22 }
0x253d   :  { %4674 = vtanh.f32 %v5723_v3 }
0x254a   :  { %v4675_v31 = vpop.eup %4674 }
0x254b   :  { %3393 = vrot.lane.b32.xlu0 %v4675_v31, %s4820_s0 }
0x259f   :  { %v3294_v32 = vpop.permute.xlu1 %3293 }
0x25a0   :  { %v3296_v20 = vmul.f32 %v4667_v11, %v3294_v32 }
0x25a2   :  { %3398 = vrot.lane.b32.xlu1 %v3296_v20, %s4821_s2 }
0x25bd   :  { %v3394_v34 = vpop.permute.xlu0 %3393 }
0x25be   :  { %v3396_v52 = vmul.f32 %v4671_v7, %v3394_v34 }
0x25c0   :  { %3498 = vrot.lane.b32.xlu0 %v3396_v52, %s4821_s2 }
0x2614   :  { %v3399_v36 = vpop.permute.xlu1 %3398 }
0x2615   :  { %4404 = vmatmul.mubr.msk.f32.vlgmr.msra.gmra.mxu1 %vm122_vm1, %v3399_v36 }
0x2616   :  { %4418 = vmatpush3.msra.mxu1 %v4717_v41  ;;  %4425 = vmatprep.mubr.msk.f32.mxu1 %vm4819_vm0, %v4818_v0 }
0x2617   :  { %4419 = vmatprep.subr.mxu1 %v4818_v0 }
0x2618   :  { %4420 = vmatpush3.msra.mxu1 %v4718_v54 }
0x2619   :  { %4421 = vmatprep.subr.mxu1 %v4818_v0 }
0x261a   :  { %4422 = vmatpush3.msra.mxu1 %v4719_v39 }
0x261b   :  { %4423 = vmatprep.subr.mxu1 %v4818_v0 }
0x261c   :  { %4424 = vmatpush3.msra.mxu1 %v4720_v12 }
0x2632   :  { %v3499_v8 = vpop.permute.xlu0 %3498 }
0x2633   :  { %4415 = vmatmul.mubr.msk.f32.vlgmr.msra.gmra.mxu0 %vm122_vm1, %v3499_v8 }
0x2634   :  { %4429 = vmatpush3.msra.mxu0 %v4721_v43  ;;  %4436 = vmatprep.mubr.msk.f32.mxu0 %vm4819_vm0, %v4818_v0 }
0x2635   :  { %4430 = vmatprep.subr.mxu0 %v4818_v0 }
0x2636   :  { %4431 = vmatpush3.msra.mxu0 %v4722_v45 }
0x2637   :  { %4432 = vmatprep.subr.mxu0 %v4818_v0 }
0x2638   :  { %4433 = vmatpush3.msra.mxu0 %v4723_v28 }
0x2639   :  { %4434 = vmatprep.subr.mxu0 %v4818_v0 }
0x263a   :  { %4435 = vmatpush3.msra.mxu0 %v5431_v38 }
0x26d5   :  { %v3468_v30 = vpop.f32.mrf.mxu1 }
0x26d6   :  { %v3472_v49 = vadd.f32 %v3468_v30, %v5510_v18 }
0x26d7   :  { %v4405_v51 = vpop.f32.mrf.mxu1 }
0x26d8   :  { %4676 = vtanh.f32 %v3472_v49  ;;  %v3918_v56 = vmul.f32 -1.442695, %v3472_v49  ;;  %v3925_v51 = vld [vmem:[%s5786_s9] ss:$0 sm:$0xff] }
0x26e5   :  { %v4677_v4 = vpop.eup %4676 }
0x26e6   :  { %3482 = vrot.lane.b32.xlu1 %v4677_v4, %s4820_s0 }
0x26f3   :  { %v3568_v53 = vpop.f32.mrf.mxu0 }
0x26f4   :  { %v3572_v50 = vadd.f32 %v3568_v53, %v5491_v10 }
0x26f5   :  { %v4416_v37 = vpop.f32.mrf.mxu0 }
0x26f6   :  { %4678 = vtanh.f32 %v3572_v50  ;;  %v3920_v58 = vmul.f32 -1.442695, %v3572_v50 }
0x26f7   :  { %4680 = vpow2.f32 %v3918_v56  ;;  %v3818_v56 = vstv %s5787_s10 }
0x2703   :  { %v4679_v55 = vpop.eup %4678 }
0x2704   :  { %3582 = vrot.lane.b32.xlu0 %v4679_v55, %s4820_s0  ;;  %v4681_v0 = vpop.eup %4680 }
0x2705   :  { %v3476_v38 = vadd.f32 1.0, %v4681_v0 }
0x2707   :  { %4682 = vrcp.f32 %v3476_v38 }
0x2708   :  { %4684 = vpow2.f32 %v3920_v58 }
0x2714   :  { %v4683_v18 = vpop.eup %4682 }
0x2715   :  { %v4685_v57 = vpop.eup %4684  ;;  %v3480_v44 = vmul.f32 %v4683_v18, %v5718_v15 }
0x2716   :  { %v3576_v62 = vadd.f32 1.0, %v4685_v57 }
0x2718   :  { %4686 = vrcp.f32 %v3576_v62 }
0x2725   :  { %v4687_v10 = vpop.eup %4686 }
0x2726   :  { %v3580_v47 = vmul.f32 %v4687_v10, %v5723_v3 }
0x2758   :  { %v3483_v29 = vpop.permute.xlu1 %3482 }
0x2759   :  { %v3485_v60 = vmul.f32 %v4683_v18, %v3483_v29 }
0x275b   :  { %3487 = vrot.lane.b32.xlu1 %v3485_v60, %s4820_s0 }
0x2776   :  { %v3583_v1 = vpop.permute.xlu0 %3582 }
0x2777   :  { %v3585_v42 = vmul.f32 %v4687_v10, %v3583_v1 }
0x2779   :  { %3587 = vrot.lane.b32.xlu0 %v3585_v42, %s4820_s0 }
0x27cd   :  { %v3488_v2 = vpop.permute.xlu1 %3487 }
0x27ce   :  { %v3490_v21 = vadd.f32 %v3488_v2, %v3480_v44 }
0x27d0   :  { %4688 = vtanh.f32 %v3490_v21 }
0x27dd   :  { %v4689_v24 = vpop.eup %4688 }
0x27de   :  { %3493 = vrot.lane.b32.xlu1 %v4689_v24, %s4820_s0 }
0x27eb   :  { %v3588_v33 = vpop.permute.xlu0 %3587 }
0x27ec   :  { %v3590_v35 = vadd.f32 %v3588_v33, %v3580_v47 }
0x27ee   :  { %4690 = vtanh.f32 %v3590_v35 }
0x27fb   :  { %v4691_v17 = vpop.eup %4690 }
0x27fc   :  { %3593 = vrot.lane.b32.xlu0 %v4691_v17, %s4820_s0 }
0x2850   :  { %v3494_v46 = vpop.permute.xlu1 %3493 }
0x2851   :  { %v3496_v19 = vmul.f32 %v4683_v18, %v3494_v46 }
0x2853   :  { %3598 = vrot.lane.b32.xlu1 %v3496_v19, %s4821_s2 }
0x286e   :  { %v3594_v5 = vpop.permute.xlu0 %3593 }
0x286f   :  { %v3596_v27 = vmul.f32 %v4687_v10, %v3594_v5 }
0x2871   :  { %3698 = vrot.lane.b32.xlu0 %v3596_v27, %s4821_s2 }
0x28c5   :  { %v3599_v26 = vpop.permute.xlu1 %3598 }
0x28c6   :  { %4426 = vmatmul.mubr.msk.f32.vlgmr.msra.gmra.mxu1 %vm122_vm1, %v3599_v26 }
0x28e3   :  { %v3699_v11 = vpop.permute.xlu0 %3698 }
0x28e4   :  { %4437 = vmatmul.mubr.msk.f32.vlgmr.msra.gmra.mxu0 %vm122_vm1, %v3699_v11 }
0x2986   :  { %v3668_v6 = vpop.f32.mrf.mxu1 }
0x2987   :  { %v3672_v63 = vadd.f32 %v3668_v6, %v5514_v23 }
0x2988   :  { %v4427_v9 = vpop.f32.mrf.mxu1 }
0x2989   :  { %4692 = vtanh.f32 %v3672_v63  ;;  %v3922_v40 = vmul.f32 -1.442695, %v3672_v63 }
0x2996   :  { %v4693_v48 = vpop.eup %4692 }
0x2997   :  { %3682 = vrot.lane.b32.xlu1 %v4693_v48, %s4820_s0 }
0x29a4   :  { %v3768_v7 = vpop.f32.mrf.mxu0 }
0x29a5   :  { %v3772_v14 = vadd.f32 %v3768_v7, %v5487_v16 }
0x29a6   :  { %v4438_v61 = vpop.f32.mrf.mxu0 }
0x29a7   :  { %4694 = vtanh.f32 %v3772_v14  ;;  %v3924_v22 = vmul.f32 -1.442695, %v3772_v14 }
0x29a8   :  { %4696 = vpow2.f32 %v3922_v40 }
0x29b4   :  { %v4695_v13 = vpop.eup %4694 }
0x29b5   :  { %3782 = vrot.lane.b32.xlu0 %v4695_v13, %s4820_s0  ;;  %v4697_v15 = vpop.eup %4696 }
0x29b6   :  { %v3676_v59 = vadd.f32 1.0, %v4697_v15 }
0x29b8   :  { %4698 = vrcp.f32 %v3676_v59 }
0x29b9   :  { %4700 = vpow2.f32 %v3924_v22 }
0x29c5   :  { %v4699_v23 = vpop.eup %4698 }
0x29c6   :  { %v4701_v31 = vpop.eup %4700  ;;  %v3680_v52 = vmul.f32 %v4699_v23, %v3490_v21 }
0x29c7   :  { %v3776_v32 = vadd.f32 1.0, %v4701_v31 }
0x29c9   :  { %4702 = vrcp.f32 %v3776_v32 }
0x29d6   :  { %v4703_v16 = vpop.eup %4702 }
0x29d7   :  { %v3780_v39 = vmul.f32 %v4703_v16, %v3590_v35 }
0x2a09   :  { %v3683_v25 = vpop.permute.xlu1 %3682 }
0x2a0a   :  { %v3685_v3 = vmul.f32 %v4699_v23, %v3683_v25 }
0x2a0c   :  { %3687 = vrot.lane.b32.xlu1 %v3685_v3, %s4820_s0 }
0x2a27   :  { %v3783_v20 = vpop.permute.xlu0 %3782 }
0x2a28   :  { %v3785_v34 = vmul.f32 %v4703_v16, %v3783_v20 }
0x2a2a   :  { %3787 = vrot.lane.b32.xlu0 %v3785_v34, %s4820_s0 }
0x2a7e   :  { %v3688_v36 = vpop.permute.xlu1 %3687 }
0x2a7f   :  { %v3690_v41 = vadd.f32 %v3688_v36, %v3680_v52 }
0x2a81   :  { %4704 = vtanh.f32 %v3690_v41 }
0x2a8e   :  { %v4705_v54 = vpop.eup %4704 }
0x2a8f   :  { %3693 = vrot.lane.b32.xlu1 %v4705_v54, %s4820_s0 }
0x2a9c   :  { %v3788_v12 = vpop.permute.xlu0 %3787 }
0x2a9d   :  { %v3790_v8 = vadd.f32 %v3788_v12, %v3780_v39 }
0x2a9f   :  { %4706 = vtanh.f32 %v3790_v8 }
0x2aac   :  { %v4707_v43 = vpop.eup %4706 }
0x2aad   :  { %3793 = vrot.lane.b32.xlu0 %v4707_v43, %s4820_s0 }
0x2b01   :  { %v3694_v45 = vpop.permute.xlu1 %3693 }
0x2b02   :  { %v3696_v28 = vmul.f32 %v4699_v23, %v3694_v45 }
0x2b04   :  { %3798 = vrot.lane.b32.xlu1 %v3696_v28, %s4821_s2 }
0x2b1f   :  { %v3794_v30 = vpop.permute.xlu0 %3793 }
0x2b20   :  { %v3796_v49 = vmul.f32 %v4703_v16, %v3794_v30 }
0x2b22   :  { %3802 = vrot.lane.b32.xlu0 %v3796_v49, %s4822_s3 }
0x2b76   :  { %v3799_v4 = vpop.permute.xlu1 %3798 }
0x2b94   :  { %v3803_v53 = vpop.permute.xlu0 %3802 }
0x2b95   :  { %v3805_v50 = vsel %vm122_vm1, %v3799_v4, %v3803_v53 }
0x2b96   :  { %v3813_v37 = vmul.f32 %v3925_v51, %v3805_v50 }
0x2b98   :  { %v3814_v55 = vsel %vm2013_vm3, %v3813_v37, 0.0 }
0x2b99   :  { %3815 = vadd.xlane.f32.xlu1 %v3814_v55 }
0x2c22   :  { %v3816_v0 = vpop.xlane.xlu1 %3815 }
0x2c23   :  { %v3819_v38 = vadd.f32 %v3818_v56, %v3816_v0 }
0x2c25   :  { %v3926_v58 = vmul.f32 -1.442695, %v3819_v38 }
0x2c27   :  { %4708 = vpow2.f32 %v3926_v58 }
0x2c34   :  { %v4709_v18 = vpop.eup %4708 }
0x2c35   :  { %v3823_v29 = vadd.f32 1.0, %v4709_v18 }
0x2c37   :  { %4710 = vrcp.f32 %v3823_v29 }
0x2c44   :  { %v4711_v60 = vpop.eup %4710 }
0x2c45   :  { %3827 = vst.msk [vmem:[%s5788_s11] sm:$0xff] %vm3826_vm4, %v4711_v60 }
0x2c46   :  { %3832 = vsyncpa [#allocation7], 1 }
0x2c47   :  { %3833 = vsyncpa [#allocation9], 1 }
0x2c48   :  { %3834 = vsyncpa [#allocation12], 1 }

</bundles_post_ra>
